<compile_context>
chip_gen: v6e
topology: v6e:2x2x1
jax: 0.10.0
libtpu: 0.0.40
codegen_flags: <defaults>
</compile_context>

<pallas_src>
import functools

import numpy as np
import jax
import jax.numpy as jnp
from jax.experimental import pallas as pl
from jax.experimental.pallas import tpu as pltpu


# ----------------------------------------------------------------------------
# small host-side helpers (all trace-time constants)
# ----------------------------------------------------------------------------
def _round_up(x, m):
    return ((x + m - 1) // m) * m


def _interp_matrix(n_in, n_out):
    # 1-D bilinear interpolation matrix matching F.interpolate(align_corners=True).
    r = np.zeros((n_out, n_in), dtype=np.float32)
    if n_in == 1 or n_out == 1:
        r[:, 0] = 1.0
        return r
    src = np.arange(n_out, dtype=np.float64) * (n_in - 1) / (n_out - 1)
    i0 = np.clip(np.floor(src).astype(np.int64), 0, n_in - 1)
    i1 = np.minimum(i0 + 1, n_in - 1)
    w = (src - i0).astype(np.float32)
    for o in range(n_out):
        r[o, i0[o]] += 1.0 - w[o]
        r[o, i1[o]] += w[o]
    return r


def _cond_in_params(emb, in_w, in_b, t):
    # ConditionalInstanceNorm2d(bias=True): fold IN affine + class embedding into a
    # per-sample, per-channel (scale, shift) pair (tiny XLA gather in the wrapper).
    c = in_w.shape[0]
    e = jnp.take(emb, t, axis=0)                    # (N, 2C)
    gamma, beta = e[:, :c], e[:, c:]
    scale = gamma * in_w[None, :]
    shift = gamma * in_b[None, :] + beta
    n = scale.shape[0]
    return (scale.reshape(n, 1, c).astype(jnp.float32),
            shift.reshape(n, 1, c).astype(jnp.float32))


def _width_mask(m, wp, wo):
    # In-kernel (m,1) mask: 1 at valid width columns, 0 at the width pad.
    # Uses only float ops (floor/mul/sub/compare) so it lowers everywhere; the
    # +0.5 keeps the floor comfortably away from integer boundaries.
    idx = jax.lax.broadcasted_iota(jnp.int32, (m, 1), 0).astype(jnp.float32)
    row = jnp.floor((idx + 0.5) * (1.0 / wp))
    col = idx - row * float(wp)
    return (col < (wo - 0.5)).astype(jnp.float32)


def _tap_offset(t, wp):
    # tap t = dy*3+dx of a 3x3 kernel over the flattened, width-padded plane.
    return (t // 3 + 1) * wp + (t % 3) - 1


# ----------------------------------------------------------------------------
# Kernels
# ----------------------------------------------------------------------------
def _up_block_kernel(xu_ref, sk_ref, sax_ref, hax_ref, sas_ref, has_ref,
                     sb_ref, hb_ref, wax_ref, was_ref, ba_ref, wb_ref, bb_ref,
                     out_ref, pu_ref, ps_ref, pa_ref,
                     *, ho, wo, wp, cx, cs, co, eps, slope):
    # One whole CondUpSample block for one batch element.
    m = ho * wp                       # output rows (padded-width flattened plane)
    r = (ho + 4) * wp                 # padded-buffer rows
    inv_cnt = 1.0 / float(ho * wo)
    mask = _width_mask(m, wp, wo)     # (m, 1)

    # halo rows of the conv pads (scratch is per-core and uninitialised, and the
    # batch axis is "parallel", so init-once on program_id==0 would be unsafe).
    for ref, c in ((pu_ref, cx), (ps_ref, cs), (pa_ref, co)):
        ref[0:2 * wp, :] = jnp.zeros((2 * wp, c), jnp.float32)
        ref[2 * wp + m:r, :] = jnp.zeros((2 * wp, c), jnp.float32)

    def stats(v, msk=None):
        vm = v if msk is None else v * msk
        mu = jnp.sum(vm, axis=0, keepdims=True) * inv_cnt
        var = jnp.sum(vm * v, axis=0, keepdims=True) * inv_cnt - mu * mu
        return mu, jax.lax.rsqrt(jnp.maximum(var, 0.0) + eps)

    # ---- ConditionalInstanceNorm-A on the upsampled half -----------------------
    xu = xu_ref[0].astype(jnp.float32)              # (m, cx); width-pad cols are 0
    mu, rstd = stats(xu)
    sc = sax_ref[0] * rstd
    sh = hax_ref[0] - mu * sc
    pu_ref[2 * wp:2 * wp + m, :] = (xu * sc + sh) * mask

    # ---- ConditionalInstanceNorm-A on the skip half ------------------------------
    sk = sk_ref[0].astype(jnp.float32)              # (m, cs); width-pad cols are 0
    mu, rstd = stats(sk)
    sc = sas_ref[0] * rstd
    sh = has_ref[0] - mu * sc
    ps_ref[2 * wp:2 * wp + m, :] = (sk * sc + sh) * mask

    # ---- convA: per-tap accumulating matmuls, split weights (the channel concat
    # of [upsampled, skip] is never materialised, nor is any im2col buffer).
    acc = jnp.zeros((m, co), jnp.float32) + ba_ref[...]
    for t in range(9):
        off = _tap_offset(t, wp)
        acc = acc + jnp.dot(pu_ref[off:off + m, :].astype(jnp.bfloat16),
                            wax_ref[t], preferred_element_type=jnp.float32)
        acc = acc + jnp.dot(ps_ref[off:off + m, :].astype(jnp.bfloat16),
                            was_ref[t], preferred_element_type=jnp.float32)

    # ---- ConditionalInstanceNorm-B + LeakyReLU -----------------------------------
    mu, rstd = stats(acc, mask)
    sc = sb_ref[0] * rstd
    sh = hb_ref[0] - mu * sc
    h = acc * sc + sh
    h = jnp.where(h >= 0.0, h, slope * h)
    pa_ref[2 * wp:2 * wp + m, :] = h * mask

    # ---- convB: per-tap accumulating matmuls --------------------------------------
    acc = jnp.zeros((m, co), jnp.float32) + bb_ref[...]
    for t in range(9):
        off = _tap_offset(t, wp)
        acc = acc + jnp.dot(pa_ref[off:off + m, :].astype(jnp.bfloat16),
                            wb_ref[t], preferred_element_type=jnp.float32)

    # ---- ConditionalInstanceNorm-B (same shared params) + LeakyReLU ---------------
    mu, rstd = stats(acc, mask)
    sc = sb_ref[0] * rstd
    sh = hb_ref[0] - mu * sc
    h = acc * sc + sh
    h = jnp.where(h >= 0.0, h, slope * h)
    out_ref[0] = (h * mask).astype(out_ref.dtype)   # pads zeroed: safe downstream


def _tail_kernel(xd_ref, y_ref, s1_ref, h1_ref, s2_ref, h2_ref,
                 wy1_ref, by1_ref, wy2_ref, by2_ref, w3x_ref, w3y_ref, b3_ref,
                 out_ref, py_ref, pr_ref, px_ref, pn_ref,
                 *, ho, wo, wp, c4, cr, eps, slope):
    # y residual branch + conv3 over cat([x_d4, y + yr]) for one batch element.
    m = ho * wp
    r = (ho + 4) * wp
    inv_cnt = 1.0 / float(ho * wo)
    mask = _width_mask(m, wp, wo)

    for ref, c in ((py_ref, 1), (pr_ref, cr), (px_ref, c4), (pn_ref, 1)):
        ref[0:2 * wp, :] = jnp.zeros((2 * wp, c), jnp.float32)
        ref[2 * wp + m:r, :] = jnp.zeros((2 * wp, c), jnp.float32)

    def stats(v, msk=None):
        vm = v if msk is None else v * msk
        mu = jnp.sum(vm, axis=0, keepdims=True) * inv_cnt
        var = jnp.sum(vm * v, axis=0, keepdims=True) * inv_cnt - mu * mu
        return mu, jax.lax.rsqrt(jnp.maximum(var, 0.0) + eps)

    yv = y_ref[0]                                   # (m, 1) f32, width-pads zero

    # normalize1 + LeakyReLU -> padded plane
    mu, rstd = stats(yv)
    sc = s1_ref[0] * rstd
    sh = h1_ref[0] - mu * sc
    h = yv * sc + sh
    h = jnp.where(h >= 0.0, h, slope * h)
    py_ref[2 * wp:2 * wp + m, :] = h * mask

    # convy1 (Cin=1): nine VPU broadcast multiply-adds (a K=1 matmul is MXU waste)
    acc = jnp.zeros((m, cr), jnp.float32) + by1_ref[...]
    for t in range(9):
        off = _tap_offset(t, wp)
        acc = acc + py_ref[off:off + m, :] * wy1_ref[t]

    # normalize2 + LeakyReLU -> padded plane
    mu, rstd = stats(acc, mask)
    sc = s2_ref[0] * rstd
    sh = h2_ref[0] - mu * sc
    h = acc * sc + sh
    h = jnp.where(h >= 0.0, h, slope * h)
    pr_ref[2 * wp:2 * wp + m, :] = h * mask

    # convy2 + residual: per-tap accumulating matmuls
    yr = jnp.zeros((m, 1), jnp.float32) + by2_ref[...]
    for t in range(9):
        off = _tap_offset(t, wp)
        yr = yr + jnp.dot(pr_ref[off:off + m, :].astype(jnp.bfloat16),
                          wy2_ref[t], preferred_element_type=jnp.float32)
    ynew = yv + yr

    # conv3 over cat([x_d4, y+yr]): split weights, concat never built.
    px_ref[2 * wp:2 * wp + m, :] = xd_ref[0].astype(jnp.float32) * mask
    pn_ref[2 * wp:2 * wp + m, :] = ynew * mask
    out = jnp.zeros((m, 1), jnp.float32) + b3_ref[...]
    for t in range(9):
        off = _tap_offset(t, wp)
        out = out + jnp.dot(px_ref[off:off + m, :].astype(jnp.bfloat16),
                            w3x_ref[t], preferred_element_type=jnp.float32)
        out = out + pn_ref[off:off + m, :] * w3y_ref[t]
    # width-pad columns of the output are garbage; the wrapper slices them away.
    out_ref[0] = out


# ----------------------------------------------------------------------------
# pallas_call wrappers
# ----------------------------------------------------------------------------
def cond_up_block(x_prev, prev_geom, skip_nchw, blk, t, *, eps=1e-5, slope=0.2):
    n = x_prev.shape[0]
    hi, wi, wpi = prev_geom
    cx = x_prev.shape[-1]
    _, cs, ho, wo = skip_nchw.shape
    co = blk['Co']
    wp = _round_up(wo + 2, 8)
    m = ho * wp
    r = (ho + 4) * wp

    # Full separable align_corners=True bilinear upsample as two tiny einsums on
    # the low-res tensor (replaces the trace-time-unrolled in-kernel row loop).
    xv = x_prev.reshape(n, hi, wpi, cx)[:, :, :wi, :].astype(jnp.float32)
    rh = jnp.asarray(_interp_matrix(hi, ho))                       # (ho, hi)
    rw = jnp.asarray(_interp_matrix(wi, wo))                       # (wo, wi)
    xu = jnp.einsum('ph,nhwc->npwc', rh, xv)
    xu = jnp.einsum('qw,npwc->npqc', rw, xu)
    xu = jnp.pad(xu, ((0, 0), (0, 0), (0, wp - wo), (0, 0)))
    xu = xu.reshape(n, m, cx).astype(jnp.bfloat16)

    sk = jnp.transpose(skip_nchw, (0, 2, 3, 1))
    sk = jnp.pad(sk, ((0, 0), (0, 0), (0, wp - wo), (0, 0)))
    sk = sk.reshape(n, m, cs).astype(jnp.bfloat16)

    sc_a, sh_a = _cond_in_params(blk['embA'], blk['inAw'], blk['inAb'], t)  # (n,1,cx+cs)
    sc_b, sh_b = _cond_in_params(blk['embB'], blk['inBw'], blk['inBb'], t)  # (n,1,co)
    sc_ax, sh_ax = sc_a[:, :, :cx], sh_a[:, :, :cx]
    sc_as, sh_as = sc_a[:, :, cx:], sh_a[:, :, cx:]

    kern = functools.partial(_up_block_kernel, ho=ho, wo=wo, wp=wp,
                             cx=cx, cs=cs, co=co, eps=eps, slope=slope)
    out = pl.pallas_call(
        kern,
        out_shape=jax.ShapeDtypeStruct((n, m, co), jnp.bfloat16),
        grid=(n,),
        in_specs=[
            pl.BlockSpec((1, m, cx), lambda i: (i, 0, 0)),
            pl.BlockSpec((1, m, cs), lambda i: (i, 0, 0)),
            pl.BlockSpec((1, 1, cx), lambda i: (i, 0, 0)),
            pl.BlockSpec((1, 1, cx), lambda i: (i, 0, 0)),
            pl.BlockSpec((1, 1, cs), lambda i: (i, 0, 0)),
            pl.BlockSpec((1, 1, cs), lambda i: (i, 0, 0)),
            pl.BlockSpec((1, 1, co), lambda i: (i, 0, 0)),
            pl.BlockSpec((1, 1, co), lambda i: (i, 0, 0)),
            pl.BlockSpec((9, cx, co), lambda i: (0, 0, 0)),
            pl.BlockSpec((9, cs, co), lambda i: (0, 0, 0)),
            pl.BlockSpec((1, co), lambda i: (0, 0)),
            pl.BlockSpec((9, co, co), lambda i: (0, 0, 0)),
            pl.BlockSpec((1, co), lambda i: (0, 0)),
        ],
        out_specs=pl.BlockSpec((1, m, co), lambda i: (i, 0, 0)),
        scratch_shapes=[pltpu.VMEM((r, cx), jnp.float32),
                        pltpu.VMEM((r, cs), jnp.float32),
                        pltpu.VMEM((r, co), jnp.float32)],
        compiler_params=pltpu.CompilerParams(dimension_semantics=("parallel",)),
    )(xu, sk, sc_ax, sh_ax, sc_as, sh_as, sc_b, sh_b,
      blk['wAx'], blk['wAs'], blk['bA'], blk['wB'], blk['bB'])
    return out, (ho, wo, wp)


def tail_block(x_d4, geom, y_nchw, tl, t, *, eps=1e-5, slope=0.2):
    n = x_d4.shape[0]
    ho, wo, wp = geom
    m = ho * wp
    r = (ho + 4) * wp
    c4 = x_d4.shape[-1]
    cr = tl['Cr']

    yt = jnp.transpose(y_nchw, (0, 2, 3, 1))
    yt = jnp.pad(yt, ((0, 0), (0, 0), (0, wp - wo), (0, 0)))
    yt = yt.reshape(n, m, 1).astype(jnp.float32)

    s1, h1 = _cond_in_params(tl['emb1'], tl['in1w'], tl['in1b'], t)    # (n,1,1)
    s2, h2 = _cond_in_params(tl['emb2'], tl['in2w'], tl['in2b'], t)    # (n,1,cr)

    kern = functools.partial(_tail_kernel, ho=ho, wo=wo, wp=wp, c4=c4, cr=cr,
                             eps=eps, slope=slope)
    out = pl.pallas_call(
        kern,
        out_shape=jax.ShapeDtypeStruct((n, m, 1), jnp.float32),
        grid=(n,),
        in_specs=[
            pl.BlockSpec((1, m, c4), lambda i: (i, 0, 0)),
            pl.BlockSpec((1, m, 1), lambda i: (i, 0, 0)),
            pl.BlockSpec((1, 1, 1), lambda i: (i, 0, 0)),
            pl.BlockSpec((1, 1, 1), lambda i: (i, 0, 0)),
            pl.BlockSpec((1, 1, cr), lambda i: (i, 0, 0)),
            pl.BlockSpec((1, 1, cr), lambda i: (i, 0, 0)),
            pl.BlockSpec((9, 1, cr), lambda i: (0, 0, 0)),
            pl.BlockSpec((1, cr), lambda i: (0, 0)),
            pl.BlockSpec((9, cr, 1), lambda i: (0, 0, 0)),
            pl.BlockSpec((1, 1), lambda i: (0, 0)),
            pl.BlockSpec((9, c4, 1), lambda i: (0, 0, 0)),
            pl.BlockSpec((9, 1, 1), lambda i: (0, 0, 0)),
            pl.BlockSpec((1, 1), lambda i: (0, 0)),
        ],
        out_specs=pl.BlockSpec((1, m, 1), lambda i: (i, 0, 0)),
        scratch_shapes=[pltpu.VMEM((r, 1), jnp.float32),
                        pltpu.VMEM((r, cr), jnp.float32),
                        pltpu.VMEM((r, c4), jnp.float32),
                        pltpu.VMEM((r, 1), jnp.float32)],
        compiler_params=pltpu.CompilerParams(dimension_semantics=("parallel",)),
    )(x_d4, yt, s1, h1, s2, h2,
      tl['wy1'], tl['by1'], tl['wy2'], tl['by2'], tl['w3x'], tl['w3y'], tl['b3'])

    out = out.reshape(n, ho, wp, 1)[:, :, :wo, :]
    return jnp.transpose(out, (0, 3, 1, 2))            # back to NCHW


# ----------------------------------------------------------------------------
# parameters + forward
# ----------------------------------------------------------------------------
def init_cond_decoder_params(key, num_classes, num_features=64, decoder_width=1.0):
    features = int(num_features * decoder_width)
    res_dim = int(32 * decoder_width)
    kit = iter(jax.random.split(key, 48))

    def conv_w(cin, cout, ksz):
        k1, k2 = jax.random.split(next(kit))
        s = 1.0 / np.sqrt(cin * ksz * ksz)
        w = jax.random.uniform(k1, (ksz, ksz, cin, cout), jnp.float32, -s, s)
        b = jax.random.uniform(k2, (cout,), jnp.float32, -s, s)
        return w, b

    def cond_in(c):
        g = jax.random.uniform(next(kit), (num_classes, c), jnp.float32, 0.0, 1.0)
        emb = jnp.concatenate([g, jnp.zeros((num_classes, c), jnp.float32)], axis=1)
        return emb, jnp.ones((c,), jnp.float32), jnp.zeros((c,), jnp.float32)

    p = {}
    w2, b2 = conv_w(num_features, features, 1)
    p['conv2_w'] = w2.reshape(num_features, features)
    p['conv2_b'] = b2.reshape(1, features)

    skip_ch = [256, 128, 64, 64]
    cx_list = [features, features // 2, features // 4, features // 8]
    co_list = [features // 2, features // 4, features // 8, features // 16]
    for bi in range(4):
        cx, cs, co = cx_list[bi], skip_ch[bi], co_list[bi]
        ctot = cx + cs
        wA, bA = conv_w(ctot, co, 3)
        wB, bB = conv_w(co, co, 3)
        embA, inAw, inAb = cond_in(ctot)
        embB, inBw, inBb = cond_in(co)
        # weights pre-packed per tap: (9, Cin, Cout) so kernels slice the
        # leading (untiled) dim -- avoids unaligned packed-sublane weight slices.
        p[f'up{bi + 1}'] = dict(
            Cx=cx, Cs=cs, Co=co,
            wAx=wA[:, :, :cx, :].reshape(9, cx, co).astype(jnp.bfloat16),
            wAs=wA[:, :, cx:, :].reshape(9, cs, co).astype(jnp.bfloat16),
            bA=bA.reshape(1, co),
            wB=wB.reshape(9, co, co).astype(jnp.bfloat16),
            bB=bB.reshape(1, co),
            embA=embA, inAw=inAw, inAb=inAb,
            embB=embB, inBw=inBw, inBb=inBb)

    c4 = features // 16
    wy1, by1 = conv_w(1, res_dim, 3)
    wy2, by2 = conv_w(res_dim, 1, 3)
    w3, b3 = conv_w(c4 + 1, 1, 3)
    emb1, in1w, in1b = cond_in(1)
    emb2, in2w, in2b = cond_in(res_dim)
    p['tail'] = dict(
        C4=c4, Cr=res_dim,
        wy1=wy1.reshape(9, 1, res_dim),                             # f32, VPU path
        by1=by1.reshape(1, res_dim),
        wy2=wy2.reshape(9, res_dim, 1).astype(jnp.bfloat16),
        by2=by2.reshape(1, 1),
        w3x=w3[:, :, :c4, :].reshape(9, c4, 1).astype(jnp.bfloat16),
        w3y=w3[:, :, c4:, :].reshape(9, 1, 1),                      # f32, VPU path
        b3=b3.reshape(1, 1),
        emb1=emb1, in1w=in1w, in1b=in1b, emb2=emb2, in2w=in2w, in2b=in2b)
    return p


def cond_decoder_forward(features, y, t, params):
    x_b0, x_b1, x_b2, x_b3, x_b4 = (features[3], features[4], features[6],
                                    features[8], features[12])
    n, c, h, w = x_b4.shape
    # x_d0 = conv2(relu(x_block4)): a tiny per-pixel 1x1 matmul -> plain XLA.
    xb4 = jnp.transpose(x_b4, (0, 2, 3, 1)).reshape(n, h * w, c)
    x = jnp.dot(jnp.maximum(xb4, 0.0), params['conv2_w']) + params['conv2_b']
    geom = (h, w, w)
    x, geom = cond_up_block(x, geom, x_b3, params['up1'], t)
    x, geom = cond_up_block(x, geom, x_b2, params['up2'], t)
    x, geom = cond_up_block(x, geom, x_b1, params['up3'], t)
    x, geom = cond_up_block(x, geom, x_b0, params['up4'], t)
    return tail_block(x, geom, y, params['tail'], t)


# ----------------------------------------------------------------------------
if __name__ == "__main__":
    N = 2
    NUM_FEATURES = 64
    NUM_CLASSES = 10

    key = jax.random.PRNGKey(0)
    kp, k0, k1, k2, k3, k4, ky, kt = jax.random.split(key, 8)
    params = init_cond_decoder_params(kp, NUM_CLASSES, NUM_FEATURES, 1.0)

    feats = [None] * 13
    feats[3] = jax.random.normal(k0, (N, 64, 32, 32), jnp.float32)           # x_block0
    feats[4] = jax.random.normal(k1, (N, 64, 16, 16), jnp.float32)           # x_block1
    feats[6] = jax.random.normal(k2, (N, 128, 8, 8), jnp.float32)            # x_block2
    feats[8] = jax.random.normal(k3, (N, 256, 4, 4), jnp.float32)            # x_block3
    feats[12] = jax.random.normal(k4, (N, NUM_FEATURES, 2, 2), jnp.float32)  # x_block4
    y = jax.random.normal(ky, (N, 1, 32, 32), jnp.float32)
    t = jax.random.randint(kt, (N,), 0, NUM_CLASSES)

    out = cond_decoder_forward(feats, y, t, params)
    out = jax.block_until_ready(out)
    assert out.shape == (N, 1, 32, 32), out.shape
    assert bool(jnp.all(jnp.isfinite(out)))
    print("KERNEL_OK")
</pallas_src>

<mosaic_0001>
module attributes {stable_mosaic.version = 11 : i64} {
  func.func @_up_block_kernel(%arg0: i32, %arg1: memref<1x32x64xbf16, #tpu.memory_space<vmem>>, %arg2: memref<1x32x256xbf16, #tpu.memory_space<vmem>>, %arg3: memref<1x1x64xf32, #tpu.memory_space<vmem>>, %arg4: memref<1x1x64xf32, #tpu.memory_space<vmem>>, %arg5: memref<1x1x256xf32, #tpu.memory_space<vmem>>, %arg6: memref<1x1x256xf32, #tpu.memory_space<vmem>>, %arg7: memref<1x1x32xf32, #tpu.memory_space<vmem>>, %arg8: memref<1x1x32xf32, #tpu.memory_space<vmem>>, %arg9: memref<9x64x32xbf16, #tpu.memory_space<vmem>>, %arg10: memref<9x256x32xbf16, #tpu.memory_space<vmem>>, %arg11: memref<1x32xf32, #tpu.memory_space<vmem>>, %arg12: memref<9x32x32xbf16, #tpu.memory_space<vmem>>, %arg13: memref<1x32xf32, #tpu.memory_space<vmem>>, %arg14: memref<1x32x32xbf16, #tpu.memory_space<vmem>>, %arg15: memref<64x64xf32, #tpu.memory_space<vmem>>, %arg16: memref<64x256xf32, #tpu.memory_space<vmem>>, %arg17: memref<64x32xf32, #tpu.memory_space<vmem>>) attributes {dimension_semantics = [#tpu.dimension_semantics<parallel>], iteration_bounds = array<i64: 2>, scalar_prefetch = 0 : i64, scratch_operands = 3 : i64, tpu.core_type = #tpu.core_type<tc>, window_params = [{transform_indices = @transform_0, window_bounds = array<i64: 1, 32, 64>}, {transform_indices = @transform_1, window_bounds = array<i64: 1, 32, 256>}, {transform_indices = @transform_2, window_bounds = array<i64: 1, 1, 64>}, {transform_indices = @transform_3, window_bounds = array<i64: 1, 1, 64>}, {transform_indices = @transform_4, window_bounds = array<i64: 1, 1, 256>}, {transform_indices = @transform_5, window_bounds = array<i64: 1, 1, 256>}, {transform_indices = @transform_6, window_bounds = array<i64: 1, 1, 32>}, {transform_indices = @transform_7, window_bounds = array<i64: 1, 1, 32>}, {pipeline_mode = #tpu.pipeline_mode<synchronous>, transform_indices = @transform_8, window_bounds = array<i64: 9, 64, 32>}, {pipeline_mode = #tpu.pipeline_mode<synchronous>, transform_indices = @transform_9, window_bounds = array<i64: 9, 256, 32>}, {pipeline_mode = #tpu.pipeline_mode<synchronous>, transform_indices = @transform_10, window_bounds = array<i64: 1, 32>}, {pipeline_mode = #tpu.pipeline_mode<synchronous>, transform_indices = @transform_11, window_bounds = array<i64: 9, 32, 32>}, {pipeline_mode = #tpu.pipeline_mode<synchronous>, transform_indices = @transform_12, window_bounds = array<i64: 1, 32>}, {transform_indices = @transform_13, window_bounds = array<i64: 1, 32, 32>}]} {
    %0 = tpu.iota {dimensions = array<i32: 0>} : vector<32x1xi32>
    %1 = arith.sitofp %0 : vector<32x1xi32> to vector<32x1xf32>
    %cst = arith.constant 5.000000e-01 : f32
    %2 = vector.broadcast %cst : f32 to vector<32x1xf32>
    %3 = arith.addf %1, %2 : vector<32x1xf32>
    %cst_0 = arith.constant 1.250000e-01 : f32
    %4 = vector.broadcast %cst_0 : f32 to vector<32x1xf32>
    %5 = arith.mulf %3, %4 : vector<32x1xf32>
    %6 = math.floor %5 : vector<32x1xf32>
    %cst_1 = arith.constant 8.000000e+00 : f32
    %7 = vector.broadcast %cst_1 : f32 to vector<32x1xf32>
    %8 = arith.mulf %6, %7 : vector<32x1xf32>
    %9 = arith.subf %1, %8 : vector<32x1xf32>
    %cst_2 = arith.constant 3.500000e+00 : f32
    %10 = vector.broadcast %cst_2 : f32 to vector<32x1xf32>
    %11 = arith.cmpf olt, %9, %10 : vector<32x1xf32>
    %12 = arith.extui %11 : vector<32x1xi1> to vector<32x1xi32>
    %13 = arith.sitofp %12 : vector<32x1xi32> to vector<32x1xf32>
    %cst_3 = arith.constant 0.000000e+00 : f32
    %14 = vector.broadcast %cst_3 : f32 to vector<16x64xf32>
    %c0 = arith.constant 0 : index
    %c0_4 = arith.constant 0 : index
    %15 = vector.load %arg15[%c0, %c0_4] : memref<64x64xf32, #tpu.memory_space<vmem>>, vector<16x64xf32>
    tpu.vector_store %arg15[%c0, %c0_4], %14 {strides = array<i32>} : memref<64x64xf32, #tpu.memory_space<vmem>>, vector<16x64xf32>,
    %cst_5 = arith.constant 0.000000e+00 : f32
    %16 = vector.broadcast %cst_5 : f32 to vector<16x64xf32>
    %c48 = arith.constant 48 : index
    %c0_6 = arith.constant 0 : index
    %17 = vector.load %arg15[%c48, %c0_6] : memref<64x64xf32, #tpu.memory_space<vmem>>, vector<16x64xf32>
    tpu.vector_store %arg15[%c48, %c0_6], %16 {strides = array<i32>} : memref<64x64xf32, #tpu.memory_space<vmem>>, vector<16x64xf32>,
    %cst_7 = arith.constant 0.000000e+00 : f32
    %18 = vector.broadcast %cst_7 : f32 to vector<16x256xf32>
    %c0_8 = arith.constant 0 : index
    %c0_9 = arith.constant 0 : index
    %19 = vector.load %arg16[%c0_8, %c0_9] : memref<64x256xf32, #tpu.memory_space<vmem>>, vector<16x256xf32>
    tpu.vector_store %arg16[%c0_8, %c0_9], %18 {strides = array<i32>} : memref<64x256xf32, #tpu.memory_space<vmem>>, vector<16x256xf32>,
    %cst_10 = arith.constant 0.000000e+00 : f32
    %20 = vector.broadcast %cst_10 : f32 to vector<16x256xf32>
    %c48_11 = arith.constant 48 : index
    %c0_12 = arith.constant 0 : index
    %21 = vector.load %arg16[%c48_11, %c0_12] : memref<64x256xf32, #tpu.memory_space<vmem>>, vector<16x256xf32>
    tpu.vector_store %arg16[%c48_11, %c0_12], %20 {strides = array<i32>} : memref<64x256xf32, #tpu.memory_space<vmem>>, vector<16x256xf32>,
    %cst_13 = arith.constant 0.000000e+00 : f32
    %22 = vector.broadcast %cst_13 : f32 to vector<16x32xf32>
    %c0_14 = arith.constant 0 : index
    %c0_15 = arith.constant 0 : index
    %23 = vector.load %arg17[%c0_14, %c0_15] : memref<64x32xf32, #tpu.memory_space<vmem>>, vector<16x32xf32>
    tpu.vector_store %arg17[%c0_14, %c0_15], %22 {strides = array<i32>} : memref<64x32xf32, #tpu.memory_space<vmem>>, vector<16x32xf32>,
    %cst_16 = arith.constant 0.000000e+00 : f32
    %24 = vector.broadcast %cst_16 : f32 to vector<16x32xf32>
    %c48_17 = arith.constant 48 : index
    %c0_18 = arith.constant 0 : index
    %25 = vector.load %arg17[%c48_17, %c0_18] : memref<64x32xf32, #tpu.memory_space<vmem>>, vector<16x32xf32>
    tpu.vector_store %arg17[%c48_17, %c0_18], %24 {strides = array<i32>} : memref<64x32xf32, #tpu.memory_space<vmem>>, vector<16x32xf32>,
    %c0_19 = arith.constant 0 : index
    %c0_20 = arith.constant 0 : index
    %c0_21 = arith.constant 0 : index
    %26 = vector.load %arg1[%c0_19, %c0_20, %c0_21] : memref<1x32x64xbf16, #tpu.memory_space<vmem>>, vector<1x32x64xbf16>
    %27 = vector.shape_cast %26 : vector<1x32x64xbf16> to vector<32x64xbf16>
    %28 = arith.extf %27 : vector<32x64xbf16> to vector<32x64xf32>
    %cst_22 = arith.constant dense<0.000000e+00> : vector<64xf32>
    %29 = vector.multi_reduction <add>, %28, %cst_22 [0] : vector<32x64xf32> to vector<64xf32>
    %30 = vector.shape_cast %29 : vector<64xf32> to vector<1x64xf32>
    %cst_23 = arith.constant 6.250000e-02 : f32
    %31 = vector.broadcast %cst_23 : f32 to vector<1x64xf32>
    %32 = arith.mulf %30, %31 : vector<1x64xf32>
    %33 = arith.mulf %28, %28 : vector<32x64xf32>
    %cst_24 = arith.constant dense<0.000000e+00> : vector<64xf32>
    %34 = vector.multi_reduction <add>, %33, %cst_24 [0] : vector<32x64xf32> to vector<64xf32>
    %35 = vector.shape_cast %34 : vector<64xf32> to vector<1x64xf32>
    %cst_25 = arith.constant 6.250000e-02 : f32
    %36 = vector.broadcast %cst_25 : f32 to vector<1x64xf32>
    %37 = arith.mulf %35, %36 : vector<1x64xf32>
    %38 = arith.mulf %32, %32 : vector<1x64xf32>
    %39 = arith.subf %37, %38 : vector<1x64xf32>
    %cst_26 = arith.constant 0.000000e+00 : f32
    %40 = vector.broadcast %cst_26 : f32 to vector<1x64xf32>
    %41 = arith.maximumf %39, %40 : vector<1x64xf32>
    %cst_27 = arith.constant 9.99999974E-6 : f32
    %42 = vector.broadcast %cst_27 : f32 to vector<1x64xf32>
    %43 = arith.addf %41, %42 : vector<1x64xf32>
    %44 = math.rsqrt %43 : vector<1x64xf32>
    %c0_28 = arith.constant 0 : index
    %c0_29 = arith.constant 0 : index
    %c0_30 = arith.constant 0 : index
    %45 = vector.load %arg3[%c0_28, %c0_29, %c0_30] : memref<1x1x64xf32, #tpu.memory_space<vmem>>, vector<1x1x64xf32>
    %46 = vector.shape_cast %45 : vector<1x1x64xf32> to vector<1x64xf32>
    %47 = arith.mulf %46, %44 : vector<1x64xf32>
    %c0_31 = arith.constant 0 : index
    %c0_32 = arith.constant 0 : index
    %c0_33 = arith.constant 0 : index
    %48 = vector.load %arg4[%c0_31, %c0_32, %c0_33] : memref<1x1x64xf32, #tpu.memory_space<vmem>>, vector<1x1x64xf32>
    %49 = vector.shape_cast %48 : vector<1x1x64xf32> to vector<1x64xf32>
    %50 = arith.mulf %32, %47 : vector<1x64xf32>
    %51 = arith.subf %49, %50 : vector<1x64xf32>
    %52 = vector.broadcast %47 : vector<1x64xf32> to vector<32x64xf32>
    %53 = arith.mulf %28, %52 : vector<32x64xf32>
    %54 = vector.broadcast %51 : vector<1x64xf32> to vector<32x64xf32>
    %55 = arith.addf %53, %54 : vector<32x64xf32>
    %56 = vector.broadcast %13 : vector<32x1xf32> to vector<32x64xf32>
    %57 = arith.mulf %55, %56 : vector<32x64xf32>
    %c16 = arith.constant 16 : index
    %c0_34 = arith.constant 0 : index
    %58 = vector.load %arg15[%c16, %c0_34] : memref<64x64xf32, #tpu.memory_space<vmem>>, vector<32x64xf32>
    tpu.vector_store %arg15[%c16, %c0_34], %57 {strides = array<i32>} : memref<64x64xf32, #tpu.memory_space<vmem>>, vector<32x64xf32>,
    %c0_35 = arith.constant 0 : index
    %c0_36 = arith.constant 0 : index
    %c0_37 = arith.constant 0 : index
    %59 = vector.load %arg2[%c0_35, %c0_36, %c0_37] : memref<1x32x256xbf16, #tpu.memory_space<vmem>>, vector<1x32x256xbf16>
    %60 = vector.shape_cast %59 : vector<1x32x256xbf16> to vector<32x256xbf16>
    %61 = arith.extf %60 : vector<32x256xbf16> to vector<32x256xf32>
    %cst_38 = arith.constant dense<0.000000e+00> : vector<256xf32>
    %62 = vector.multi_reduction <add>, %61, %cst_38 [0] : vector<32x256xf32> to vector<256xf32>
    %63 = vector.shape_cast %62 : vector<256xf32> to vector<1x256xf32>
    %cst_39 = arith.constant 6.250000e-02 : f32
    %64 = vector.broadcast %cst_39 : f32 to vector<1x256xf32>
    %65 = arith.mulf %63, %64 : vector<1x256xf32>
    %66 = arith.mulf %61, %61 : vector<32x256xf32>
    %cst_40 = arith.constant dense<0.000000e+00> : vector<256xf32>
    %67 = vector.multi_reduction <add>, %66, %cst_40 [0] : vector<32x256xf32> to vector<256xf32>
    %68 = vector.shape_cast %67 : vector<256xf32> to vector<1x256xf32>
    %cst_41 = arith.constant 6.250000e-02 : f32
    %69 = vector.broadcast %cst_41 : f32 to vector<1x256xf32>
    %70 = arith.mulf %68, %69 : vector<1x256xf32>
    %71 = arith.mulf %65, %65 : vector<1x256xf32>
    %72 = arith.subf %70, %71 : vector<1x256xf32>
    %cst_42 = arith.constant 0.000000e+00 : f32
    %73 = vector.broadcast %cst_42 : f32 to vector<1x256xf32>
    %74 = arith.maximumf %72, %73 : vector<1x256xf32>
    %cst_43 = arith.constant 9.99999974E-6 : f32
    %75 = vector.broadcast %cst_43 : f32 to vector<1x256xf32>
    %76 = arith.addf %74, %75 : vector<1x256xf32>
    %77 = math.rsqrt %76 : vector<1x256xf32>
    %c0_44 = arith.constant 0 : index
    %c0_45 = arith.constant 0 : index
    %c0_46 = arith.constant 0 : index
    %78 = vector.load %arg5[%c0_44, %c0_45, %c0_46] : memref<1x1x256xf32, #tpu.memory_space<vmem>>, vector<1x1x256xf32>
    %79 = vector.shape_cast %78 : vector<1x1x256xf32> to vector<1x256xf32>
    %80 = arith.mulf %79, %77 : vector<1x256xf32>
    %c0_47 = arith.constant 0 : index
    %c0_48 = arith.constant 0 : index
    %c0_49 = arith.constant 0 : index
    %81 = vector.load %arg6[%c0_47, %c0_48, %c0_49] : memref<1x1x256xf32, #tpu.memory_space<vmem>>, vector<1x1x256xf32>
    %82 = vector.shape_cast %81 : vector<1x1x256xf32> to vector<1x256xf32>
    %83 = arith.mulf %65, %80 : vector<1x256xf32>
    %84 = arith.subf %82, %83 : vector<1x256xf32>
    %85 = vector.broadcast %80 : vector<1x256xf32> to vector<32x256xf32>
    %86 = arith.mulf %61, %85 : vector<32x256xf32>
    %87 = vector.broadcast %84 : vector<1x256xf32> to vector<32x256xf32>
    %88 = arith.addf %86, %87 : vector<32x256xf32>
    %89 = vector.broadcast %13 : vector<32x1xf32> to vector<32x256xf32>
    %90 = arith.mulf %88, %89 : vector<32x256xf32>
    %c16_50 = arith.constant 16 : index
    %c0_51 = arith.constant 0 : index
    %91 = vector.load %arg16[%c16_50, %c0_51] : memref<64x256xf32, #tpu.memory_space<vmem>>, vector<32x256xf32>
    tpu.vector_store %arg16[%c16_50, %c0_51], %90 {strides = array<i32>} : memref<64x256xf32, #tpu.memory_space<vmem>>, vector<32x256xf32>,
    %cst_52 = arith.constant 0.000000e+00 : f32
    %92 = vector.broadcast %cst_52 : f32 to vector<32x32xf32>
    %c0_53 = arith.constant 0 : index
    %c0_54 = arith.constant 0 : index
    %93 = vector.load %arg11[%c0_53, %c0_54] : memref<1x32xf32, #tpu.memory_space<vmem>>, vector<1x32xf32>
    %94 = vector.broadcast %93 : vector<1x32xf32> to vector<32x32xf32>
    %95 = arith.addf %92, %94 : vector<32x32xf32>
    %c7 = arith.constant 7 : index
    %c0_55 = arith.constant 0 : index
    %96 = vector.load %arg15[%c7, %c0_55] : memref<64x64xf32, #tpu.memory_space<vmem>>, vector<32x64xf32>
    %97 = arith.truncf %96 : vector<32x64xf32> to vector<32x64xbf16>
    %c0_56 = arith.constant 0 : index
    %c0_57 = arith.constant 0 : index
    %c0_58 = arith.constant 0 : index
    %98 = vector.load %arg9[%c0_56, %c0_57, %c0_58] : memref<9x64x32xbf16, #tpu.memory_space<vmem>>, vector<1x64x32xbf16>
    %99 = vector.shape_cast %98 : vector<1x64x32xbf16> to vector<64x32xbf16>
    %cst_59 = arith.constant dense<0.000000e+00> : vector<32x32xf32>
    %100 = tpu.matmul %97, %99, %cst_59 {dimension_numbers = #tpu.dot_dimension_numbers<[1], [0], [0], [1], [0, 0, 1, 1], [], []>} : vector<32x64xbf16>, vector<64x32xbf16>, vector<32x32xf32> -> vector<32x32xf32>
    %101 = arith.addf %95, %100 : vector<32x32xf32>
    %c7_60 = arith.constant 7 : index
    %c0_61 = arith.constant 0 : index
    %102 = vector.load %arg16[%c7_60, %c0_61] : memref<64x256xf32, #tpu.memory_space<vmem>>, vector<32x256xf32>
    %103 = arith.truncf %102 : vector<32x256xf32> to vector<32x256xbf16>
    %c0_62 = arith.constant 0 : index
    %c0_63 = arith.constant 0 : index
    %c0_64 = arith.constant 0 : index
    %104 = vector.load %arg10[%c0_62, %c0_63, %c0_64] : memref<9x256x32xbf16, #tpu.memory_space<vmem>>, vector<1x256x32xbf16>
    %105 = vector.shape_cast %104 : vector<1x256x32xbf16> to vector<256x32xbf16>
    %cst_65 = arith.constant dense<0.000000e+00> : vector<32x32xf32>
    %106 = tpu.matmul %103, %105, %cst_65 {dimension_numbers = #tpu.dot_dimension_numbers<[1], [0], [0], [1], [0, 0, 1, 1], [], []>} : vector<32x256xbf16>, vector<256x32xbf16>, vector<32x32xf32> -> vector<32x32xf32>
    %107 = arith.addf %101, %106 : vector<32x32xf32>
    %c8 = arith.constant 8 : index
    %c0_66 = arith.constant 0 : index
    %108 = vector.load %arg15[%c8, %c0_66] : memref<64x64xf32, #tpu.memory_space<vmem>>, vector<32x64xf32>
    %109 = arith.truncf %108 : vector<32x64xf32> to vector<32x64xbf16>
    %c1 = arith.constant 1 : index
    %c0_67 = arith.constant 0 : index
    %c0_68 = arith.constant 0 : index
    %110 = vector.load %arg9[%c1, %c0_67, %c0_68] : memref<9x64x32xbf16, #tpu.memory_space<vmem>>, vector<1x64x32xbf16>
    %111 = vector.shape_cast %110 : vector<1x64x32xbf16> to vector<64x32xbf16>
    %cst_69 = arith.constant dense<0.000000e+00> : vector<32x32xf32>
    %112 = tpu.matmul %109, %111, %cst_69 {dimension_numbers = #tpu.dot_dimension_numbers<[1], [0], [0], [1], [0, 0, 1, 1], [], []>} : vector<32x64xbf16>, vector<64x32xbf16>, vector<32x32xf32> -> vector<32x32xf32>
    %113 = arith.addf %107, %112 : vector<32x32xf32>
    %c8_70 = arith.constant 8 : index
    %c0_71 = arith.constant 0 : index
    %114 = vector.load %arg16[%c8_70, %c0_71] : memref<64x256xf32, #tpu.memory_space<vmem>>, vector<32x256xf32>
    %115 = arith.truncf %114 : vector<32x256xf32> to vector<32x256xbf16>
    %c1_72 = arith.constant 1 : index
    %c0_73 = arith.constant 0 : index
    %c0_74 = arith.constant 0 : index
    %116 = vector.load %arg10[%c1_72, %c0_73, %c0_74] : memref<9x256x32xbf16, #tpu.memory_space<vmem>>, vector<1x256x32xbf16>
    %117 = vector.shape_cast %116 : vector<1x256x32xbf16> to vector<256x32xbf16>
    %cst_75 = arith.constant dense<0.000000e+00> : vector<32x32xf32>
    %118 = tpu.matmul %115, %117, %cst_75 {dimension_numbers = #tpu.dot_dimension_numbers<[1], [0], [0], [1], [0, 0, 1, 1], [], []>} : vector<32x256xbf16>, vector<256x32xbf16>, vector<32x32xf32> -> vector<32x32xf32>
    %119 = arith.addf %113, %118 : vector<32x32xf32>
    %c9 = arith.constant 9 : index
    %c0_76 = arith.constant 0 : index
    %120 = vector.load %arg15[%c9, %c0_76] : memref<64x64xf32, #tpu.memory_space<vmem>>, vector<32x64xf32>
    %121 = arith.truncf %120 : vector<32x64xf32> to vector<32x64xbf16>
    %c2 = arith.constant 2 : index
    %c0_77 = arith.constant 0 : index
    %c0_78 = arith.constant 0 : index
    %122 = vector.load %arg9[%c2, %c0_77, %c0_78] : memref<9x64x32xbf16, #tpu.memory_space<vmem>>, vector<1x64x32xbf16>
    %123 = vector.shape_cast %122 : vector<1x64x32xbf16> to vector<64x32xbf16>
    %cst_79 = arith.constant dense<0.000000e+00> : vector<32x32xf32>
    %124 = tpu.matmul %121, %123, %cst_79 {dimension_numbers = #tpu.dot_dimension_numbers<[1], [0], [0], [1], [0, 0, 1, 1], [], []>} : vector<32x64xbf16>, vector<64x32xbf16>, vector<32x32xf32> -> vector<32x32xf32>
    %125 = arith.addf %119, %124 : vector<32x32xf32>
    %c9_80 = arith.constant 9 : index
    %c0_81 = arith.constant 0 : index
    %126 = vector.load %arg16[%c9_80, %c0_81] : memref<64x256xf32, #tpu.memory_space<vmem>>, vector<32x256xf32>
    %127 = arith.truncf %126 : vector<32x256xf32> to vector<32x256xbf16>
    %c2_82 = arith.constant 2 : index
    %c0_83 = arith.constant 0 : index
    %c0_84 = arith.constant 0 : index
    %128 = vector.load %arg10[%c2_82, %c0_83, %c0_84] : memref<9x256x32xbf16, #tpu.memory_space<vmem>>, vector<1x256x32xbf16>
    %129 = vector.shape_cast %128 : vector<1x256x32xbf16> to vector<256x32xbf16>
    %cst_85 = arith.constant dense<0.000000e+00> : vector<32x32xf32>
    %130 = tpu.matmul %127, %129, %cst_85 {dimension_numbers = #tpu.dot_dimension_numbers<[1], [0], [0], [1], [0, 0, 1, 1], [], []>} : vector<32x256xbf16>, vector<256x32xbf16>, vector<32x32xf32> -> vector<32x32xf32>
    %131 = arith.addf %125, %130 : vector<32x32xf32>
    %c15 = arith.constant 15 : index
    %c0_86 = arith.constant 0 : index
    %132 = vector.load %arg15[%c15, %c0_86] : memref<64x64xf32, #tpu.memory_space<vmem>>, vector<32x64xf32>
    %133 = arith.truncf %132 : vector<32x64xf32> to vector<32x64xbf16>
    %c3 = arith.constant 3 : index
    %c0_87 = arith.constant 0 : index
    %c0_88 = arith.constant 0 : index
    %134 = vector.load %arg9[%c3, %c0_87, %c0_88] : memref<9x64x32xbf16, #tpu.memory_space<vmem>>, vector<1x64x32xbf16>
    %135 = vector.shape_cast %134 : vector<1x64x32xbf16> to vector<64x32xbf16>
    %cst_89 = arith.constant dense<0.000000e+00> : vector<32x32xf32>
    %136 = tpu.matmul %133, %135, %cst_89 {dimension_numbers = #tpu.dot_dimension_numbers<[1], [0], [0], [1], [0, 0, 1, 1], [], []>} : vector<32x64xbf16>, vector<64x32xbf16>, vector<32x32xf32> -> vector<32x32xf32>
    %137 = arith.addf %131, %136 : vector<32x32xf32>
    %c15_90 = arith.constant 15 : index
    %c0_91 = arith.constant 0 : index
    %138 = vector.load %arg16[%c15_90, %c0_91] : memref<64x256xf32, #tpu.memory_space<vmem>>, vector<32x256xf32>
    %139 = arith.truncf %138 : vector<32x256xf32> to vector<32x256xbf16>
    %c3_92 = arith.constant 3 : index
    %c0_93 = arith.constant 0 : index
    %c0_94 = arith.constant 0 : index
    %140 = vector.load %arg10[%c3_92, %c0_93, %c0_94] : memref<9x256x32xbf16, #tpu.memory_space<vmem>>, vector<1x256x32xbf16>
    %141 = vector.shape_cast %140 : vector<1x256x32xbf16> to vector<256x32xbf16>
    %cst_95 = arith.constant dense<0.000000e+00> : vector<32x32xf32>
    %142 = tpu.matmul %139, %141, %cst_95 {dimension_numbers = #tpu.dot_dimension_numbers<[1], [0], [0], [1], [0, 0, 1, 1], [], []>} : vector<32x256xbf16>, vector<256x32xbf16>, vector<32x32xf32> -> vector<32x32xf32>
    %143 = arith.addf %137, %142 : vector<32x32xf32>
    %c16_96 = arith.constant 16 : index
    %c0_97 = arith.constant 0 : index
    %144 = vector.load %arg15[%c16_96, %c0_97] : memref<64x64xf32, #tpu.memory_space<vmem>>, vector<32x64xf32>
    %145 = arith.truncf %144 : vector<32x64xf32> to vector<32x64xbf16>
    %c4 = arith.constant 4 : index
    %c0_98 = arith.constant 0 : index
    %c0_99 = arith.constant 0 : index
    %146 = vector.load %arg9[%c4, %c0_98, %c0_99] : memref<9x64x32xbf16, #tpu.memory_space<vmem>>, vector<1x64x32xbf16>
    %147 = vector.shape_cast %146 : vector<1x64x32xbf16> to vector<64x32xbf16>
    %cst_100 = arith.constant dense<0.000000e+00> : vector<32x32xf32>
    %148 = tpu.matmul %145, %147, %cst_100 {dimension_numbers = #tpu.dot_dimension_numbers<[1], [0], [0], [1], [0, 0, 1, 1], [], []>} : vector<32x64xbf16>, vector<64x32xbf16>, vector<32x32xf32> -> vector<32x32xf32>
    %149 = arith.addf %143, %148 : vector<32x32xf32>
    %c16_101 = arith.constant 16 : index
    %c0_102 = arith.constant 0 : index
    %150 = vector.load %arg16[%c16_101, %c0_102] : memref<64x256xf32, #tpu.memory_space<vmem>>, vector<32x256xf32>
    %151 = arith.truncf %150 : vector<32x256xf32> to vector<32x256xbf16>
    %c4_103 = arith.constant 4 : index
    %c0_104 = arith.constant 0 : index
    %c0_105 = arith.constant 0 : index
    %152 = vector.load %arg10[%c4_103, %c0_104, %c0_105] : memref<9x256x32xbf16, #tpu.memory_space<vmem>>, vector<1x256x32xbf16>
    %153 = vector.shape_cast %152 : vector<1x256x32xbf16> to vector<256x32xbf16>
    %cst_106 = arith.constant dense<0.000000e+00> : vector<32x32xf32>
    %154 = tpu.matmul %151, %153, %cst_106 {dimension_numbers = #tpu.dot_dimension_numbers<[1], [0], [0], [1], [0, 0, 1, 1], [], []>} : vector<32x256xbf16>, vector<256x32xbf16>, vector<32x32xf32> -> vector<32x32xf32>
    %155 = arith.addf %149, %154 : vector<32x32xf32>
    %c17 = arith.constant 17 : index
    %c0_107 = arith.constant 0 : index
    %156 = vector.load %arg15[%c17, %c0_107] : memref<64x64xf32, #tpu.memory_space<vmem>>, vector<32x64xf32>
    %157 = arith.truncf %156 : vector<32x64xf32> to vector<32x64xbf16>
    %c5 = arith.constant 5 : index
    %c0_108 = arith.constant 0 : index
    %c0_109 = arith.constant 0 : index
    %158 = vector.load %arg9[%c5, %c0_108, %c0_109] : memref<9x64x32xbf16, #tpu.memory_space<vmem>>, vector<1x64x32xbf16>
    %159 = vector.shape_cast %158 : vector<1x64x32xbf16> to vector<64x32xbf16>
    %cst_110 = arith.constant dense<0.000000e+00> : vector<32x32xf32>
    %160 = tpu.matmul %157, %159, %cst_110 {dimension_numbers = #tpu.dot_dimension_numbers<[1], [0], [0], [1], [0, 0, 1, 1], [], []>} : vector<32x64xbf16>, vector<64x32xbf16>, vector<32x32xf32> -> vector<32x32xf32>
    %161 = arith.addf %155, %160 : vector<32x32xf32>
    %c17_111 = arith.constant 17 : index
    %c0_112 = arith.constant 0 : index
    %162 = vector.load %arg16[%c17_111, %c0_112] : memref<64x256xf32, #tpu.memory_space<vmem>>, vector<32x256xf32>
    %163 = arith.truncf %162 : vector<32x256xf32> to vector<32x256xbf16>
    %c5_113 = arith.constant 5 : index
    %c0_114 = arith.constant 0 : index
    %c0_115 = arith.constant 0 : index
    %164 = vector.load %arg10[%c5_113, %c0_114, %c0_115] : memref<9x256x32xbf16, #tpu.memory_space<vmem>>, vector<1x256x32xbf16>
    %165 = vector.shape_cast %164 : vector<1x256x32xbf16> to vector<256x32xbf16>
    %cst_116 = arith.constant dense<0.000000e+00> : vector<32x32xf32>
    %166 = tpu.matmul %163, %165, %cst_116 {dimension_numbers = #tpu.dot_dimension_numbers<[1], [0], [0], [1], [0, 0, 1, 1], [], []>} : vector<32x256xbf16>, vector<256x32xbf16>, vector<32x32xf32> -> vector<32x32xf32>
    %167 = arith.addf %161, %166 : vector<32x32xf32>
    %c23 = arith.constant 23 : index
    %c0_117 = arith.constant 0 : index
    %168 = vector.load %arg15[%c23, %c0_117] : memref<64x64xf32, #tpu.memory_space<vmem>>, vector<32x64xf32>
    %169 = arith.truncf %168 : vector<32x64xf32> to vector<32x64xbf16>
    %c6 = arith.constant 6 : index
    %c0_118 = arith.constant 0 : index
    %c0_119 = arith.constant 0 : index
    %170 = vector.load %arg9[%c6, %c0_118, %c0_119] : memref<9x64x32xbf16, #tpu.memory_space<vmem>>, vector<1x64x32xbf16>
    %171 = vector.shape_cast %170 : vector<1x64x32xbf16> to vector<64x32xbf16>
    %cst_120 = arith.constant dense<0.000000e+00> : vector<32x32xf32>
    %172 = tpu.matmul %169, %171, %cst_120 {dimension_numbers = #tpu.dot_dimension_numbers<[1], [0], [0], [1], [0, 0, 1, 1], [], []>} : vector<32x64xbf16>, vector<64x32xbf16>, vector<32x32xf32> -> vector<32x32xf32>
    %173 = arith.addf %167, %172 : vector<32x32xf32>
    %c23_121 = arith.constant 23 : index
    %c0_122 = arith.constant 0 : index
    %174 = vector.load %arg16[%c23_121, %c0_122] : memref<64x256xf32, #tpu.memory_space<vmem>>, vector<32x256xf32>
    %175 = arith.truncf %174 : vector<32x256xf32> to vector<32x256xbf16>
    %c6_123 = arith.constant 6 : index
    %c0_124 = arith.constant 0 : index
    %c0_125 = arith.constant 0 : index
    %176 = vector.load %arg10[%c6_123, %c0_124, %c0_125] : memref<9x256x32xbf16, #tpu.memory_space<vmem>>, vector<1x256x32xbf16>
    %177 = vector.shape_cast %176 : vector<1x256x32xbf16> to vector<256x32xbf16>
    %cst_126 = arith.constant dense<0.000000e+00> : vector<32x32xf32>
    %178 = tpu.matmul %175, %177, %cst_126 {dimension_numbers = #tpu.dot_dimension_numbers<[1], [0], [0], [1], [0, 0, 1, 1], [], []>} : vector<32x256xbf16>, vector<256x32xbf16>, vector<32x32xf32> -> vector<32x32xf32>
    %179 = arith.addf %173, %178 : vector<32x32xf32>
    %c24 = arith.constant 24 : index
    %c0_127 = arith.constant 0 : index
    %180 = vector.load %arg15[%c24, %c0_127] : memref<64x64xf32, #tpu.memory_space<vmem>>, vector<32x64xf32>
    %181 = arith.truncf %180 : vector<32x64xf32> to vector<32x64xbf16>
    %c7_128 = arith.constant 7 : index
    %c0_129 = arith.constant 0 : index
    %c0_130 = arith.constant 0 : index
    %182 = vector.load %arg9[%c7_128, %c0_129, %c0_130] : memref<9x64x32xbf16, #tpu.memory_space<vmem>>, vector<1x64x32xbf16>
    %183 = vector.shape_cast %182 : vector<1x64x32xbf16> to vector<64x32xbf16>
    %cst_131 = arith.constant dense<0.000000e+00> : vector<32x32xf32>
    %184 = tpu.matmul %181, %183, %cst_131 {dimension_numbers = #tpu.dot_dimension_numbers<[1], [0], [0], [1], [0, 0, 1, 1], [], []>} : vector<32x64xbf16>, vector<64x32xbf16>, vector<32x32xf32> -> vector<32x32xf32>
    %185 = arith.addf %179, %184 : vector<32x32xf32>
    %c24_132 = arith.constant 24 : index
    %c0_133 = arith.constant 0 : index
    %186 = vector.load %arg16[%c24_132, %c0_133] : memref<64x256xf32, #tpu.memory_space<vmem>>, vector<32x256xf32>
    %187 = arith.truncf %186 : vector<32x256xf32> to vector<32x256xbf16>
    %c7_134 = arith.constant 7 : index
    %c0_135 = arith.constant 0 : index
    %c0_136 = arith.constant 0 : index
    %188 = vector.load %arg10[%c7_134, %c0_135, %c0_136] : memref<9x256x32xbf16, #tpu.memory_space<vmem>>, vector<1x256x32xbf16>
    %189 = vector.shape_cast %188 : vector<1x256x32xbf16> to vector<256x32xbf16>
    %cst_137 = arith.constant dense<0.000000e+00> : vector<32x32xf32>
    %190 = tpu.matmul %187, %189, %cst_137 {dimension_numbers = #tpu.dot_dimension_numbers<[1], [0], [0], [1], [0, 0, 1, 1], [], []>} : vector<32x256xbf16>, vector<256x32xbf16>, vector<32x32xf32> -> vector<32x32xf32>
    %191 = arith.addf %185, %190 : vector<32x32xf32>
    %c25 = arith.constant 25 : index
    %c0_138 = arith.constant 0 : index
    %192 = vector.load %arg15[%c25, %c0_138] : memref<64x64xf32, #tpu.memory_space<vmem>>, vector<32x64xf32>
    %193 = arith.truncf %192 : vector<32x64xf32> to vector<32x64xbf16>
    %c8_139 = arith.constant 8 : index
    %c0_140 = arith.constant 0 : index
    %c0_141 = arith.constant 0 : index
    %194 = vector.load %arg9[%c8_139, %c0_140, %c0_141] : memref<9x64x32xbf16, #tpu.memory_space<vmem>>, vector<1x64x32xbf16>
    %195 = vector.shape_cast %194 : vector<1x64x32xbf16> to vector<64x32xbf16>
    %cst_142 = arith.constant dense<0.000000e+00> : vector<32x32xf32>
    %196 = tpu.matmul %193, %195, %cst_142 {dimension_numbers = #tpu.dot_dimension_numbers<[1], [0], [0], [1], [0, 0, 1, 1], [], []>} : vector<32x64xbf16>, vector<64x32xbf16>, vector<32x32xf32> -> vector<32x32xf32>
    %197 = arith.addf %191, %196 : vector<32x32xf32>
    %c25_143 = arith.constant 25 : index
    %c0_144 = arith.constant 0 : index
    %198 = vector.load %arg16[%c25_143, %c0_144] : memref<64x256xf32, #tpu.memory_space<vmem>>, vector<32x256xf32>
    %199 = arith.truncf %198 : vector<32x256xf32> to vector<32x256xbf16>
    %c8_145 = arith.constant 8 : index
    %c0_146 = arith.constant 0 : index
    %c0_147 = arith.constant 0 : index
    %200 = vector.load %arg10[%c8_145, %c0_146, %c0_147] : memref<9x256x32xbf16, #tpu.memory_space<vmem>>, vector<1x256x32xbf16>
    %201 = vector.shape_cast %200 : vector<1x256x32xbf16> to vector<256x32xbf16>
    %cst_148 = arith.constant dense<0.000000e+00> : vector<32x32xf32>
    %202 = tpu.matmul %199, %201, %cst_148 {dimension_numbers = #tpu.dot_dimension_numbers<[1], [0], [0], [1], [0, 0, 1, 1], [], []>} : vector<32x256xbf16>, vector<256x32xbf16>, vector<32x32xf32> -> vector<32x32xf32>
    %203 = arith.addf %197, %202 : vector<32x32xf32>
    %204 = vector.broadcast %13 : vector<32x1xf32> to vector<32x32xf32>
    %205 = arith.mulf %203, %204 : vector<32x32xf32>
    %cst_149 = arith.constant dense<0.000000e+00> : vector<32xf32>
    %206 = vector.multi_reduction <add>, %205, %cst_149 [0] : vector<32x32xf32> to vector<32xf32>
    %207 = vector.shape_cast %206 : vector<32xf32> to vector<1x32xf32>
    %cst_150 = arith.constant 6.250000e-02 : f32
    %208 = vector.broadcast %cst_150 : f32 to vector<1x32xf32>
    %209 = arith.mulf %207, %208 : vector<1x32xf32>
    %210 = arith.mulf %205, %203 : vector<32x32xf32>
    %cst_151 = arith.constant dense<0.000000e+00> : vector<32xf32>
    %211 = vector.multi_reduction <add>, %210, %cst_151 [0] : vector<32x32xf32> to vector<32xf32>
    %212 = vector.shape_cast %211 : vector<32xf32> to vector<1x32xf32>
    %cst_152 = arith.constant 6.250000e-02 : f32
    %213 = vector.broadcast %cst_152 : f32 to vector<1x32xf32>
    %214 = arith.mulf %212, %213 : vector<1x32xf32>
    %215 = arith.mulf %209, %209 : vector<1x32xf32>
    %216 = arith.subf %214, %215 : vector<1x32xf32>
    %cst_153 = arith.constant 0.000000e+00 : f32
    %217 = vector.broadcast %cst_153 : f32 to vector<1x32xf32>
    %218 = arith.maximumf %216, %217 : vector<1x32xf32>
    %cst_154 = arith.constant 9.99999974E-6 : f32
    %219 = vector.broadcast %cst_154 : f32 to vector<1x32xf32>
    %220 = arith.addf %218, %219 : vector<1x32xf32>
    %221 = math.rsqrt %220 : vector<1x32xf32>
    %c0_155 = arith.constant 0 : index
    %c0_156 = arith.constant 0 : index
    %c0_157 = arith.constant 0 : index
    %222 = vector.load %arg7[%c0_155, %c0_156, %c0_157] : memref<1x1x32xf32, #tpu.memory_space<vmem>>, vector<1x1x32xf32>
    %223 = vector.shape_cast %222 : vector<1x1x32xf32> to vector<1x32xf32>
    %224 = arith.mulf %223, %221 : vector<1x32xf32>
    %c0_158 = arith.constant 0 : index
    %c0_159 = arith.constant 0 : index
    %c0_160 = arith.constant 0 : index
    %225 = vector.load %arg8[%c0_158, %c0_159, %c0_160] : memref<1x1x32xf32, #tpu.memory_space<vmem>>, vector<1x1x32xf32>
    %226 = vector.shape_cast %225 : vector<1x1x32xf32> to vector<1x32xf32>
    %227 = arith.mulf %209, %224 : vector<1x32xf32>
    %228 = arith.subf %226, %227 : vector<1x32xf32>
    %229 = vector.broadcast %224 : vector<1x32xf32> to vector<32x32xf32>
    %230 = arith.mulf %203, %229 : vector<32x32xf32>
    %231 = vector.broadcast %228 : vector<1x32xf32> to vector<32x32xf32>
    %232 = arith.addf %230, %231 : vector<32x32xf32>
    %cst_161 = arith.constant 0.000000e+00 : f32
    %233 = vector.broadcast %cst_161 : f32 to vector<32x32xf32>
    %234 = arith.cmpf oge, %232, %233 : vector<32x32xf32>
    %cst_162 = arith.constant 2.000000e-01 : f32
    %235 = vector.broadcast %cst_162 : f32 to vector<32x32xf32>
    %236 = arith.mulf %235, %232 : vector<32x32xf32>
    %237 = arith.select %234, %232, %236 : vector<32x32xi1>, vector<32x32xf32>
    %238 = vector.broadcast %13 : vector<32x1xf32> to vector<32x32xf32>
    %239 = arith.mulf %237, %238 : vector<32x32xf32>
    %c16_163 = arith.constant 16 : index
    %c0_164 = arith.constant 0 : index
    %240 = vector.load %arg17[%c16_163, %c0_164] : memref<64x32xf32, #tpu.memory_space<vmem>>, vector<32x32xf32>
    tpu.vector_store %arg17[%c16_163, %c0_164], %239 {strides = array<i32>} : memref<64x32xf32, #tpu.memory_space<vmem>>, vector<32x32xf32>,
    %cst_165 = arith.constant 0.000000e+00 : f32
    %241 = vector.broadcast %cst_165 : f32 to vector<32x32xf32>
    %c0_166 = arith.constant 0 : index
    %c0_167 = arith.constant 0 : index
    %242 = vector.load %arg13[%c0_166, %c0_167] : memref<1x32xf32, #tpu.memory_space<vmem>>, vector<1x32xf32>
    %243 = vector.broadcast %242 : vector<1x32xf32> to vector<32x32xf32>
    %244 = arith.addf %241, %243 : vector<32x32xf32>
    %c7_168 = arith.constant 7 : index
    %c0_169 = arith.constant 0 : index
    %245 = vector.load %arg17[%c7_168, %c0_169] : memref<64x32xf32, #tpu.memory_space<vmem>>, vector<32x32xf32>
    %246 = arith.truncf %245 : vector<32x32xf32> to vector<32x32xbf16>
    %c0_170 = arith.constant 0 : index
    %c0_171 = arith.constant 0 : index
    %c0_172 = arith.constant 0 : index
    %247 = vector.load %arg12[%c0_170, %c0_171, %c0_172] : memref<9x32x32xbf16, #tpu.memory_space<vmem>>, vector<1x32x32xbf16>
    %248 = vector.shape_cast %247 : vector<1x32x32xbf16> to vector<32x32xbf16>
    %cst_173 = arith.constant dense<0.000000e+00> : vector<32x32xf32>
    %249 = tpu.matmul %246, %248, %cst_173 {dimension_numbers = #tpu.dot_dimension_numbers<[1], [0], [0], [1], [0, 0, 1, 1], [], []>} : vector<32x32xbf16>, vector<32x32xbf16>, vector<32x32xf32> -> vector<32x32xf32>
    %250 = arith.addf %244, %249 : vector<32x32xf32>
    %c8_174 = arith.constant 8 : index
    %c0_175 = arith.constant 0 : index
    %251 = vector.load %arg17[%c8_174, %c0_175] : memref<64x32xf32, #tpu.memory_space<vmem>>, vector<32x32xf32>
    %252 = arith.truncf %251 : vector<32x32xf32> to vector<32x32xbf16>
    %c1_176 = arith.constant 1 : index
    %c0_177 = arith.constant 0 : index
    %c0_178 = arith.constant 0 : index
    %253 = vector.load %arg12[%c1_176, %c0_177, %c0_178] : memref<9x32x32xbf16, #tpu.memory_space<vmem>>, vector<1x32x32xbf16>
    %254 = vector.shape_cast %253 : vector<1x32x32xbf16> to vector<32x32xbf16>
    %cst_179 = arith.constant dense<0.000000e+00> : vector<32x32xf32>
    %255 = tpu.matmul %252, %254, %cst_179 {dimension_numbers = #tpu.dot_dimension_numbers<[1], [0], [0], [1], [0, 0, 1, 1], [], []>} : vector<32x32xbf16>, vector<32x32xbf16>, vector<32x32xf32> -> vector<32x32xf32>
    %256 = arith.addf %250, %255 : vector<32x32xf32>
    %c9_180 = arith.constant 9 : index
    %c0_181 = arith.constant 0 : index
    %257 = vector.load %arg17[%c9_180, %c0_181] : memref<64x32xf32, #tpu.memory_space<vmem>>, vector<32x32xf32>
    %258 = arith.truncf %257 : vector<32x32xf32> to vector<32x32xbf16>
    %c2_182 = arith.constant 2 : index
    %c0_183 = arith.constant 0 : index
    %c0_184 = arith.constant 0 : index
    %259 = vector.load %arg12[%c2_182, %c0_183, %c0_184] : memref<9x32x32xbf16, #tpu.memory_space<vmem>>, vector<1x32x32xbf16>
    %260 = vector.shape_cast %259 : vector<1x32x32xbf16> to vector<32x32xbf16>
    %cst_185 = arith.constant dense<0.000000e+00> : vector<32x32xf32>
    %261 = tpu.matmul %258, %260, %cst_185 {dimension_numbers = #tpu.dot_dimension_numbers<[1], [0], [0], [1], [0, 0, 1, 1], [], []>} : vector<32x32xbf16>, vector<32x32xbf16>, vector<32x32xf32> -> vector<32x32xf32>
    %262 = arith.addf %256, %261 : vector<32x32xf32>
    %c15_186 = arith.constant 15 : index
    %c0_187 = arith.constant 0 : index
    %263 = vector.load %arg17[%c15_186, %c0_187] : memref<64x32xf32, #tpu.memory_space<vmem>>, vector<32x32xf32>
    %264 = arith.truncf %263 : vector<32x32xf32> to vector<32x32xbf16>
    %c3_188 = arith.constant 3 : index
    %c0_189 = arith.constant 0 : index
    %c0_190 = arith.constant 0 : index
    %265 = vector.load %arg12[%c3_188, %c0_189, %c0_190] : memref<9x32x32xbf16, #tpu.memory_space<vmem>>, vector<1x32x32xbf16>
    %266 = vector.shape_cast %265 : vector<1x32x32xbf16> to vector<32x32xbf16>
    %cst_191 = arith.constant dense<0.000000e+00> : vector<32x32xf32>
    %267 = tpu.matmul %264, %266, %cst_191 {dimension_numbers = #tpu.dot_dimension_numbers<[1], [0], [0], [1], [0, 0, 1, 1], [], []>} : vector<32x32xbf16>, vector<32x32xbf16>, vector<32x32xf32> -> vector<32x32xf32>
    %268 = arith.addf %262, %267 : vector<32x32xf32>
    %c16_192 = arith.constant 16 : index
    %c0_193 = arith.constant 0 : index
    %269 = vector.load %arg17[%c16_192, %c0_193] : memref<64x32xf32, #tpu.memory_space<vmem>>, vector<32x32xf32>
    %270 = arith.truncf %269 : vector<32x32xf32> to vector<32x32xbf16>
    %c4_194 = arith.constant 4 : index
    %c0_195 = arith.constant 0 : index
    %c0_196 = arith.constant 0 : index
    %271 = vector.load %arg12[%c4_194, %c0_195, %c0_196] : memref<9x32x32xbf16, #tpu.memory_space<vmem>>, vector<1x32x32xbf16>
    %272 = vector.shape_cast %271 : vector<1x32x32xbf16> to vector<32x32xbf16>
    %cst_197 = arith.constant dense<0.000000e+00> : vector<32x32xf32>
    %273 = tpu.matmul %270, %272, %cst_197 {dimension_numbers = #tpu.dot_dimension_numbers<[1], [0], [0], [1], [0, 0, 1, 1], [], []>} : vector<32x32xbf16>, vector<32x32xbf16>, vector<32x32xf32> -> vector<32x32xf32>
    %274 = arith.addf %268, %273 : vector<32x32xf32>
    %c17_198 = arith.constant 17 : index
    %c0_199 = arith.constant 0 : index
    %275 = vector.load %arg17[%c17_198, %c0_199] : memref<64x32xf32, #tpu.memory_space<vmem>>, vector<32x32xf32>
    %276 = arith.truncf %275 : vector<32x32xf32> to vector<32x32xbf16>
    %c5_200 = arith.constant 5 : index
    %c0_201 = arith.constant 0 : index
    %c0_202 = arith.constant 0 : index
    %277 = vector.load %arg12[%c5_200, %c0_201, %c0_202] : memref<9x32x32xbf16, #tpu.memory_space<vmem>>, vector<1x32x32xbf16>
    %278 = vector.shape_cast %277 : vector<1x32x32xbf16> to vector<32x32xbf16>
    %cst_203 = arith.constant dense<0.000000e+00> : vector<32x32xf32>
    %279 = tpu.matmul %276, %278, %cst_203 {dimension_numbers = #tpu.dot_dimension_numbers<[1], [0], [0], [1], [0, 0, 1, 1], [], []>} : vector<32x32xbf16>, vector<32x32xbf16>, vector<32x32xf32> -> vector<32x32xf32>
    %280 = arith.addf %274, %279 : vector<32x32xf32>
    %c23_204 = arith.constant 23 : index
    %c0_205 = arith.constant 0 : index
    %281 = vector.load %arg17[%c23_204, %c0_205] : memref<64x32xf32, #tpu.memory_space<vmem>>, vector<32x32xf32>
    %282 = arith.truncf %281 : vector<32x32xf32> to vector<32x32xbf16>
    %c6_206 = arith.constant 6 : index
    %c0_207 = arith.constant 0 : index
    %c0_208 = arith.constant 0 : index
    %283 = vector.load %arg12[%c6_206, %c0_207, %c0_208] : memref<9x32x32xbf16, #tpu.memory_space<vmem>>, vector<1x32x32xbf16>
    %284 = vector.shape_cast %283 : vector<1x32x32xbf16> to vector<32x32xbf16>
    %cst_209 = arith.constant dense<0.000000e+00> : vector<32x32xf32>
    %285 = tpu.matmul %282, %284, %cst_209 {dimension_numbers = #tpu.dot_dimension_numbers<[1], [0], [0], [1], [0, 0, 1, 1], [], []>} : vector<32x32xbf16>, vector<32x32xbf16>, vector<32x32xf32> -> vector<32x32xf32>
    %286 = arith.addf %280, %285 : vector<32x32xf32>
    %c24_210 = arith.constant 24 : index
    %c0_211 = arith.constant 0 : index
    %287 = vector.load %arg17[%c24_210, %c0_211] : memref<64x32xf32, #tpu.memory_space<vmem>>, vector<32x32xf32>
    %288 = arith.truncf %287 : vector<32x32xf32> to vector<32x32xbf16>
    %c7_212 = arith.constant 7 : index
    %c0_213 = arith.constant 0 : index
    %c0_214 = arith.constant 0 : index
    %289 = vector.load %arg12[%c7_212, %c0_213, %c0_214] : memref<9x32x32xbf16, #tpu.memory_space<vmem>>, vector<1x32x32xbf16>
    %290 = vector.shape_cast %289 : vector<1x32x32xbf16> to vector<32x32xbf16>
    %cst_215 = arith.constant dense<0.000000e+00> : vector<32x32xf32>
    %291 = tpu.matmul %288, %290, %cst_215 {dimension_numbers = #tpu.dot_dimension_numbers<[1], [0], [0], [1], [0, 0, 1, 1], [], []>} : vector<32x32xbf16>, vector<32x32xbf16>, vector<32x32xf32> -> vector<32x32xf32>
    %292 = arith.addf %286, %291 : vector<32x32xf32>
    %c25_216 = arith.constant 25 : index
    %c0_217 = arith.constant 0 : index
    %293 = vector.load %arg17[%c25_216, %c0_217] : memref<64x32xf32, #tpu.memory_space<vmem>>, vector<32x32xf32>
    %294 = arith.truncf %293 : vector<32x32xf32> to vector<32x32xbf16>
    %c8_218 = arith.constant 8 : index
    %c0_219 = arith.constant 0 : index
    %c0_220 = arith.constant 0 : index
    %295 = vector.load %arg12[%c8_218, %c0_219, %c0_220] : memref<9x32x32xbf16, #tpu.memory_space<vmem>>, vector<1x32x32xbf16>
    %296 = vector.shape_cast %295 : vector<1x32x32xbf16> to vector<32x32xbf16>
    %cst_221 = arith.constant dense<0.000000e+00> : vector<32x32xf32>
    %297 = tpu.matmul %294, %296, %cst_221 {dimension_numbers = #tpu.dot_dimension_numbers<[1], [0], [0], [1], [0, 0, 1, 1], [], []>} : vector<32x32xbf16>, vector<32x32xbf16>, vector<32x32xf32> -> vector<32x32xf32>
    %298 = arith.addf %292, %297 : vector<32x32xf32>
    %299 = vector.broadcast %13 : vector<32x1xf32> to vector<32x32xf32>
    %300 = arith.mulf %298, %299 : vector<32x32xf32>
    %cst_222 = arith.constant dense<0.000000e+00> : vector<32xf32>
    %301 = vector.multi_reduction <add>, %300, %cst_222 [0] : vector<32x32xf32> to vector<32xf32>
    %302 = vector.shape_cast %301 : vector<32xf32> to vector<1x32xf32>
    %cst_223 = arith.constant 6.250000e-02 : f32
    %303 = vector.broadcast %cst_223 : f32 to vector<1x32xf32>
    %304 = arith.mulf %302, %303 : vector<1x32xf32>
    %305 = arith.mulf %300, %298 : vector<32x32xf32>
    %cst_224 = arith.constant dense<0.000000e+00> : vector<32xf32>
    %306 = vector.multi_reduction <add>, %305, %cst_224 [0] : vector<32x32xf32> to vector<32xf32>
    %307 = vector.shape_cast %306 : vector<32xf32> to vector<1x32xf32>
    %cst_225 = arith.constant 6.250000e-02 : f32
    %308 = vector.broadcast %cst_225 : f32 to vector<1x32xf32>
    %309 = arith.mulf %307, %308 : vector<1x32xf32>
    %310 = arith.mulf %304, %304 : vector<1x32xf32>
    %311 = arith.subf %309, %310 : vector<1x32xf32>
    %cst_226 = arith.constant 0.000000e+00 : f32
    %312 = vector.broadcast %cst_226 : f32 to vector<1x32xf32>
    %313 = arith.maximumf %311, %312 : vector<1x32xf32>
    %cst_227 = arith.constant 9.99999974E-6 : f32
    %314 = vector.broadcast %cst_227 : f32 to vector<1x32xf32>
    %315 = arith.addf %313, %314 : vector<1x32xf32>
    %316 = math.rsqrt %315 : vector<1x32xf32>
    %c0_228 = arith.constant 0 : index
    %c0_229 = arith.constant 0 : index
    %c0_230 = arith.constant 0 : index
    %317 = vector.load %arg7[%c0_228, %c0_229, %c0_230] : memref<1x1x32xf32, #tpu.memory_space<vmem>>, vector<1x1x32xf32>
    %318 = vector.shape_cast %317 : vector<1x1x32xf32> to vector<1x32xf32>
    %319 = arith.mulf %318, %316 : vector<1x32xf32>
    %c0_231 = arith.constant 0 : index
    %c0_232 = arith.constant 0 : index
    %c0_233 = arith.constant 0 : index
    %320 = vector.load %arg8[%c0_231, %c0_232, %c0_233] : memref<1x1x32xf32, #tpu.memory_space<vmem>>, vector<1x1x32xf32>
    %321 = vector.shape_cast %320 : vector<1x1x32xf32> to vector<1x32xf32>
    %322 = arith.mulf %304, %319 : vector<1x32xf32>
    %323 = arith.subf %321, %322 : vector<1x32xf32>
    %324 = vector.broadcast %319 : vector<1x32xf32> to vector<32x32xf32>
    %325 = arith.mulf %298, %324 : vector<32x32xf32>
    %326 = vector.broadcast %323 : vector<1x32xf32> to vector<32x32xf32>
    %327 = arith.addf %325, %326 : vector<32x32xf32>
    %cst_234 = arith.constant 0.000000e+00 : f32
    %328 = vector.broadcast %cst_234 : f32 to vector<32x32xf32>
    %329 = arith.cmpf oge, %327, %328 : vector<32x32xf32>
    %cst_235 = arith.constant 2.000000e-01 : f32
    %330 = vector.broadcast %cst_235 : f32 to vector<32x32xf32>
    %331 = arith.mulf %330, %327 : vector<32x32xf32>
    %332 = arith.select %329, %327, %331 : vector<32x32xi1>, vector<32x32xf32>
    %333 = vector.broadcast %13 : vector<32x1xf32> to vector<32x32xf32>
    %334 = arith.mulf %332, %333 : vector<32x32xf32>
    %335 = arith.truncf %334 : vector<32x32xf32> to vector<32x32xbf16>
    %c0_236 = arith.constant 0 : index
    %c0_237 = arith.constant 0 : index
    %c0_238 = arith.constant 0 : index
    %336 = vector.load %arg14[%c0_236, %c0_237, %c0_238] : memref<1x32x32xbf16, #tpu.memory_space<vmem>>, vector<1x32x32xbf16>
    %337 = vector.shape_cast %336 : vector<1x32x32xbf16> to vector<32x32xbf16>
    %338 = vector.shape_cast %335 : vector<32x32xbf16> to vector<1x32x32xbf16>
    tpu.vector_store %arg14[%c0_236, %c0_237, %c0_238], %338 {strides = array<i32>} : memref<1x32x32xbf16, #tpu.memory_space<vmem>>, vector<1x32x32xbf16>,
    return
  }
  func.func @transform_0(%arg0: i32) -> (i32, i32, i32) {
    %c0_i32 = arith.constant 0 : i32
    %c0_i32_0 = arith.constant 0 : i32
    %c0_i32_1 = arith.constant 0 : i32
    return %arg0, %c0_i32, %c0_i32_0 : i32, i32, i32
  }
  func.func @transform_1(%arg0: i32) -> (i32, i32, i32) {
    %c0_i32 = arith.constant 0 : i32
    %c0_i32_0 = arith.constant 0 : i32
    %c0_i32_1 = arith.constant 0 : i32
    return %arg0, %c0_i32, %c0_i32_0 : i32, i32, i32
  }
  func.func @transform_2(%arg0: i32) -> (i32, i32, i32) {
    %c0_i32 = arith.constant 0 : i32
    %c0_i32_0 = arith.constant 0 : i32
    %c0_i32_1 = arith.constant 0 : i32
    return %arg0, %c0_i32, %c0_i32_0 : i32, i32, i32
  }
  func.func @transform_3(%arg0: i32) -> (i32, i32, i32) {
    %c0_i32 = arith.constant 0 : i32
    %c0_i32_0 = arith.constant 0 : i32
    %c0_i32_1 = arith.constant 0 : i32
    return %arg0, %c0_i32, %c0_i32_0 : i32, i32, i32
  }
  func.func @transform_4(%arg0: i32) -> (i32, i32, i32) {
    %c0_i32 = arith.constant 0 : i32
    %c0_i32_0 = arith.constant 0 : i32
    %c0_i32_1 = arith.constant 0 : i32
    return %arg0, %c0_i32, %c0_i32_0 : i32, i32, i32
  }
  func.func @transform_5(%arg0: i32) -> (i32, i32, i32) {
    %c0_i32 = arith.constant 0 : i32
    %c0_i32_0 = arith.constant 0 : i32
    %c0_i32_1 = arith.constant 0 : i32
    return %arg0, %c0_i32, %c0_i32_0 : i32, i32, i32
  }
  func.func @transform_6(%arg0: i32) -> (i32, i32, i32) {
    %c0_i32 = arith.constant 0 : i32
    %c0_i32_0 = arith.constant 0 : i32
    %c0_i32_1 = arith.constant 0 : i32
    return %arg0, %c0_i32, %c0_i32_0 : i32, i32, i32
  }
  func.func @transform_7(%arg0: i32) -> (i32, i32, i32) {
    %c0_i32 = arith.constant 0 : i32
    %c0_i32_0 = arith.constant 0 : i32
    %c0_i32_1 = arith.constant 0 : i32
    return %arg0, %c0_i32, %c0_i32_0 : i32, i32, i32
  }
  func.func @transform_8(%arg0: i32) -> (i32, i32, i32) {
    %c0_i32 = arith.constant 0 : i32
    %c0_i32_0 = arith.constant 0 : i32
    %c0_i32_1 = arith.constant 0 : i32
    %c0_i32_2 = arith.constant 0 : i32
    return %c0_i32, %c0_i32_0, %c0_i32_1 : i32, i32, i32
  }
  func.func @transform_9(%arg0: i32) -> (i32, i32, i32) {
    %c0_i32 = arith.constant 0 : i32
    %c0_i32_0 = arith.constant 0 : i32
    %c0_i32_1 = arith.constant 0 : i32
    %c0_i32_2 = arith.constant 0 : i32
    return %c0_i32, %c0_i32_0, %c0_i32_1 : i32, i32, i32
  }
  func.func @transform_10(%arg0: i32) -> (i32, i32) {
    %c0_i32 = arith.constant 0 : i32
    %c0_i32_0 = arith.constant 0 : i32
    %c0_i32_1 = arith.constant 0 : i32
    return %c0_i32, %c0_i32_0 : i32, i32
  }
  func.func @transform_11(%arg0: i32) -> (i32, i32, i32) {
    %c0_i32 = arith.constant 0 : i32
    %c0_i32_0 = arith.constant 0 : i32
    %c0_i32_1 = arith.constant 0 : i32
    %c0_i32_2 = arith.constant 0 : i32
    return %c0_i32, %c0_i32_0, %c0_i32_1 : i32, i32, i32
  }
  func.func @transform_12(%arg0: i32) -> (i32, i32) {
    %c0_i32 = arith.constant 0 : i32
    %c0_i32_0 = arith.constant 0 : i32
    %c0_i32_1 = arith.constant 0 : i32
    return %c0_i32, %c0_i32_0 : i32, i32
  }
  func.func @transform_13(%arg0: i32) -> (i32, i32, i32) {
    %c0_i32 = arith.constant 0 : i32
    %c0_i32_0 = arith.constant 0 : i32
    %c0_i32_1 = arith.constant 0 : i32
    return %arg0, %c0_i32, %c0_i32_0 : i32, i32, i32
  }
}

</mosaic_0001>

<bundles_post_ra>
// kernel: tpu_custom_call.1
= control target key start
LH: loop header
LB: loop body
LE: loop exit
PB: predicated region body
PF: predicated region fallthrough
CT: control target
= control target key end

     0   :  { %18 = vsyncpa [#allocation6], 0  ;;  %s7859_s0 = inlined_call_operand.vmem [shape: bf16[2,32,64], index: 0, kind: input, shape index: {}]   ;;  %s7860_s1 = inlined_call_operand.vmem [shape: bf16[2,32,256], index: 1, kind: input, shape index: {}]   ;;  %s7861_s2 = inlined_call_operand.vmem [shape: f32[2,1,64], index: 2, kind: input, shape index: {}]   ;;  %s7862_s3 = inlined_call_operand.vmem [shape: f32[2,1,64], index: 3, kind: input, shape index: {}]   ;;  %s7863_s4 = inlined_call_operand.vmem [shape: f32[2,1,256], index: 4, kind: input, shape index: {}]   ;;  %s7864_s5 = inlined_call_operand.vmem [shape: f32[2,1,256], index: 5, kind: input, shape index: {}]   ;;  %s7865_s6 = inlined_call_operand.vmem [shape: f32[2,1,32], index: 6, kind: input, shape index: {}]   ;;  %s7866_s7 = inlined_call_operand.vmem [shape: f32[2,1,32], index: 7, kind: input, shape index: {}]   ;;  %s7867_s8 = inlined_call_operand.vmem [shape: bf16[9,64,32], index: 8, kind: input, shape index: {}]   ;;  %s7868_s9 = inlined_call_operand.vmem [shape: bf16[9,256,32], index: 9, kind: input, shape index: {}]   ;;  %s7869_s10 = inlined_call_operand.vmem [shape: f32[1,32], index: 10, kind: input, shape index: {}]   ;;  %s7870_s11 = inlined_call_operand.vmem [shape: bf16[9,32,32], index: 11, kind: input, shape index: {}]   ;;  %s7871_s12 = inlined_call_operand.vmem [shape: f32[1,32], index: 12, kind: input, shape index: {}]   ;;  %s7872_s13 = inlined_call_operand.hbm [shape: bf16[2,32,32], index: 13, kind: output, shape index: {}]  }
   0x1   :  { %20 = vsyncpa [#allocation6 + $0x1], 0  ;;  %s6404_s25 = smov 0   ;;  %s6406_s26 = smov 0  }
   0x2   :  { %s6408_s27 = smov 0   ;;  %s6410_s28 = smov 0  }
   0x3 LB: > { %7888 = sst [smem:[#allocation8_spill]] %s6322_s27  ;;  %s6425_s29 = sadd.s32 4294967295, %s6326_s28   ;;  %s6326_s28 = sphi %s6410_s28, %s7919_s28   ;;  %s6322_s27 = sphi %s6408_s27, %s7921_s27   ;;  %s6318_s26 = sphi %s6406_s26, %s7923_s26   ;;  %s6314_s25 = sphi %s6404_s25, %s7922_s25  }
   0x4   : > { %s4841_s30 = sadd.s32 4294967294, %s6326_s28   ;;  %s6429_s14 = sadd.s32 1, %s6326_s28  }
   0x5   : > { %7889 = sst [smem:[#allocation9_spill]] %s6429_s14  ;;  %s346_s15 = sadd.s32 1, %s6322_s27 }
   0x6   : > { %s343_s16 = ssub.s32 %s6326_s28, %s6429_s14  ;;  %p356_p0 = scmp.ne.s32.totalorder %s6322_s27, %s6318_s26 }
   0x7   : > { %p344_p1 = scmp.eq.s32.totalorder %s343_s16, 0  ;;  %p357_p2 = scmp.eq.s32.totalorder %s6425_s29, 1 }
   0x8   : > { %p362_p3 = scmp.ne.s32.totalorder %s6318_s26, %s6314_s25  ;;  %p363_p4 = scmp.eq.s32.totalorder %s4841_s30, 1 }
   0x9   : > { %s6440_s17 = scalar_select %p344_p1, %s6322_s27, %s346_s15  }
   0xa   : > { %p6442_p5 = por %p357_p2, %p356_p0  ;;  %p6446_p6 = por %p363_p4, %p362_p3 }
   0xb   : > { %7890 = sst [smem:[#allocation10_spill]] %s6440_s17  ;;  %p4844_p7 = scmp.ge.s32.totalorder %s6326_s28, 1 }
   0xc   : > { %p450_p8 = scmp.lt.s32.totalorder %s6326_s28, 3 }
   0xe   : > { %p451_p9 = pnand %p4844_p7, %p450_p8 }
  0x10   : > { %454 = sbr.rel (%p451_p9) target bundleno = 918 (0x396), region = 72 }
  0x15   : > { %v6034_v0 = vld [vmem:[%s7867_s8 + $0x18] sm:$0xff]   ;;  %p519_p10 = scmp.lt.s32.totalorder %s6425_s29, 1  ;;  %v6035_v1 = vld [vmem:[%s7867_s8 + $0x10] sm:$0xff]   ;;  %v6328_v3 = vmov 0.0   ;;  %v6038_v5 = vld [vmem:[%s7867_s8 + $0x8] sm:$0xff]   ;;  %vm591_vm0 = vcmask 523264   ;;  %v550_v18 = vlaneseq }
  0x16   : > { %5811 = vmatprep.subr.bf16.mxu0 %v6034_v0  ;;  %v6036_v2 = vld [vmem:[%s7868_s9 + $0x78] sm:$0xff]   ;;  %596 = vst [vmem:[#allocation3 + $0x70] sm:$0xff] %v6328_v3  ;;  %597 = vst [vmem:[#allocation3] sm:$0xff] %v6328_v3  ;;  %v6039_v6 = vld [vmem:[%s7868_s9 + $0x70] sm:$0xff]   ;;  %vm1006_vm5 = vsmask.f32 4352 }
  0x17   : > { %s6463_s15 = scalar_select %p519_p10, %s6425_s29, 1  ;;  %598 = vst [vmem:[#allocation3 + $0x38] sm:$0xff] %v6328_v3  ;;  %599 = vst [vmem:[#allocation3 + $0x18] sm:$0xff] %v6328_v3  ;;  %5812 = vmatpush3.bf16.msra.mxu0 %v6034_v0  ;;  %v6037_v4 = vld [vmem:[%s7868_s9 + $0x38] sm:$0xff]   ;;  %5475 = vmatprep.subr.bf16.mxu1 %v6036_v2  ;;  %v6040_v7 = vld [vmem:[%s7868_s9 + $0x30] sm:$0xff]   ;;  %v6547_v34 = vshrl.u32 %v550_v18, 7 }
  0x18   : > { %600 = vst [vmem:[#allocation3 + $0x30] sm:$0xff] %v6328_v3  ;;  %601 = vst [vmem:[#allocation3 + $0x48] sm:$0xff] %v6328_v3  ;;  %5813 = vmatprep.subr.bf16.mxu0 %v6035_v1  ;;  %5476 = vmatpush3.bf16.msra.mxu1 %v6037_v4  ;;  %v6041_v8 = vld [vmem:[%s7867_s8] sm:$0xff]   ;;  %v6042_v9 = vld [vmem:[%s7868_s9 + $0x68] sm:$0xff]   ;;  %vm1645_vm6 = vsmask.f32 7424 }
  0x19   : > { %602 = vst [vmem:[#allocation3 + $0x8] sm:$0xff] %v6328_v3  ;;  %603 = vst [vmem:[#allocation3 + $0x28] sm:$0xff] %v6328_v3  ;;  %s5453_s23 = sshll.u32 %s6463_s15, 4  ;;  %5477 = vmatprep.subr.bf16.mxu1 %v6039_v6  ;;  %v6043_v10 = vld [vmem:[%s7868_s9 + $0x28] sm:$0xff]   ;;  %v6044_v17 = vld [vmem:[%s7868_s9 + $0x60] sm:$0xff]   ;;  %v6558_v44 = vadd.s32 8, %v6547_v34  ;;  %v555_v50 = vcvt.s32.f32 %v6547_v34  ;;  %s7705_s22 = scalar_lea.vmem %s7866_s7, %s6463_s15 }
  0x1a   : > { %592 = vst.msk [vmem:[#allocation2] sm:$0xff] %vm591_vm0, %v6328_v3  ;;  %593 = vst.msk [vmem:[#allocation2 + $0x8] sm:$0xff] %vm591_vm0, %v6328_v3  ;;  %s523_s21 = scalar_lea.vmem %s7859_s0, %s5453_s23  ;;  %v6526_v22 = vld [vmem:[%s7867_s8 + $0x38] sm:$0xff]   ;;  %v6046_v26 = vld [vmem:[%s7868_s9 + $0x20] sm:$0xff]   ;;  %s5454_s27 = sshll.u32 %s6463_s15, 5  ;;  %v6569_v52 = vadd.s32 16, %v6547_v34 }
  0x1b   : > { %594 = vst.msk [vmem:[#allocation2 + $0x30] sm:$0xff] %vm591_vm0, %v6328_v3  ;;  %595 = vst.msk [vmem:[#allocation2 + $0x38] sm:$0xff] %vm591_vm0, %v6328_v3  ;;  %5814 = vmatpush3.bf16.msra.mxu0 %v6035_v1  ;;  %v5461_v11 = vld [vmem:[%s523_s21] sm:$0xff]   ;;  %v5468_v12 = vld [vmem:[%s523_s21 + $0x8] sm:$0xff]   ;;  %v556_v55 = vcvt.s32.f32 %v6558_v44  ;;  %s528_s20 = scalar_lea.vmem %s7860_s1, %s5454_s27  ;;  %v559_v60 = vadd.f32 0.5, %v555_v50  ;;  %s531_s23 = scalar_lea.vmem %s7861_s2, %s6463_s15  ;;  %v6664_v44 = vsub.s32 0, %v6547_v34 }
  0x1c   : > { %5815 = vmatprep.subr.bf16.mxu0 %v6038_v5  ;;  %5478 = vmatpush3.bf16.msra.mxu1 %v6040_v7  ;;  %v6506_v13 = vunpack.c.l.bf16 %v5461_v11  ;;  %v6508_v14 = vunpack.c.h.bf16 %v5461_v11  ;;  %v6510_v15 = vunpack.c.l.bf16 %v5468_v12  ;;  %v6512_v16 = vunpack.c.h.bf16 %v5468_v12  ;;  %v6047_v30 = vld [vmem:[%s7868_s9 + $0x58] sm:$0xff]   ;;  %v6050_v41 = vld [vmem:[%s7868_s9 + $0x50] sm:$0xff]   ;;  %v6053_v48 = vld [vmem:[%s7868_s9 + $0x48] sm:$0xff]   ;;  %s4850_s17 = sshll.u32 %s6463_s15, 1  ;;  %s516_s27 = sand.u32 1, %s6318_s26  }
  0x1d   : > { %5479 = vmatprep.subr.bf16.mxu1 %v6042_v9  ;;  %v6049_v37 = vld [vmem:[%s7868_s9 + $0x18] sm:$0xff]   ;;  %v6052_v46 = vld [vmem:[%s7868_s9 + $0x10] sm:$0xff]   ;;  %v6055_v53 = vld [vmem:[%s7868_s9 + $0x8] sm:$0xff]   ;;  %v557_v62 = vcvt.s32.f32 %v6569_v52  ;;  %v560_v1 = vadd.f32 0.5, %v556_v55  ;;  %7893 = vst [vmem:[#allocation11_spill] sm:$0xff] %v6664_v44  ;;  %s538_s30 = scalar_lea.vmem %s7863_s4, %s4850_s17  ;;  %vm604_vm7 = vcmask 261120  }
  0x1e   : > { %v617_v19 = vsel %vm591_vm0, %v6506_v13, 0.0  ;;  %v618_v20 = vsel %vm591_vm0, %v6508_v14, 0.0  ;;  %v620_v21 = vsel %vm591_vm0, %v6510_v15, 0.0  ;;  %v631_v24 = vmul.f32 %v6506_v13, %v6506_v13  ;;  %v6056_v56 = vld [vmem:[%s7868_s9 + $0x40] sm:$0xff]   ;;  %v6591_v2 = vld [vmem:[%s528_s20 + $0x8] sm:$0xff]  ;;  %v6593_v4 = vld [vmem:[%s528_s20 + $0x10] sm:$0xff] }
  0x1f   : > { %5816 = vmatpush3.bf16.msra.mxu0 %v6038_v5  ;;  %v619_v23 = vadd.f32 %v618_v20, %v617_v19  ;;  %v632_v25 = vmul.f32 %v6508_v14, %v6508_v14  ;;  %v622_v27 = vsel %vm591_vm0, %v6512_v16, 0.0  ;;  %v633_v28 = vmul.f32 %v6510_v15, %v6510_v15  ;;  %v6058_v59 = vld [vmem:[%s7868_s9] sm:$0xff]   ;;  %v6595_v5 = vld [vmem:[%s528_s20 + $0x18] sm:$0xff]  ;;  %s7819_s16 = scalar_lea.sflag [#allocation6], %s516_s27 }
  0x20   : > { %5817 = vmatprep.subr.bf16.mxu0 %v6041_v8  ;;  %5480 = vmatpush3.bf16.msra.mxu1 %v6043_v10  ;;  %v634_v29 = vmul.f32 %v6512_v16, %v6512_v16  ;;  %v635_v32 = vsel %vm591_vm0, %v631_v24, 0.0  ;;  %v6587_v63 = vld [vmem:[%s528_s20] sm:$0xff]  ;;  %v693_v9 = vunpack.c.l.bf16 %v6591_v2  ;;  %v694_v10 = vunpack.c.h.bf16 %v6591_v2  ;;  %v6610_v20 = vld [vmem:[%s7867_s8 + $0x58] sm:$0xff]   ;;  %s534_s20 = scalar_lea.vmem %s7862_s3, %s6463_s15 }
  0x21   : > { %5481 = vmatprep.subr.bf16.mxu1 %v6044_v17  ;;  %v621_v31 = vadd.f32 %v620_v21, %v619_v23  ;;  %v636_v33 = vsel %vm591_vm0, %v632_v25, 0.0  ;;  %v638_v36 = vsel %vm591_vm0, %v633_v28, 0.0  ;;  %v691_v6 = vunpack.c.l.bf16 %v6587_v63 }
  0x22   : > { %v637_v35 = vadd.f32 %v636_v33, %v635_v32  ;;  %v640_v39 = vsel %vm591_vm0, %v634_v29, 0.0  ;;  %v692_v7 = vunpack.c.h.bf16 %v6587_v63  ;;  %v695_v11 = vunpack.c.l.bf16 %v6593_v4 }
  0x23   : > { %5818 = vmatpush3.bf16.msra.mxu0 %v6041_v8  ;;  %v623_v38 = vadd.f32 %v622_v27, %v621_v31  ;;  %v696_v17 = vunpack.c.h.bf16 %v6593_v4  ;;  %v697_v18 = vunpack.c.l.bf16 %v6595_v5  ;;  %v698_v19 = vunpack.c.h.bf16 %v6595_v5 }
  0x24   : > { %5823 = vmatprep.subr.bf16.mxu0 %v6526_v22  ;;  %5482 = vmatpush3.bf16.msra.mxu1 %v6046_v26  ;;  %v639_v40 = vadd.f32 %v638_v36, %v637_v35  ;;  %v699_v23 = vadd.f32 %v693_v9, %v691_v6  ;;  %v708_v24 = vadd.f32 %v694_v10, %v692_v7  ;;  %v563_v32 = vmul.f32 0.125, %v559_v60 }
  0x25   : > { %5483 = vmatprep.subr.bf16.mxu1 %v6047_v30  ;;  %v624_v42 = vrot.slane %v623_v38, 4  ;;  %6292 = vmul.bf16.f32.vacc0 %v6587_v63, %v6587_v63  ;;  %v564_v33 = vmul.f32 0.125, %v560_v1 }
  0x26   : > { %v641_v43 = vadd.f32 %v640_v39, %v639_v40  ;;  %v700_v27 = vadd.f32 %v699_v23, %v695_v11  ;;  %v709_v28 = vadd.f32 %v708_v24, %v696_v17  ;;  %6293 = vmac.bf16.f32.vacc0 %v6591_v2, %v6591_v2 }
  0x27   : > { %v625_v45 = vadd.f32 %v624_v42, %v623_v38  ;;  %6294 = vmac.bf16.f32.vacc0 %v6593_v4, %v6593_v4  ;;  %v561_v38 = vadd.f32 0.5, %v557_v62 }
  0x28   : > { %5484 = vmatpush3.bf16.msra.mxu1 %v6049_v37  ;;  %v642_v47 = vrot.slane %v641_v43, 4  ;;  %v701_v30 = vadd.f32 %v700_v27, %v697_v18  ;;  %v710_v31 = vadd.f32 %v709_v28, %v698_v19  ;;  %6295 = vmac.bf16.f32.vacc0 %v6595_v5, %v6595_v5 }
  0x29   : > { %5485 = vmatprep.subr.bf16.mxu1 %v6050_v41  ;;  %v626_v49 = vrot.slane %v625_v45, 2  ;;  %v565_v1 = vmul.f32 0.125, %v561_v38 }
  0x2a   : > { %v643_v51 = vadd.f32 %v642_v47, %v641_v43  ;;  %v702_v36 = vrot.slane %v701_v30, 4  ;;  %v711_v37 = vrot.slane %v710_v31, 4  ;;  %v6296_v39 = vmovacc.add.low.vacc0 }
  0x2b   : > { %v627_v54 = vadd.f32 %v626_v49, %v625_v45  ;;  %v6297_v40 = vmovacc.add.high.vacc0  ;;  %v6329_v43 = vmov 1935823168  }
  0x2c   : > { %5486 = vmatpush3.bf16.msra.mxu1 %v6052_v46  ;;  %v644_v57 = vrot.slane %v643_v51, 2  ;;  %v6300_v45 = vunpack.c.l.s4 %v6329_v43 }
  0x2d   : > { %5487 = vmatprep.subr.bf16.mxu1 %v6053_v48  ;;  %v628_v58 = vrot.slane %v627_v54, 1  ;;  %v6298_v41 = vcombine.low %v6296_v39, %v6297_v40  ;;  %v6299_v42 = vcombine.high %v6296_v39, %v6297_v40 }
  0x2e   : > { %v645_v61 = vadd.f32 %v644_v57, %v643_v51  ;;  %v6301_v46 = vunpack.c.0.s8 %v6300_v45  ;;  %v554_v51 = vadd.s32 24, %v6547_v34  ;;  %v567_v57 = vfloor.f32 %v563_v32 }
  0x2f   : > { %v629_v0 = vadd.f32 %v628_v58, %v627_v54  ;;  %v703_v54 = vadd.f32 %v702_v36, %v701_v30  ;;  %v568_v58 = vfloor.f32 %v564_v33  ;;  %v569_v32 = vfloor.f32 %v565_v1 }
  0x30   : > { %5488 = vmatpush3.bf16.msra.mxu1 %v6055_v53  ;;  %v646_v8 = vrot.slane %v645_v61, 1  ;;  %v6304_v47 = vsub.s32 %v6301_v46, %v6547_v34 }
  0x31   : > { %5489 = vmatprep.subr.bf16.mxu1 %v6056_v56  ;;  %v6602_v12 = vmul.f32 0.0625, %v629_v0  ;;  %v712_v56 = vadd.f32 %v711_v37, %v710_v31  ;;  %v704_v60 = vrot.slane %v703_v54, 2  ;;  %v572_v27 = vmul.f32 8.0, %v568_v58 }
  0x32   : > { %v647_v21 = vadd.f32 %v646_v8, %v645_v61  ;;  %v6305_v48 = vrot.slane %v6298_v41, %v6304_v47  ;;  %v6311_v49 = vrot.slane %v6299_v42, %v6304_v47  ;;  %v573_v47 = vmul.f32 8.0, %v569_v32 }
  0x33   : > { %v649_v25 = vmul.f32 %v6602_v12, %v6602_v12  ;;  %v713_v61 = vrot.slane %v712_v56, 2  ;;  %v576_v40 = vsub.f32 %v556_v55, %v572_v27 }
  0x34   : > { %5490 = vmatpush3.bf16.msra.mxu1 %v6058_v59  ;;  %v648_v26 = vmul.f32 0.0625, %v647_v21  ;;  %v730_v59 = vrot.slane %v6305_v48, 4  ;;  %v739_v0 = vrot.slane %v6311_v49, 4  ;;  %v705_v21 = vadd.f32 %v704_v60, %v703_v54 }
  0x35   : > { %5835 = vmatprep.subr.bf16.mxu1 %v6610_v20  ;;  %v714_v23 = vadd.f32 %v713_v61, %v712_v56  ;;  %vm580_vm2 = vcmp.lt.f32.partialorder %v576_v40, 3.5  ;;  %v6330_v40 = vmov 1966171168  }
  0x36   : > { %v650_v29 = vsub.f32 %v648_v26, %v649_v25  ;;  %v731_v8 = vadd.f32 %v6305_v48, %v730_v59  ;;  %v740_v24 = vadd.f32 %v6311_v49, %v739_v0  ;;  %v558_v25 = vcvt.s32.f32 %v554_v51  ;;  %v654_v49 = vld [vmem:[%s531_s23] sm:$0x1] }
  0x37   : > { %v571_v26 = vmul.f32 8.0, %v567_v57  ;;  %v715_v30 = vrot.slane %v714_v23, 1  ;;  %v577_v59 = vsub.f32 %v557_v62, %v573_v47  ;;  %v656_v0 = vld [vmem:[%s534_s20] sm:$0x1]  ;;  %v6674_v27 = vsel %vm580_vm2, 1.0, %v6328_v3  ;;  %s6331_s20 = smov [#allocation5]  }
  0x38   : > { %v651_v35 = vmax.f32 %v650_v29, 0.0  ;;  %v732_v28 = vrot.slane %v731_v8, 2  ;;  %v706_v29 = vrot.slane %v705_v21, 1  ;;  %v741_v31 = vrot.slane %v740_v24, 2  ;;  %7895 = vst [vmem:[#allocation13_spill] sm:$0xff] %v6674_v27  ;;  %s6250_s21 = sshll.u32 %s6331_s20, 4  ;;  %s6251_s21 = int_to_ptr.vmem [resolvable:$false] %s6250_s21 }
  0x39   : > { %v716_v36 = vadd.f32 %v715_v30, %v714_v23  ;;  %v562_v39 = vadd.f32 0.5, %v558_v25  ;;  %v575_v38 = vsub.f32 %v555_v50, %v571_v26  ;;  %vm581_vm3 = vcmp.lt.f32.partialorder %v577_v59, 3.5  ;;  %v6048_v59 = vld [vmem:[%s7867_s8 + $0x30] sm:$0xff]  }
  0x3a   : > { %v652_v53 = vadd.f32 1e-05, %v651_v35  ;;  %v733_v33 = vadd.f32 %v732_v28, %v731_v8  ;;  %v707_v35 = vadd.f32 %v706_v29, %v705_v21  ;;  %v742_v37 = vadd.f32 %v741_v31, %v740_v24 }
  0x3b   : > { %v6653_v43 = vmul.f32 0.0625, %v716_v36  ;;  %v566_v46 = vmul.f32 0.125, %v562_v39  ;;  %vm579_vm1 = vcmp.lt.f32.partialorder %v575_v38, 3.5 }
  0x3c   : > { %6232 = vrsqrt.f32 %v652_v53  ;;  %v734_v41 = vrot.slane %v733_v33, 1  ;;  %v6651_v42 = vmul.f32 0.0625, %v707_v35  ;;  %v743_v45 = vrot.slane %v742_v37, 1 }
  0x3d   : > { %v748_v50 = vmul.f32 %v6653_v43, %v6653_v43  ;;  %v570_v54 = vfloor.f32 %v566_v46  ;;  %v6669_v21 = vsel %vm579_vm1, 1.0, %v6328_v3  ;;  %v861_v46 = vld [vmem:[#allocation2 + $0x7] sm:$0xff] }
  0x3e   : > { %v735_v48 = vadd.f32 %v734_v41, %v733_v33  ;;  %v744_v51 = vadd.f32 %v743_v45, %v742_v37  ;;  %v747_v53 = vmul.f32 %v6651_v42, %v6651_v42  ;;  %7894 = vst [vmem:[#allocation12_spill] sm:$0xff] %v6669_v21  ;;  %v6682_v33 = vsel %vm581_vm3, 1.0, %v6328_v3 }
  0x3f   : > { %v574_v57 = vmul.f32 8.0, %v570_v54  ;;  %7896 = vst [vmem:[#allocation14_spill] sm:$0xff] %v6682_v33  ;;  %v762_v41 = vunpack.c.l.s4 %v6330_v40 }
  0x40   : > { %v745_v55 = vmul.f32 0.0625, %v735_v48  ;;  %v746_v56 = vmul.f32 0.0625, %v744_v51  ;;  %v1212_v48 = vld [vmem:[#allocation2 + $0x8] sm:$0xff] }
  0x41   : > { %v578_v8 = vsub.f32 %v558_v25, %v574_v57  ;;  %v763_v45 = vunpack.c.0.s8 %v762_v41 }
  0x42   : > { %v749_v60 = vsub.f32 %v745_v55, %v747_v53  ;;  %v750_v1 = vsub.f32 %v746_v56, %v748_v50 }
  0x43   : > { %vm582_vm4 = vcmp.lt.f32.partialorder %v578_v8, 3.5  ;;  %v766_v50 = vsub.s32 %v763_v45, %v6547_v34  ;;  %v757_v8 = vld [vmem:[%s538_s30] sm:$0x3]  ;;  %s542_s30 = scalar_lea.vmem %s7864_s5, %s4850_s17  ;;  %s7698_s17 = scalar_lea.vmem %s7865_s6, %s6463_s15 }
  0x44   : > { %v751_v23 = vmax.f32 %v749_v60, 0.0  ;;  %v752_v28 = vmax.f32 %v750_v1, 0.0  ;;  %v6685_v35 = vsel %vm582_vm4, 1.0, %v6328_v3  ;;  %s4845_s15 = sshll.u32 %s516_s27, 4 }
  0x45   : > { %7897 = vst [vmem:[#allocation15_spill] sm:$0xff] %v6685_v35 }
  0x46   : > { %v753_v52 = vadd.f32 1e-05, %v751_v23  ;;  %v754_v32 = vadd.f32 1e-05, %v752_v28  ;;  %v6051_v23 = vld [vmem:[%s7867_s8 + $0x28] sm:$0xff]  }
  0x48   : > { %6234 = vrsqrt.f32 %v753_v52  ;;  %v6054_v52 = vld [vmem:[%s7867_s8 + $0x20] sm:$0xff]  }
  0x49   : > { %v6233_v58 = vpop.eup %6232  ;;  %6236 = vrsqrt.f32 %v754_v32 }
  0x4a   : > { %v655_v61 = vmul.f32 %v6233_v58, %v654_v49 }
  0x4c   : > { %v657_v24 = vmul.f32 %v655_v61, %v6602_v12  ;;  %v663_v26 = vrot.slane %v655_v61, %v6664_v44 }
  0x4e   : > { %v658_v62 = vsub.f32 %v656_v0, %v657_v24  ;;  %v665_v29 = vmul.f32 %v6506_v13, %v663_v26  ;;  %v668_v25 = vmul.f32 %v6512_v16, %v663_v26  ;;  %v666_v30 = vmul.f32 %v6508_v14, %v663_v26 }
  0x4f   : > { %v667_v31 = vmul.f32 %v6510_v15, %v663_v26  ;;  %v785_v26 = vsub.s32 1, %v6547_v34  ;;  %v6057_v34 = vld [vmem:[%s7868_s9 + $0xf8] sm:$0xff]  }
  0x50   : > { %v673_v12 = vrot.slane %v658_v62, %v6664_v44 }
  0x52   : > { %v675_v36 = vadd.f32 %v673_v12, %v665_v29  ;;  %v676_v37 = vadd.f32 %v673_v12, %v666_v30  ;;  %v677_v13 = vadd.f32 %v673_v12, %v667_v31  ;;  %v678_v16 = vadd.f32 %v673_v12, %v668_v25  ;;  %v959_v29 = vld [vmem:[#allocation3] sm:$0x80]  ;;  %v958_v31 = vld [vmem:[#allocation3 + $0x70] sm:$0x80] }
  0x54   : > { %v679_v14 = vmul.f32 %v6669_v21, %v675_v36  ;;  %v680_v15 = vmul.f32 %v6674_v27, %v676_v37  ;;  %v681_v39 = vmul.f32 %v6682_v33, %v677_v13  ;;  %v682_v38 = vmul.f32 %v6685_v35, %v678_v16  ;;  %v6059_v37 = vld [vmem:[%s7868_s9 + $0xb8] sm:$0xff]   ;;  %v777_v16 = vld [vmem:[%s542_s30] sm:$0x3] }
  0x55   : > { %v6235_v47 = vpop.eup %6234  ;;  %v969_v36 = vpack.c.bf16 %v6328_v3, %v959_v29 }
  0x56   : > { %683 = vst.msk [vmem:[#allocation2 + $0x10] sm:$0xff] %vm591_vm0, %v679_v14  ;;  %684 = vst.msk [vmem:[#allocation2 + $0x18] sm:$0xff] %vm591_vm0, %v680_v15  ;;  %v6237_v54 = vpop.eup %6236  ;;  %v6060_v14 = vld [vmem:[%s7868_s9 + $0xf0] sm:$0xff]  }
  0x57   : > { %685 = vst.msk [vmem:[#allocation2 + $0x20] sm:$0xff] %vm591_vm0, %v681_v39  ;;  %686 = vst.msk [vmem:[#allocation2 + $0x28] sm:$0xff] %vm591_vm0, %v682_v38  ;;  %v760_v61 = vcombine.low %v6235_v47, %v6237_v54  ;;  %v1025_v39 = vshrl.u32 %v969_v36, 16  ;;  %v1028_v38 = vshll.u32 %v969_v36, 16  ;;  %v6068_v36 = vld [vmem:[%s7868_s9 + $0xa0] sm:$0xff]  }
  0x59   : > { %v767_v1 = vrot.slane %v760_v61, %v766_v50 }
  0x5b   : > { %v774_v24 = vrot.slane %v767_v1, %v766_v50 }
  0x5d   : > { %v6696_v49 = vld [vmem:[#allocation2 + $0xf] sm:$0xff]  ;;  %v6698_v51 = vld [vmem:[#allocation2 + $0x17] sm:$0xff]  ;;  %v776_v28 = vmul.f32 %v774_v24, %v757_v8 }
  0x5e   : > { %v6700_v53 = vld [vmem:[#allocation2 + $0x1f] sm:$0xff]  ;;  %v865_v55 = vpack.c.bf16 %v6696_v49, %v861_v46  ;;  %v6706_v57 = vld [vmem:[#allocation2 + $0x10] sm:$0xff] }
  0x5f   : > { %v866_v56 = vpack.c.bf16 %v6700_v53, %v6698_v51  ;;  %v6708_v58 = vld [vmem:[#allocation2 + $0x18] sm:$0xff]  ;;  %v1216_v60 = vpack.c.bf16 %v6706_v57, %v1212_v48  ;;  %v786_v62 = vrot.slane %v776_v28, %v785_v26  ;;  %v6735_v32 = vld [vmem:[#allocation2 + $0x20] sm:$0xff] }
  0x60   : > { %v2177_v0 = vpack.c.bf16 %v6708_v58, %v6706_v57  ;;  %5819 = vmatprep.mubr.msk.bf16.mxu0 %vm591_vm0, %v865_v55  ;;  %v1030_v55 = vrot.slane %v1028_v38, 4 }
  0x61   : > { %5820 = vmatmul.mubr.msk.bf16.vlgmr.msra.gmra.mxu0 %vm591_vm0, %v866_v56  ;;  %v790_v30 = vmul.f32 %v786_v62, %v6653_v43  ;;  %v1217_v43 = vpack.c.bf16 %v6735_v32, %v6708_v58  ;;  %v813_v46 = vmul.f32 %v786_v62, %v694_v10  ;;  %v815_v54 = vmul.f32 %v786_v62, %v696_v17 }
  0x62   : > { %5824 = vmatpush3.bf16.msra.mxu0 %v6526_v22  ;;  %5831 = vmatprep.mubr.msk.bf16.mxu0 %vm591_vm0, %v1216_v60  ;;  %v782_v22 = vrot.slane %v776_v28, %v6664_v44  ;;  %v817_v63 = vmul.f32 %v786_v62, %v698_v19 }
  0x63   : > { %5825 = vmatprep.subr.bf16.mxu0 %v6048_v59 }
  0x64   : > { %v789_v25 = vmul.f32 %v782_v22, %v6651_v42  ;;  %v968_v42 = vpack.c.bf16 %v6328_v3, %v958_v31  ;;  %v811_v3 = vmul.f32 %v786_v62, %v692_v7  ;;  %v810_v47 = vmul.f32 %v782_v22, %v691_v6  ;;  %v6063_v7 = vld [vmem:[%s7868_s9 + $0xe8] sm:$0xff]  }
  0x65   : > { %v812_v48 = vmul.f32 %v782_v22, %v693_v9  ;;  %v814_v10 = vmul.f32 %v782_v22, %v695_v11  ;;  %v816_v2 = vmul.f32 %v782_v22, %v697_v18  ;;  %v6778_v9 = vrot.slane %v1025_v39, 3  ;;  %v6065_v11 = vld [vmem:[%s7868_s9 + $0xa8] sm:$0xff]  }
  0x66   : > { %5826 = vmatpush3.bf16.msra.mxu0 %v6048_v59  ;;  %v793_v12 = vcombine.low %v789_v25, %v790_v30  ;;  %v1008_v40 = vshrl.u32 %v968_v42, 16  ;;  %v1011_v41 = vshll.u32 %v968_v42, 16  ;;  %v6069_v42 = vld [vmem:[%s7868_s9 + $0xd8] sm:$0xff]  }
  0x67   : > { %5827 = vmatprep.subr.bf16.mxu0 %v6051_v23 }
  0x68   : > { %v800_v13 = vrot.slane %v793_v12, %v766_v50  ;;  %v1010_v59 = vrot.slane %v1008_v40, 3  ;;  %v1013_v60 = vrot.slane %v1011_v41, 4  ;;  %v6071_v41 = vld [vmem:[%s7868_s9 + $0x98] sm:$0xff]  }
  0x6a   : > { %5828 = vmatpush3.bf16.msra.mxu0 %v6051_v23  ;;  %v807_v15 = vrot.slane %v800_v13, %v766_v50  ;;  %v6062_v50 = vld [vmem:[%s7868_s9 + $0xb0] sm:$0xff]  }
  0x6b   : > { %5829 = vmatprep.subr.bf16.mxu0 %v6054_v52 }
  0x6c   : > { %v809_v45 = vsub.f32 %v777_v16, %v807_v15  ;;  %v1014_v15 = vor.u32 %v1013_v60, %v1010_v59 }
  0x6e   : > { %5830 = vmatpush3.bf16.msra.mxu0 %v6054_v52  ;;  %v826_v6 = vrot.slane %v809_v45, %v785_v26  ;;  %v822_v56 = vrot.slane %v809_v45, %v6664_v44  ;;  %v6066_v52 = vld [vmem:[%s7868_s9 + $0xe0] sm:$0xff]   ;;  %v1597_v45 = vld [vmem:[#allocation3 + $0x18] sm:$0xfe] }
  0x6f   : > { %5509 = vmatprep.subr.bf16.mxu0 %v6057_v34  ;;  %v6823_v34 = vld [vmem:[#allocation3 + $0x70] sm:$0xff] }
  0x70   : > { %v830_v61 = vadd.f32 %v826_v6, %v811_v3  ;;  %v832_v17 = vadd.f32 %v826_v6, %v813_v46  ;;  %v829_v1 = vadd.f32 %v822_v56, %v810_v47  ;;  %v831_v4 = vadd.f32 %v822_v56, %v812_v48  ;;  %v6072_v48 = vld [vmem:[%s7868_s9 + $0xd0] sm:$0xff]  }
  0x71   : > { %5832 = vmatmul.mubr.msk.bf16.vlgmr.msra.gmra.mxu0 %vm591_vm0, %v1217_v43  ;;  %v834_v5 = vadd.f32 %v826_v6, %v815_v54  ;;  %v833_v18 = vadd.f32 %v822_v56, %v814_v10  ;;  %v836_v19 = vadd.f32 %v826_v6, %v817_v63  ;;  %v835_v8 = vadd.f32 %v822_v56, %v816_v2  ;;  %v6064_v54 = vld [vmem:[%s7867_s8 + $0x50] sm:$0xff]   ;;  %v6076_v56 = vld [vmem:[%s7868_s9 + $0xc8] sm:$0xff]  }
  0x72   : > { %5510 = vmatpush3.bf16.msra.mxu0 %v6059_v37  ;;  %v6785_v23 = vmul.f32 %v6669_v21, %v830_v61  ;;  %v6788_v24 = vmul.f32 %v6674_v27, %v832_v17  ;;  %v6791_v26 = vmul.f32 %v6669_v21, %v829_v1  ;;  %v6794_v28 = vmul.f32 %v6674_v27, %v831_v4  ;;  %v6067_v1 = vld [vmem:[%s7867_s8 + $0x48] sm:$0xff]   ;;  %v7597_v27 = vld [vmem:[%s7870_s11 + $0x18] sm:$0xff]  }
  0x73   : > { %5511 = vmatprep.subr.bf16.mxu0 %v6060_v14  ;;  %v6800_v22 = vmul.f32 %v6682_v33, %v834_v5  ;;  %v6803_v62 = vmul.f32 %v6682_v33, %v833_v18  ;;  %v6806_v29 = vmul.f32 %v6685_v35, %v836_v19  ;;  %v6809_v25 = vmul.f32 %v6685_v35, %v835_v8  ;;  %v6078_v4 = vld [vmem:[%s7868_s9 + $0x88] sm:$0xff]  }
  0x74   : > { %846 = vst [vmem:[#allocation3 + $0x60] sm:$0xff] %v6785_v23  ;;  %848 = vst [vmem:[#allocation3 + $0x78] sm:$0xff] %v6788_v24  ;;  %v6815_v30 = vpack.c.bf16 %v6788_v24, %v6785_v23  ;;  %v6821_v31 = vpack.c.bf16 %v6794_v28, %v6791_v26  ;;  %v1313_v12 = vpack.c.bf16 %v6785_v23, %v6823_v34 }
  0x75   : > { %845 = vst [vmem:[#allocation3 + $0x20] sm:$0xff] %v6791_v26  ;;  %847 = vst [vmem:[#allocation3 + $0x10] sm:$0xff] %v6794_v28  ;;  %v1031_v14 = vor.u32 %v1030_v55, %v6778_v9  ;;  %v1607_v2 = vpack.c.bf16 %v6785_v23, %v1597_v45  ;;  %v6074_v55 = vld [vmem:[%s7868_s9 + $0x90] sm:$0xff]   ;;  %v6892_v45 = vld [vmem:[#allocation2 + $0x21] sm:$0xff] }
  0x76   : > { %5512 = vmatpush3.bf16.msra.mxu0 %v6062_v50  ;;  %850 = vst [vmem:[#allocation3 + $0x50] sm:$0xff] %v6800_v22  ;;  %849 = vst [vmem:[#allocation3 + $0x40] sm:$0xff] %v6803_v62  ;;  %v1033_v43 = vshrl.u32 %v6815_v30, 16  ;;  %v1036_v37 = vshll.u32 %v6815_v30, 16  ;;  %v1016_v13 = vshrl.u32 %v6821_v31, 16  ;;  %v1019_v16 = vshll.u32 %v6821_v31, 16  ;;  %1477 = vmatprep.mubr.bf16.mxu0 %v1313_v12 }
  0x77   : > { %5513 = vmatprep.subr.bf16.mxu0 %v6063_v7  ;;  %852 = vst [vmem:[#allocation3 + $0x68] sm:$0xff] %v6806_v29  ;;  %851 = vst [vmem:[#allocation3 + $0x58] sm:$0xff] %v6809_v25  ;;  %v1661_v5 = vshll.u32 %v1607_v2, 16  ;;  %v6871_v12 = vld [vmem:[#allocation2 + $0x11] sm:$0xff] }
  0x78   : > { %v1035_v39 = vrot.slane %v1033_v43, 3  ;;  %v1038_v38 = vrot.slane %v1036_v37, 4  ;;  %v1018_v3 = vrot.slane %v1016_v13, 3  ;;  %v1021_v40 = vrot.slane %v1019_v16, 4  ;;  %v6082_v13 = vld [vmem:[%s7868_s9 + $0x80] sm:$0xff]   ;;  %7903 = vst [vmem:[#allocation21_spill] sm:$0xff] %v7597_v27 }
  0x79   : > { %v1659_v16 = vshrl.u32 %v1607_v2, 16  ;;  %v6075_v2 = vld [vmem:[%s7868_s9 + $0x138] sm:$0xff]  }
  0x7a   : > { %5514 = vmatpush3.bf16.msra.mxu0 %v6065_v11  ;;  %v1039_v46 = vor.u32 %v1038_v38, %v1035_v39  ;;  %v1022_v47 = vor.u32 %v1021_v40, %v1018_v3  ;;  %v6869_v11 = vpack.c.bf16 %v6800_v22, %v6788_v24  ;;  %v6070_v24 = vld [vmem:[%s7867_s8 + $0x40] sm:$0xff]   ;;  %v1663_v39 = vrot.slane %v1661_v5, 1  ;;  %v6085_v40 = vld [vmem:[%s7867_s8 + $0x78] sm:$0xff]  }
  0x7b   : > { %5515 = vmatprep.subr.bf16.mxu0 %v6066_v52  ;;  %v1498_v52 = vld [vmem:[#allocation2 + $0x9] sm:$0xff]  ;;  %v6886_v3 = vld [vmem:[#allocation2 + $0x19] sm:$0xff]  ;;  %v1843_v5 = vpack.c.bf16 %v6698_v51, %v6696_v49 }
  0x7c   : > { %v1040_v50 = vsel %vm1006_vm5, %v1031_v14, %v1039_v46  ;;  %v1023_v7 = vsel %vm1006_vm5, %v1014_v15, %v1022_v47  ;;  %v1502_v37 = vpack.c.bf16 %v6871_v12, %v1498_v52  ;;  %v1666_v38 = vshll.u32 %v6869_v11, 16  ;;  %v6949_v52 = vld [vmem:[#allocation2 + $0x27] sm:$0xff]  ;;  %v6097_v51 = vld [vmem:[%s7868_s9 + $0x1f8] sm:$0xff]  }
  0x7d   : > { %v967_v10 = vld [vmem:[#allocation3 + $0x50] sm:$0x7f]  ;;  %v966_v63 = vld [vmem:[#allocation3 + $0x40] sm:$0x7f]  ;;  %1191 = vmatprep.mubr.bf16.mxu1 %v1040_v50 }
  0x7e   : > { %5516 = vmatpush3.bf16.msra.mxu0 %v6068_v36  ;;  %v973_v6 = vpack.c.bf16 %v967_v10, %v967_v10  ;;  %v972_v9 = vpack.c.bf16 %v966_v63, %v966_v63  ;;  %1192 = vmatmul.mubr.bf16.vlgmr.msra.gmra.mxu1 %v1023_v7  ;;  %v6080_v36 = vld [vmem:[%s7868_s9 + $0xc0] sm:$0xff]   ;;  %v6899_v50 = vrot.slane %v1666_v38, 1  ;;  %v2276_v7 = vpack.c.bf16 %v6806_v29, %v6800_v22 }
  0x7f   : > { %5517 = vmatprep.subr.bf16.mxu0 %v6069_v42  ;;  %5836 = vmatpush3.bf16.msra.mxu1 %v6610_v20  ;;  %v2275_v10 = vpack.c.bf16 %v6809_v25, %v6803_v62  ;;  %v1503_v63 = vpack.c.bf16 %v6892_v45, %v6886_v3  ;;  %v6086_v49 = vld [vmem:[%s7868_s9 + $0x120] sm:$0xff]  }
  0x80   : > { %v1051_v59 = vshrl.u32 %v973_v6, 16  ;;  %v1054_v60 = vshll.u32 %v973_v6, 16  ;;  %v1042_v61 = vshrl.u32 %v972_v9, 16  ;;  %v1045_v17 = vshll.u32 %v972_v9, 16  ;;  %5837 = vmatprep.subr.bf16.mxu1 %v6064_v54  ;;  %v6077_v6 = vld [vmem:[%s7868_s9 + $0x170] sm:$0xff]  }
  0x82   : > { %5518 = vmatpush3.bf16.msra.mxu0 %v6071_v41  ;;  %v1053_v18 = vrot.slane %v1051_v59, 3  ;;  %v1056_v20 = vrot.slane %v1054_v60, 4  ;;  %v1044_v19 = vrot.slane %v1042_v61, 3  ;;  %v1047_v8 = vrot.slane %v1045_v17, 4  ;;  %v1938_v41 = vld [vmem:[#allocation3 + $0x18] sm:$0x80] }
  0x83   : > { %5519 = vmatprep.subr.bf16.mxu0 %v6072_v48  ;;  %5838 = vmatpush3.bf16.msra.mxu1 %v6064_v54  ;;  %v1664_v48 = vor.u32 %v1663_v39, %v1659_v16  ;;  %v6088_v54 = vld [vmem:[%s7867_s8 + $0x70] sm:$0xff]   ;;  %v6081_v60 = vld [vmem:[%s7868_s9 + $0x168] sm:$0xff]   ;;  %v6932_v61 = vpack.c.bf16 %v6803_v62, %v6794_v28  ;;  %v6094_v17 = vld [vmem:[%s7867_s8 + $0x60] sm:$0xff]  }
  0x84   : > { %v1057_v42 = vor.u32 %v1056_v20, %v1053_v18  ;;  %v1048_v43 = vor.u32 %v1047_v8, %v1044_v19  ;;  %5839 = vmatprep.subr.bf16.mxu1 %v6067_v1  ;;  %v6079_v59 = vld [vmem:[%s7868_s9 + $0x130] sm:$0xff]   ;;  %v1999_v19 = vrot.slane %v1666_v38, 4  ;;  %v6084_v8 = vld [vmem:[%s7868_s9 + $0x160] sm:$0xff]   ;;  %v6089_v16 = vld [vmem:[%s7868_s9 + $0x118] sm:$0xff]  }
  0x85   : > { %v1669_v9 = vsel %vm1645_vm6, %v1664_v48, %v6899_v50  ;;  %v6102_v38 = vld [vmem:[%s7868_s9 + $0x1b0] sm:$0xff]   ;;  %v6093_v48 = vld [vmem:[%s7868_s9 + $0x148] sm:$0xff]  }
  0x86   : > { %5520 = vmatpush3.bf16.msra.mxu0 %v6074_v55  ;;  %v1058_v14 = vsel %vm1006_vm5, %v1039_v46, %v1057_v42  ;;  %v1049_v15 = vsel %vm1006_vm5, %v1022_v47, %v1048_v43  ;;  %v1312_v46 = vpack.c.bf16 %v6791_v26, %v6823_v34  ;;  %v6073_v47 = vld [vmem:[%s7868_s9 + $0x178] sm:$0xff]   ;;  %v1942_v34 = vpack.c.bf16 %v6785_v23, %v1938_v41  ;;  %v6091_v23 = vld [vmem:[%s7867_s8 + $0x68] sm:$0xff]   ;;  %v6168_v62 = vld [vmem:[%s7867_s8 + $0xf0] sm:$0xff]  }
  0x87   : > { %5521 = vmatprep.subr.bf16.mxu0 %v6076_v56  ;;  %1199 = vmatprep.mubr.bf16.mxu1 %v1058_v14  ;;  %v6100_v14 = vld [vmem:[%s7868_s9 + $0x1f0] sm:$0xff]   ;;  %v1605_v41 = vld [vmem:[#allocation3 + $0x68] sm:$0x1] }
  0x88   : > { %1200 = vmatmul.mubr.bf16.gmra.mxu1 %v1049_v15  ;;  %v1991_v55 = vshrl.u32 %v1942_v34, 16  ;;  %v1994_v56 = vshll.u32 %v1942_v34, 16  ;;  %v1611_v34 = vpack.c.bf16 %v1605_v41, %v1605_v41 }
  0x89   : > { %5840 = vmatpush3.bf16.msra.mxu1 %v6067_v1  ;;  %5843 = vmatprep.mubr.msk.bf16.mxu1 %vm591_vm0, %v1502_v37  ;;  %v1678_v1 = vshrl.u32 %v6869_v11, 16  ;;  %v1596_v37 = vld [vmem:[#allocation3 + $0x38] sm:$0xfe] }
  0x8a   : > { %5522 = vmatpush3.bf16.msra.mxu0 %v6078_v4  ;;  %5841 = vmatprep.subr.bf16.mxu1 %v6070_v24  ;;  %v6083_v4 = vld [vmem:[%s7868_s9 + $0x128] sm:$0xff]   ;;  %v1993_v18 = vrot.slane %v1991_v55, 3  ;;  %v1996_v28 = vrot.slane %v1994_v56, 4  ;;  %v1606_v15 = vpack.c.bf16 %v6791_v26, %v1596_v37  ;;  %v1654_v55 = vshll.u32 %v6932_v61, 16  ;;  %v1937_v56 = vld [vmem:[#allocation3 + $0x38] sm:$0x80] }
  0x8b   : > { %5523 = vmatprep.subr.bf16.mxu0 %v6080_v36  ;;  %v1998_v20 = vrot.slane %v1678_v1, 3  ;;  %v6087_v36 = vld [vmem:[%s7868_s9 + $0x158] sm:$0xff]   ;;  %v1670_v37 = vshrl.u32 %v6932_v61, 16 }
  0x8c   : > { %v1997_v42 = vor.u32 %v1996_v28, %v1993_v18  ;;  %v1656_v28 = vrot.slane %v1654_v55, 1 }
  0x8d   : > { %5842 = vmatpush3.bf16.msra.mxu1 %v6070_v24  ;;  %v6961_v43 = vor.u32 %v1999_v19, %v1998_v20  ;;  %v1844_v24 = vpack.c.bf16 %v6949_v52, %v6700_v53  ;;  %v6090_v53 = vld [vmem:[%s7868_s9 + $0x150] sm:$0xff]   ;;  %v6101_v20 = vld [vmem:[%s7867_s8 + $0x98] sm:$0xff]  }
  0x8e   : > { %5524 = vmatpush3.bf16.msra.mxu0 %v6082_v13  ;;  %5543 = vmatprep.subr.bf16.mxu1 %v6073_v47  ;;  %v6099_v13 = vld [vmem:[%s7868_s9 + $0x1b8] sm:$0xff]   ;;  %v1649_v47 = vshll.u32 %v1606_v15, 16 }
  0x8f   : > { %5847 = vmatprep.subr.bf16.mxu0 %v6085_v40  ;;  %v2001_v39 = vsel %vm1006_vm5, %v1997_v42, %v6961_v43  ;;  %v6111_v42 = vld [vmem:[%s7868_s9 + $0x198] sm:$0xff]  }
  0x90   : > { %5844 = vmatmul.mubr.msk.bf16.vlgmr.msra.gmra.mxu1 %vm591_vm0, %v1503_v63  ;;  %v6095_v63 = vld [vmem:[%s7868_s9 + $0x108] sm:$0xff]  }
  0x91   : > { %1478 = vmatmul.mubr.bf16.vlgmr.msra.gmra.mxu0 %v1312_v46  ;;  %5544 = vmatpush3.bf16.msra.mxu1 %v6075_v2  ;;  %v6092_v46 = vld [vmem:[%s7868_s9 + $0x110] sm:$0xff]   ;;  %v1647_v2 = vshrl.u32 %v1606_v15, 16 }
  0x92   : > { %5848 = vmatpush3.bf16.msra.mxu0 %v6085_v40  ;;  %1485 = vmatprep.mubr.bf16.mxu0 %v6869_v11  ;;  %v6103_v40 = vld [vmem:[%s7868_s9 + $0x1e8] sm:$0xff]   ;;  %v6114_v11 = vld [vmem:[%s7868_s9 + $0x190] sm:$0xff]  }
  0x93   : > { %5849 = vmatprep.subr.bf16.mxu0 %v6088_v54  ;;  %1818 = vmatprep.mubr.bf16.mxu1 %v1669_v9  ;;  %v1651_v9 = vrot.slane %v1649_v47, 1  ;;  %v6118_v47 = vld [vmem:[%s7868_s9 + $0x188] sm:$0xff]  }
  0x94   : > { %5545 = vmatprep.subr.bf16.mxu1 %v6077_v6  ;;  %v6106_v6 = vld [vmem:[%s7868_s9 + $0x1e0] sm:$0xff]  }
  0x95   : > { %5546 = vmatpush3.bf16.msra.mxu1 %v6079_v59  ;;  %v1604_v59 = vld [vmem:[#allocation3 + $0x58] sm:$0x1]  ;;  %v1652_v18 = vor.u32 %v1651_v9, %v1647_v2 }
  0x96   : > { %5850 = vmatpush3.bf16.msra.mxu0 %v6088_v54  ;;  %5547 = vmatprep.subr.bf16.mxu1 %v6081_v60  ;;  %v6105_v54 = vld [vmem:[%s7868_s9 + $0x1a8] sm:$0xff]   ;;  %v1682_v60 = vshll.u32 %v1611_v34, 16  ;;  %v1610_v19 = vpack.c.bf16 %v1604_v59, %v1604_v59 }
  0x97   : > { %5851 = vmatprep.subr.bf16.mxu0 %v6091_v23 }
  0x99   : > { %1486 = vmatmul.mubr.bf16.gmra.mxu0 %v6932_v61  ;;  %5548 = vmatpush3.bf16.msra.mxu1 %v6083_v4  ;;  %v6109_v4 = vld [vmem:[%s7868_s9 + $0x1d8] sm:$0xff]  }
  0x9a   : > { %5852 = vmatpush3.bf16.msra.mxu0 %v6091_v23  ;;  %5855 = vmatprep.mubr.msk.bf16.mxu0 %vm591_vm0, %v1843_v5  ;;  %v6096_v23 = vld [vmem:[%s7868_s9 + $0x140] sm:$0xff]   ;;  %v1939_v61 = vld [vmem:[#allocation3 + $0x58] sm:$0x7f] }
  0x9b   : > { %5853 = vmatprep.subr.bf16.mxu0 %v6094_v17  ;;  %5549 = vmatprep.subr.bf16.mxu1 %v6084_v8  ;;  %v6098_v5 = vld [vmem:[%s7868_s9 + $0x100] sm:$0xff]   ;;  %v1941_v8 = vpack.c.bf16 %v6791_v26, %v1937_v56  ;;  %v6104_v26 = vld [vmem:[%s7867_s8 + $0x90] sm:$0xff]   ;;  %v1943_v2 = vpack.c.bf16 %v1939_v61, %v1939_v61 }
  0x9d   : > { %5550 = vmatpush3.bf16.msra.mxu1 %v6086_v49  ;;  %v1940_v49 = vld [vmem:[#allocation3 + $0x68] sm:$0x7f]  ;;  %v1982_v15 = vshll.u32 %v1941_v8, 16 }
  0x9e   : > { %5854 = vmatpush3.bf16.msra.mxu0 %v6094_v17  ;;  %5551 = vmatprep.subr.bf16.mxu1 %v6087_v36  ;;  %v6108_v17 = vld [vmem:[%s7868_s9 + $0x1a0] sm:$0xff]   ;;  %v1684_v36 = vrot.slane %v1682_v60, 1 }
  0x9f   : > { %5577 = vmatprep.subr.bf16.mxu0 %v6097_v51  ;;  %v1680_v51 = vor.u32 %v1678_v1, %v6899_v50  ;;  %v1944_v50 = vpack.c.bf16 %v1940_v49, %v1940_v49  ;;  %v1657_v1 = vsel %vm1645_vm6, %v1652_v18, %v1656_v28  ;;  %v1984_v34 = vrot.slane %v1982_v15, 4  ;;  %v6122_v60 = vld [vmem:[%s7868_s9 + $0x180] sm:$0xff]   ;;  %v7056_v18 = vld [vmem:[#allocation2 + $0x28] sm:$0xff]  ;;  %v7068_v49 = vld [vmem:[#allocation3 + $0x78] sm:$0xff] }
  0xa0   : > { %v2463_v15 = vpack.c.bf16 %v6886_v3, %v6871_v12  ;;  %v6137_v12 = vld [vmem:[%s7868_s9 + $0x2f8] sm:$0xff]  }
  0xa1   : > { %5856 = vmatmul.mubr.msk.bf16.vlgmr.msra.gmra.mxu0 %vm591_vm0, %v1844_v24  ;;  %5552 = vmatpush3.bf16.msra.mxu1 %v6089_v16  ;;  %v6112_v24 = vld [vmem:[%s7868_s9 + $0x1d0] sm:$0xff]   ;;  %v1979_v16 = vshrl.u32 %v1941_v8, 16  ;;  %v2558_v8 = vld [vmem:[#allocation3 + $0x60] sm:$0xfe] }
  0xa2   : > { %5578 = vmatpush3.bf16.msra.mxu0 %v6099_v13  ;;  %2152 = vmatprep.mubr.bf16.mxu0 %v2001_v39  ;;  %v1674_v13 = vshll.u32 %v1610_v19, 16  ;;  %v2012_v39 = vshrl.u32 %v1944_v50, 16  ;;  %v2568_v58 = vpack.c.bf16 %v7068_v49, %v2558_v8  ;;  %v6149_v8 = vld [vmem:[%s7868_s9 + $0x2d8] sm:$0xff]  }
  0xa3   : > { %5579 = vmatprep.subr.bf16.mxu0 %v6100_v14  ;;  %5553 = vmatprep.subr.bf16.mxu1 %v6090_v53  ;;  %v1685_v14 = vsel %vm1645_vm6, %v1680_v51, %v1684_v36  ;;  %v6116_v53 = vld [vmem:[%s7868_s9 + $0x1c8] sm:$0xff]  }
  0xa4   : > { %v1676_v41 = vrot.slane %v1674_v13, 1  ;;  %v2014_v9 = vrot.slane %v2012_v39, 3  ;;  %v6119_v13 = vld [vmem:[%s7868_s9 + $0x230] sm:$0xff]   ;;  %v2619_v61 = vshrl.u32 %v2568_v58, 16 }
  0xa5   : > { %5554 = vmatpush3.bf16.msra.mxu1 %v6092_v46  ;;  %v6107_v46 = vld [vmem:[%s7867_s8 + $0x88] sm:$0xff]  }
  0xa6   : > { %5580 = vmatpush3.bf16.msra.mxu0 %v6102_v38  ;;  %5555 = vmatprep.subr.bf16.mxu1 %v6093_v48  ;;  %v2015_v38 = vshll.u32 %v1944_v50, 16  ;;  %v1981_v48 = vrot.slane %v1979_v16, 3  ;;  %v6121_v16 = vld [vmem:[%s7868_s9 + $0x268] sm:$0xff]  }
  0xa7   : > { %5581 = vmatprep.subr.bf16.mxu0 %v6103_v40  ;;  %v1672_v40 = vor.u32 %v1670_v37, %v1656_v28  ;;  %v6125_v28 = vld [vmem:[%s7867_s8 + $0xb8] sm:$0xff]  }
  0xa8   : > { %v2017_v56 = vrot.slane %v2015_v38, 4 }
  0xa9   : > { %5556 = vmatpush3.bf16.msra.mxu1 %v6095_v63  ;;  %v1987_v63 = vrot.slane %v1654_v55, 4  ;;  %v1677_v59 = vsel %vm1645_vm6, %v1672_v40, %v1676_v41  ;;  %v1985_v55 = vor.u32 %v1984_v34, %v1981_v48  ;;  %v6124_v40 = vld [vmem:[%s7868_s9 + $0x260] sm:$0xff]   ;;  %v7115_v41 = vld [vmem:[#allocation2 + $0x29] sm:$0xff]  ;;  %v6127_v48 = vld [vmem:[%s7868_s9 + $0x258] sm:$0xff]  }
  0xaa   : > { %5582 = vmatpush3.bf16.msra.mxu0 %v6105_v54  ;;  %5557 = vmatprep.subr.bf16.mxu1 %v6096_v23  ;;  %v1986_v54 = vrot.slane %v1670_v37, 3  ;;  %v6110_v23 = vld [vmem:[%s7867_s8 + $0x80] sm:$0xff]   ;;  %v2018_v19 = vor.u32 %v2017_v56, %v2014_v9  ;;  %v7082_v37 = vld [vmem:[#allocation3 + $0x50] sm:$0xff]  ;;  %v6139_v34 = vld [vmem:[%s7868_s9 + $0x2b8] sm:$0xff]  }
  0xab   : > { %5583 = vmatprep.subr.bf16.mxu0 %v6106_v6  ;;  %v6120_v6 = vld [vmem:[%s7868_s9 + $0x1c0] sm:$0xff]   ;;  %v7093_v50 = vpack.c.bf16 %v6806_v29, %v7082_v37  ;;  %v6143_v9 = vld [vmem:[%s7868_s9 + $0x2e8] sm:$0xff]   ;;  %v6132_v56 = vld [vmem:[%s7868_s9 + $0x210] sm:$0xff]  }
  0xac   : > { %v2019_v57 = vsel %vm1006_vm5, %v6961_v43, %v2018_v19  ;;  %v6131_v43 = vld [vmem:[%s7867_s8 + $0xa8] sm:$0xff]   ;;  %v6138_v19 = vld [vmem:[%s7868_s9 + $0x200] sm:$0xff]  }
  0xad   : > { %5558 = vmatpush3.bf16.msra.mxu1 %v6098_v5  ;;  %v2006_v5 = vshll.u32 %v1943_v2, 16  ;;  %v2626_v38 = vshll.u32 %v7093_v50, 16  ;;  %v6162_v29 = vld [vmem:[%s7868_s9 + $0x280] sm:$0xff]  }
  0xae   : > { %5584 = vmatpush3.bf16.msra.mxu0 %v6108_v17  ;;  %5859 = vmatprep.subr.bf16.mxu1 %v6101_v20  ;;  %v1988_v17 = vor.u32 %v1987_v63, %v1986_v54  ;;  %v2464_v54 = vpack.c.bf16 %v7115_v41, %v6892_v45  ;;  %v6140_v63 = vld [vmem:[%s7868_s9 + $0x2f0] sm:$0xff]  }
  0xaf   : > { %5585 = vmatprep.subr.bf16.mxu0 %v6109_v4  ;;  %v2003_v4 = vshrl.u32 %v1943_v2, 16  ;;  %v6130_v45 = vld [vmem:[%s7868_s9 + $0x250] sm:$0xff]  }
  0xb0   : > { %1819 = vmatmul.mubr.bf16.vlgmr.msra.gmra.mxu1 %v1657_v1  ;;  %v1989_v51 = vsel %vm1006_vm5, %v1985_v55, %v1988_v17  ;;  %v2621_v1 = vshll.u32 %v2568_v58, 16  ;;  %v6135_v55 = vld [vmem:[%s7868_s9 + $0x208] sm:$0xff]   ;;  %v6144_v58 = vld [vmem:[%s7867_s8 + $0xd0] sm:$0xff]  }
  0xb1   : > { %5860 = vmatpush3.bf16.msra.mxu1 %v6101_v20  ;;  %1826 = vmatprep.mubr.bf16.mxu1 %v1685_v14  ;;  %v6113_v20 = vld [vmem:[%s7868_s9 + $0x278] sm:$0xff]   ;;  %v2005_v36 = vrot.slane %v2003_v4, 3  ;;  %v6136_v4 = vld [vmem:[%s7868_s9 + $0x240] sm:$0xff]  }
  0xb2   : > { %5586 = vmatpush3.bf16.msra.mxu0 %v6111_v42  ;;  %5861 = vmatprep.subr.bf16.mxu1 %v6104_v26  ;;  %v2008_v42 = vrot.slane %v2006_v5, 4  ;;  %v2623_v39 = vrot.slane %v2621_v1, 1  ;;  %v2557_v5 = vld [vmem:[#allocation3 + $0x20] sm:$0xfe]  ;;  %v6154_v1 = vld [vmem:[%s7868_s9 + $0x290] sm:$0xff]  }
  0xb3   : > { %5587 = vmatprep.subr.bf16.mxu0 %v6112_v24  ;;  %v6128_v24 = vld [vmem:[%s7867_s8 + $0xb0] sm:$0xff]  }
  0xb4   : > { %v2624_v3 = vor.u32 %v2623_v39, %v2619_v61  ;;  %v6158_v61 = vld [vmem:[%s7868_s9 + $0x288] sm:$0xff]  }
  0xb5   : > { %5862 = vmatpush3.bf16.msra.mxu1 %v6104_v26  ;;  %v2178_v26 = vpack.c.bf16 %v7056_v18, %v6735_v32  ;;  %v2009_v32 = vor.u32 %v2008_v42, %v2005_v36  ;;  %v6151_v36 = vld [vmem:[%s7868_s9 + $0x298] sm:$0xff]  }
  0xb6   : > { %5588 = vmatpush3.bf16.msra.mxu0 %v6114_v11  ;;  %5863 = vmatprep.subr.bf16.mxu1 %v6107_v46  ;;  %v6117_v11 = vld [vmem:[%s7868_s9 + $0x270] sm:$0xff]  }
  0xb7   : > { %5589 = vmatprep.subr.bf16.mxu0 %v6116_v53  ;;  %v2010_v14 = vsel %vm1006_vm5, %v1988_v17, %v2009_v32  ;;  %v6134_v53 = vld [vmem:[%s7867_s8 + $0xa0] sm:$0xff]  }
  0xb8   : > { %1827 = vmatmul.mubr.bf16.gmra.mxu1 %v1677_v59  ;;  %v6133_v59 = vld [vmem:[%s7868_s9 + $0x248] sm:$0xff]   ;;  %v6146_v17 = vld [vmem:[%s7868_s9 + $0x2e0] sm:$0xff]  }
  0xb9   : > { %5864 = vmatpush3.bf16.msra.mxu1 %v6107_v46  ;;  %5867 = vmatprep.mubr.msk.bf16.mxu1 %vm591_vm0, %v2177_v0  ;;  %v6115_v0 = vld [vmem:[%s7868_s9 + $0x238] sm:$0xff]   ;;  %v7123_v46 = vrot.slane %v2626_v38, 1 }
  0xba   : > { %5590 = vmatpush3.bf16.msra.mxu0 %v6118_v47  ;;  %5865 = vmatprep.subr.bf16.mxu1 %v6110_v23  ;;  %v6126_v47 = vld [vmem:[%s7868_s9 + $0x220] sm:$0xff]  }
  0xbb   : > { %5591 = vmatprep.subr.bf16.mxu0 %v6120_v6  ;;  %v2629_v2 = vsel %vm1645_vm6, %v2624_v3, %v7123_v46  ;;  %v6129_v6 = vld [vmem:[%s7868_s9 + $0x218] sm:$0xff]  }
  0xbd   : > { %5866 = vmatpush3.bf16.msra.mxu1 %v6110_v23  ;;  %v6142_v23 = vld [vmem:[%s7868_s9 + $0x2b0] sm:$0xff]  }
  0xbe   : > { %5592 = vmatpush3.bf16.msra.mxu0 %v6122_v60  ;;  %5611 = vmatprep.subr.bf16.mxu1 %v6113_v20  ;;  %v6145_v60 = vld [vmem:[%s7868_s9 + $0x2a8] sm:$0xff]   ;;  %v6148_v20 = vld [vmem:[%s7868_s9 + $0x2a0] sm:$0xff]  }
  0xbf   : > { %5871 = vmatprep.subr.bf16.mxu0 %v6125_v28 }
  0xc0   : > { %5868 = vmatmul.mubr.msk.bf16.vlgmr.msra.gmra.mxu1 %vm591_vm0, %v2178_v26  ;;  %v6152_v26 = vld [vmem:[%s7868_s9 + $0x2d0] sm:$0xff]  }
  0xc1   : > { %2153 = vmatmul.mubr.bf16.vlgmr.msra.gmra.mxu0 %v1989_v51  ;;  %5612 = vmatpush3.bf16.msra.mxu1 %v6115_v0  ;;  %v6141_v51 = vld [vmem:[%s7867_s8 + $0xd8] sm:$0xff]  }
  0xc2   : > { %5872 = vmatpush3.bf16.msra.mxu0 %v6125_v28  ;;  %2160 = vmatprep.mubr.bf16.mxu0 %v2019_v57  ;;  %v7172_v28 = vld [vmem:[#allocation3 + $0x10] sm:$0xff]  ;;  %v2898_v57 = vld [vmem:[#allocation3 + $0x60] sm:$0x80]  ;;  %v7198_v0 = vld [vmem:[#allocation3 + $0x58] sm:$0xff] }
  0xc3   : > { %5873 = vmatprep.subr.bf16.mxu0 %v6128_v24  ;;  %2438 = vmatprep.mubr.bf16.mxu1 %v6815_v30  ;;  %v6123_v30 = vld [vmem:[%s7868_s9 + $0x228] sm:$0xff]   ;;  %v2567_v42 = vpack.c.bf16 %v7172_v28, %v2557_v5  ;;  %v6155_v5 = vld [vmem:[%s7868_s9 + $0x338] sm:$0xff]  }
  0xc4   : > { %5613 = vmatprep.subr.bf16.mxu1 %v6117_v11 }
  0xc5   : > { %5614 = vmatpush3.bf16.msra.mxu1 %v6119_v13  ;;  %v2609_v32 = vshll.u32 %v2567_v42, 16  ;;  %v2902_v13 = vpack.c.bf16 %v7068_v49, %v2898_v57 }
  0xc6   : > { %5874 = vmatpush3.bf16.msra.mxu0 %v6128_v24  ;;  %5615 = vmatprep.subr.bf16.mxu1 %v6121_v16  ;;  %v7190_v24 = vld [vmem:[#allocation3 + $0x40] sm:$0xff]  ;;  %v6156_v16 = vld [vmem:[%s7868_s9 + $0x2c8] sm:$0xff]  }
  0xc7   : > { %5875 = vmatprep.subr.bf16.mxu0 %v6131_v43  ;;  %v7202_v11 = vpack.c.bf16 %v7198_v0, %v7190_v24  ;;  %v2611_v39 = vrot.slane %v2609_v32, 1  ;;  %v2951_v3 = vshrl.u32 %v2902_v13, 16  ;;  %v6161_v32 = vld [vmem:[%s7868_s9 + $0x368] sm:$0xff]  }
  0xc9   : > { %2161 = vmatmul.mubr.bf16.gmra.mxu0 %v2010_v14  ;;  %5616 = vmatpush3.bf16.msra.mxu1 %v6123_v30  ;;  %v2607_v14 = vshrl.u32 %v2567_v42, 16  ;;  %v2800_v30 = vld [vmem:[#allocation2 + $0x1f] sm:$0xff]  ;;  %v2630_v25 = vshrl.u32 %v7202_v11, 16 }
  0xca   : > { %5876 = vmatpush3.bf16.msra.mxu0 %v6131_v43  ;;  %5879 = vmatprep.mubr.msk.bf16.mxu0 %vm591_vm0, %v2463_v15  ;;  %v2566_v43 = vld [vmem:[#allocation3 + $0x48] sm:$0x1]  ;;  %v2799_v15 = vld [vmem:[#allocation2 + $0x17] sm:$0xff] }
  0xcb   : > { %5877 = vmatprep.subr.bf16.mxu0 %v6134_v53  ;;  %5617 = vmatprep.subr.bf16.mxu1 %v6124_v40  ;;  %v2614_v40 = vshll.u32 %v7202_v11, 16  ;;  %v2803_v22 = vpack.c.bf16 %v2800_v30, %v2799_v15  ;;  %v6177_v15 = vld [vmem:[%s7868_s9 + $0x3f8] sm:$0xff]   ;;  %v6166_v30 = vld [vmem:[%s7868_s9 + $0x320] sm:$0xff]  }
  0xcc   : > { %v6178_v11 = vld [vmem:[%s7868_s9 + $0x300] sm:$0xff]  }
  0xcd   : > { %5618 = vmatpush3.bf16.msra.mxu1 %v6126_v47  ;;  %v2954_v47 = vshll.u32 %v2902_v13, 16 }
  0xce   : > { %5878 = vmatpush3.bf16.msra.mxu0 %v6134_v53  ;;  %5619 = vmatprep.subr.bf16.mxu1 %v6127_v48  ;;  %v6147_v53 = vld [vmem:[%s7867_s8 + $0xc8] sm:$0xff]   ;;  %v6160_v48 = vld [vmem:[%s7868_s9 + $0x2c0] sm:$0xff]  }
  0xcf   : > { %5645 = vmatprep.subr.bf16.mxu0 %v6137_v12  ;;  %v2572_v12 = vpack.c.bf16 %v2566_v43, %v2566_v43  ;;  %v6174_v43 = vld [vmem:[%s7867_s8 + $0xe0] sm:$0xff]  }
  0xd1   : > { %5880 = vmatmul.mubr.msk.bf16.vlgmr.msra.gmra.mxu0 %vm591_vm0, %v2464_v54  ;;  %5620 = vmatpush3.bf16.msra.mxu1 %v6129_v6  ;;  %v6150_v54 = vld [vmem:[%s7867_s8 + $0xc0] sm:$0xff]   ;;  %v2616_v6 = vrot.slane %v2614_v40, 1 }
  0xd2   : > { %5646 = vmatpush3.bf16.msra.mxu0 %v6139_v34  ;;  %2778 = vmatprep.mubr.bf16.mxu0 %v2629_v2  ;;  %v2638_v34 = vshrl.u32 %v7093_v50, 16  ;;  %v6153_v50 = vld [vmem:[%s7868_s9 + $0x378] sm:$0xff]  }
  0xd3   : > { %5647 = vmatprep.subr.bf16.mxu0 %v6140_v63  ;;  %5621 = vmatprep.subr.bf16.mxu1 %v6130_v45  ;;  %v2642_v63 = vshll.u32 %v2572_v12, 16  ;;  %v2953_v45 = vrot.slane %v2951_v3, 3  ;;  %v2632_v42 = vor.u32 %v2630_v25, %v2616_v6  ;;  %v6179_v12 = vld [vmem:[%s7868_s9 + $0x3b8] sm:$0xff]   ;;  %v6180_v3 = vld [vmem:[%s7868_s9 + $0x3f0] sm:$0xff]  }
  0xd5   : > { %5622 = vmatpush3.bf16.msra.mxu1 %v6132_v56  ;;  %v2959_v56 = vrot.slane %v2626_v38, 4 }
  0xd6   : > { %5648 = vmatpush3.bf16.msra.mxu0 %v6142_v23  ;;  %5623 = vmatprep.subr.bf16.mxu1 %v6133_v59  ;;  %v2956_v23 = vrot.slane %v2954_v47, 4  ;;  %v6165_v59 = vld [vmem:[%s7867_s8 + $0xf8] sm:$0xff]   ;;  %v2900_v47 = vld [vmem:[#allocation3 + $0x48] sm:$0x7f] }
  0xd7   : > { %5649 = vmatprep.subr.bf16.mxu0 %v6143_v9  ;;  %v2958_v9 = vrot.slane %v2638_v34, 3 }
  0xd9   : > { %5624 = vmatpush3.bf16.msra.mxu1 %v6135_v55  ;;  %v2644_v55 = vrot.slane %v2642_v63, 1  ;;  %v6182_v63 = vld [vmem:[%s7868_s9 + $0x3b0] sm:$0xff]  }
  0xda   : > { %5650 = vmatpush3.bf16.msra.mxu0 %v6145_v60  ;;  %5625 = vmatprep.subr.bf16.mxu1 %v6136_v4  ;;  %v2640_v60 = vor.u32 %v2638_v34, %v7123_v46  ;;  %v2802_v4 = vld [vmem:[#allocation2 + $0x2f] sm:$0xff]  ;;  %v7252_v46 = vor.u32 %v2959_v56, %v2958_v9 }
  0xdb   : > { %5651 = vmatprep.subr.bf16.mxu0 %v6146_v17  ;;  %v6170_v34 = vld [vmem:[%s7868_s9 + $0x350] sm:$0xff]  }
  0xdc   : > { %v2899_v56 = vld [vmem:[#allocation3 + $0x30] sm:$0x7f] }
  0xdd   : > { %5626 = vmatpush3.bf16.msra.mxu1 %v6138_v19  ;;  %v6157_v19 = vld [vmem:[%s7868_s9 + $0x370] sm:$0xff]  }
  0xde   : > { %5652 = vmatpush3.bf16.msra.mxu0 %v6148_v20  ;;  %5883 = vmatprep.subr.bf16.mxu1 %v6141_v51  ;;  %v2804_v20 = vpack.c.bf16 %v2802_v4, %v6949_v52  ;;  %v3134_v52 = vld [vmem:[#allocation2 + $0x20] sm:$0xff] }
  0xdf   : > { %5653 = vmatprep.subr.bf16.mxu0 %v6149_v8  ;;  %v2645_v8 = vsel %vm1645_vm6, %v2640_v60, %v2644_v55  ;;  %v2946_v60 = vrot.slane %v2630_v25, 3  ;;  %v6175_v55 = vld [vmem:[%s7868_s9 + $0x308] sm:$0xff]   ;;  %v6188_v25 = vld [vmem:[%s7868_s9 + $0x3a0] sm:$0xff]  }
  0xe0   : > { %2439 = vmatmul.mubr.bf16.vlgmr.msra.gmra.mxu1 %v6821_v31  ;;  %v2565_v31 = vld [vmem:[#allocation3 + $0x30] sm:$0x1] }
  0xe1   : > { %5884 = vmatpush3.bf16.msra.mxu1 %v6141_v51  ;;  %2446 = vmatprep.mubr.bf16.mxu1 %v2276_v7  ;;  %v2571_v2 = vpack.c.bf16 %v2565_v31, %v2565_v31  ;;  %v2612_v7 = vor.u32 %v2611_v39, %v2607_v14  ;;  %v6164_v14 = vld [vmem:[%s7868_s9 + $0x360] sm:$0xff]   ;;  %v6167_v39 = vld [vmem:[%s7868_s9 + $0x358] sm:$0xff]  }
  0xe2   : > { %5654 = vmatpush3.bf16.msra.mxu0 %v6151_v36  ;;  %5885 = vmatprep.subr.bf16.mxu1 %v6144_v58  ;;  %v6171_v36 = vld [vmem:[%s7867_s8 + $0xe8] sm:$0xff]   ;;  %v2897_v31 = vld [vmem:[#allocation3 + $0x20] sm:$0x80] }
  0xe3   : > { %5655 = vmatprep.subr.bf16.mxu0 %v6152_v26  ;;  %v2634_v17 = vshll.u32 %v2571_v2, 16  ;;  %v2617_v38 = vsel %vm1645_vm6, %v2612_v7, %v2616_v6  ;;  %v3133_v26 = vld [vmem:[#allocation2 + $0x18] sm:$0xff]  ;;  %v6183_v2 = vld [vmem:[%s7868_s9 + $0x3e8] sm:$0xff]  }
  0xe4   : > { %v3137_v13 = vpack.c.bf16 %v3134_v52, %v3133_v26  ;;  %v6173_v6 = vld [vmem:[%s7868_s9 + $0x348] sm:$0xff]   ;;  %v6191_v26 = vld [vmem:[%s7868_s9 + $0x398] sm:$0xff]   ;;  %v6192_v52 = vld [vmem:[%s7868_s9 + $0x3d0] sm:$0xff]  }
  0xe5   : > { %5886 = vmatpush3.bf16.msra.mxu1 %v6144_v58  ;;  %v2636_v51 = vrot.slane %v2634_v17, 1  ;;  %v6159_v58 = vld [vmem:[%s7868_s9 + $0x330] sm:$0xff]  }
  0xe6   : > { %5656 = vmatpush3.bf16.msra.mxu0 %v6154_v1  ;;  %5887 = vmatprep.subr.bf16.mxu1 %v6147_v53 }
  0xe7   : > { %5657 = vmatprep.subr.bf16.mxu0 %v6156_v16  ;;  %v2637_v1 = vsel %vm1645_vm6, %v2632_v42, %v2636_v51  ;;  %v6163_v16 = vld [vmem:[%s7868_s9 + $0x328] sm:$0xff]  }
  0xe8   : > { %2447 = vmatmul.mubr.bf16.gmra.mxu1 %v2275_v10  ;;  %v2957_v10 = vor.u32 %v2956_v23, %v2953_v45  ;;  %v6185_v45 = vld [vmem:[%s7868_s9 + $0x3a8] sm:$0xff]  }
  0xe9   : > { %5888 = vmatpush3.bf16.msra.mxu1 %v6147_v53  ;;  %5891 = vmatprep.mubr.msk.bf16.mxu1 %vm591_vm0, %v2803_v22  ;;  %v3136_v53 = vld [vmem:[#allocation2 + $0x30] sm:$0xff] }
  0xea   : > { %5658 = vmatpush3.bf16.msra.mxu0 %v6158_v61  ;;  %5889 = vmatprep.subr.bf16.mxu1 %v6150_v54  ;;  %v2961_v57 = vsel %vm1006_vm5, %v2957_v10, %v7252_v46  ;;  %v3138_v61 = vpack.c.bf16 %v3136_v53, %v7056_v18  ;;  %v3234_v18 = vpack.c.bf16 %v7082_v37, %v7068_v49  ;;  %v6172_v22 = vld [vmem:[%s7868_s9 + $0x310] sm:$0xff]   ;;  %v6196_v53 = vld [vmem:[%s7868_s9 + $0x3c8] sm:$0xff]  }
  0xeb   : > { %5659 = vmatprep.subr.bf16.mxu0 %v6160_v48  ;;  %v6169_v48 = vld [vmem:[%s7868_s9 + $0x318] sm:$0xff]   ;;  %v2904_v49 = vpack.c.bf16 %v2900_v47, %v2900_v47  ;;  %v6200_v47 = vld [vmem:[%s7868_s9 + $0x3c0] sm:$0xff]  }
  0xed   : > { %5890 = vmatpush3.bf16.msra.mxu1 %v6150_v54  ;;  %v2901_v54 = vpack.c.bf16 %v7172_v28, %v2897_v31  ;;  %v2972_v23 = vshrl.u32 %v2904_v49, 16  ;;  %v2975_v9 = vshll.u32 %v2904_v49, 16 }
  0xee   : > { %5660 = vmatpush3.bf16.msra.mxu0 %v6162_v29  ;;  %5679 = vmatprep.subr.bf16.mxu1 %v6153_v50  ;;  %v2947_v50 = vrot.slane %v2614_v40, 4 }
  0xef   : > { %5895 = vmatprep.subr.bf16.mxu0 %v6165_v59  ;;  %v2939_v29 = vshrl.u32 %v2901_v54, 16  ;;  %v2942_v7 = vshll.u32 %v2901_v54, 16  ;;  %v2974_v10 = vrot.slane %v2972_v23, 3  ;;  %v6190_v54 = vld [vmem:[%s7867_s8 + $0x100] sm:$0xff]  }
  0xf0   : > { %5892 = vmatmul.mubr.msk.bf16.vlgmr.msra.gmra.mxu1 %vm591_vm0, %v2804_v20  ;;  %v6189_v20 = vld [vmem:[%s7868_s9 + $0x3d8] sm:$0xff]  }
  0xf1   : > { %2779 = vmatmul.mubr.bf16.vlgmr.msra.gmra.mxu0 %v2617_v38  ;;  %5680 = vmatpush3.bf16.msra.mxu1 %v6155_v5  ;;  %v2941_v17 = vrot.slane %v2939_v29, 3  ;;  %v2944_v4 = vrot.slane %v2942_v7, 4  ;;  %v2903_v38 = vpack.c.bf16 %v2899_v56, %v2899_v56  ;;  %v2977_v5 = vrot.slane %v2975_v9, 4  ;;  %v6193_v7 = vld [vmem:[%s7868_s9 + $0x478] sm:$0xff]  }
  0xf2   : > { %5896 = vmatpush3.bf16.msra.mxu0 %v6165_v59  ;;  %2786 = vmatprep.mubr.bf16.mxu0 %v2645_v8  ;;  %v6186_v59 = vld [vmem:[%s7868_s9 + $0x3e0] sm:$0xff]   ;;  %v3233_v29 = vpack.c.bf16 %v7190_v24, %v7172_v28  ;;  %v6197_v28 = vld [vmem:[%s7868_s9 + $0x470] sm:$0xff]  }
  0xf3   : > { %5897 = vmatprep.subr.bf16.mxu0 %v6168_v62  ;;  %3112 = vmatprep.mubr.bf16.mxu1 %v2961_v57  ;;  %v2945_v40 = vor.u32 %v2944_v4, %v2941_v17  ;;  %v2963_v8 = vshrl.u32 %v2903_v38, 16  ;;  %v2966_v51 = vshll.u32 %v2903_v38, 16  ;;  %v2978_v42 = vor.u32 %v2977_v5, %v2974_v10  ;;  %v3518_v57 = vld [vmem:[#allocation3 + $0x78] sm:$0xfe]  ;;  %v6201_v17 = vld [vmem:[%s7868_s9 + $0x468] sm:$0xff]  }
  0xf4   : > { %5681 = vmatprep.subr.bf16.mxu1 %v6157_v19  ;;  %v2948_v19 = vor.u32 %v2947_v50, %v2946_v60  ;;  %v6203_v4 = vld [vmem:[%s7868_s9 + $0x428] sm:$0xff]   ;;  %v6204_v50 = vld [vmem:[%s7868_s9 + $0x460] sm:$0xff]   ;;  %v6206_v38 = vld [vmem:[%s7868_s9 + $0x458] sm:$0xff]  }
  0xf5   : > { %5682 = vmatpush3.bf16.msra.mxu1 %v6159_v58  ;;  %v6207_v10 = vld [vmem:[%s7868_s9 + $0x418] sm:$0xff]  }
  0xf6   : > { %5898 = vmatpush3.bf16.msra.mxu0 %v6168_v62  ;;  %5683 = vmatprep.subr.bf16.mxu1 %v6161_v32  ;;  %v6176_v62 = vld [vmem:[%s7868_s9 + $0x340] sm:$0xff]   ;;  %v2949_v58 = vsel %vm1006_vm5, %v2945_v40, %v2948_v19  ;;  %v2965_v32 = vrot.slane %v2963_v8, 3  ;;  %v6209_v40 = vld [vmem:[%s7868_s9 + $0x410] sm:$0xff]  }
  0xf7   : > { %5899 = vmatprep.subr.bf16.mxu0 %v6171_v36 }
  0xf9   : > { %2787 = vmatmul.mubr.bf16.gmra.mxu0 %v2637_v1  ;;  %5684 = vmatpush3.bf16.msra.mxu1 %v6163_v16  ;;  %v6184_v1 = vld [vmem:[%s7867_s8 + $0x110] sm:$0xff]  }
  0xfa   : > { %5900 = vmatpush3.bf16.msra.mxu0 %v6171_v36  ;;  %5903 = vmatprep.mubr.msk.bf16.mxu0 %vm591_vm0, %v3137_v13  ;;  %v6181_v36 = vld [vmem:[%s7867_s8 + $0x118] sm:$0xff]   ;;  %v2979_v13 = vsel %vm1006_vm5, %v7252_v46, %v2978_v42  ;;  %v6194_v16 = vld [vmem:[%s7868_s9 + $0x390] sm:$0xff]   ;;  %v6187_v46 = vld [vmem:[%s7867_s8 + $0x108] sm:$0xff]  }
  0xfb   : > { %5901 = vmatprep.subr.bf16.mxu0 %v6174_v43  ;;  %5685 = vmatprep.subr.bf16.mxu1 %v6164_v14  ;;  %v3528_v14 = vpack.c.bf16 %v7082_v37, %v3518_v57  ;;  %v6198_v37 = vld [vmem:[%s7868_s9 + $0x388] sm:$0xff]  }
  0xfd   : > { %5686 = vmatpush3.bf16.msra.mxu1 %v6166_v30 }
  0xfe   : > { %5902 = vmatpush3.bf16.msra.mxu0 %v6174_v43  ;;  %5687 = vmatprep.subr.bf16.mxu1 %v6167_v39  ;;  %v2968_v43 = vrot.slane %v2966_v51, 4  ;;  %v3420_v39 = vld [vmem:[#allocation2 + $0x21] sm:$0xff] }
  0xff   : > { %5713 = vmatprep.subr.bf16.mxu0 %v6177_v15  ;;  %v3522_v15 = vld [vmem:[#allocation3 + $0x68] sm:$0xff] }
 0x100   : > { %v2969_v30 = vor.u32 %v2968_v43, %v2965_v32  ;;  %v6212_v32 = vld [vmem:[%s7868_s9 + $0x440] sm:$0xff]  }
 0x101   : > { %5904 = vmatmul.mubr.msk.bf16.vlgmr.msra.gmra.mxu0 %vm591_vm0, %v3138_v61  ;;  %5688 = vmatpush3.bf16.msra.mxu1 %v6169_v48  ;;  %v3419_v61 = vld [vmem:[#allocation2 + $0x19] sm:$0xff] }
 0x102   : > { %5714 = vmatpush3.bf16.msra.mxu0 %v6179_v12  ;;  %3398 = vmatprep.mubr.bf16.mxu0 %v3234_v18  ;;  %v7378_v12 = vld [vmem:[#allocation3 + $0x70] sm:$0xff]  ;;  %v2970_v18 = vsel %vm1006_vm5, %v2948_v19, %v2969_v30  ;;  %v3423_v48 = vpack.c.bf16 %v3420_v39, %v3419_v61 }
 0x103   : > { %5715 = vmatprep.subr.bf16.mxu0 %v6180_v3  ;;  %5689 = vmatprep.subr.bf16.mxu1 %v6170_v34  ;;  %v7381_v31 = vpack.c.bf16 %v7378_v12, %v3522_v15  ;;  %v3581_v3 = vshll.u32 %v3528_v14, 16  ;;  %v6202_v34 = vld [vmem:[%s7868_s9 + $0x380] sm:$0xff]   ;;  %605 = vst.msk [vmem:[#allocation4] sm:$0xff] %vm604_vm7, %v7378_v12  ;;  %606 = vst.msk [vmem:[#allocation4 + $0x8] sm:$0xff] %vm604_vm7, %v7378_v12 }
 0x104   : > { %607 = vst.msk [vmem:[#allocation4 + $0x30] sm:$0xff] %vm604_vm7, %v7378_v12  ;;  %608 = vst.msk [vmem:[#allocation4 + $0x38] sm:$0xff] %vm604_vm7, %v7378_v12 }
 0x105   : > { %5690 = vmatpush3.bf16.msra.mxu1 %v6172_v22  ;;  %v3583_v49 = vrot.slane %v3581_v3, 1  ;;  %v3422_v22 = vld [vmem:[#allocation2 + $0x31] sm:$0xff]  ;;  %v3598_v43 = vshrl.u32 %v7381_v31, 16 }
 0x106   : > { %5716 = vmatpush3.bf16.msra.mxu0 %v6182_v63  ;;  %5691 = vmatprep.subr.bf16.mxu1 %v6173_v6  ;;  %v3579_v63 = vshrl.u32 %v3528_v14, 16  ;;  %v6245_v6 = vld [vmem:[#allocation3 + $0x68] sm:$0xff]  ;;  %v3424_v56 = vpack.c.bf16 %v3422_v22, %v7115_v41  ;;  %v6199_v41 = vld [vmem:[%s7868_s9 + $0x430] sm:$0xff]   ;;  %v6213_v14 = vld [vmem:[%s7868_s9 + $0x400] sm:$0xff]  }
 0x107   : > { %5717 = vmatprep.subr.bf16.mxu0 %v6183_v2  ;;  %v3586_v2 = vshll.u32 %v7381_v31, 16 }
 0x108   : > { %v3584_v23 = vor.u32 %v3583_v49, %v3579_v63 }
 0x109   : > { %5692 = vmatpush3.bf16.msra.mxu1 %v6175_v55  ;;  %v3588_v9 = vrot.slane %v3586_v2, 1  ;;  %v3235_v55 = vpack.c.bf16 %v7378_v12, %v7198_v0  ;;  %v6205_v0 = vld [vmem:[%s7868_s9 + $0x420] sm:$0xff]  }
 0x10a   : > { %5718 = vmatpush3.bf16.msra.mxu0 %v6185_v45  ;;  %5693 = vmatprep.subr.bf16.mxu1 %v6176_v62  ;;  %v3236_v45 = vpack.c.bf16 %v7378_v12, %v6245_v6  ;;  %v3517_v62 = vld [vmem:[#allocation3 + $0x10] sm:$0xfe] }
 0x10b   : > { %5719 = vmatprep.subr.bf16.mxu0 %v6186_v59  ;;  %v6195_v59 = vld [vmem:[%s7868_s9 + $0x438] sm:$0xff]   ;;  %v3589_v60 = vsel %vm1645_vm6, %v3584_v23, %v3588_v9  ;;  %v3527_v5 = vpack.c.bf16 %v7190_v24, %v3517_v62  ;;  %v6210_v24 = vld [vmem:[%s7868_s9 + $0x448] sm:$0xff]  }
 0x10d   : > { %5694 = vmatpush3.bf16.msra.mxu1 %v6178_v11  ;;  %v3526_v11 = vld [vmem:[#allocation3 + $0x28] sm:$0x1]  ;;  %v3569_v51 = vshll.u32 %v3527_v5, 16 }
 0x10e   : > { %5720 = vmatpush3.bf16.msra.mxu0 %v6188_v25  ;;  %5907 = vmatprep.subr.bf16.mxu1 %v6181_v36  ;;  %v6208_v25 = vld [vmem:[%s7868_s9 + $0x450] sm:$0xff]  }
 0x10f   : > { %5721 = vmatprep.subr.bf16.mxu0 %v6189_v20  ;;  %v3521_v20 = vld [vmem:[#allocation3 + $0x58] sm:$0xff]  ;;  %v3571_v57 = vrot.slane %v3569_v51, 1 }
 0x110   : > { %3113 = vmatmul.mubr.bf16.vlgmr.msra.gmra.mxu1 %v2949_v58  ;;  %v3529_v8 = vpack.c.bf16 %v7378_v12, %v3521_v20 }
 0x111   : > { %5908 = vmatpush3.bf16.msra.mxu1 %v6181_v36  ;;  %3120 = vmatprep.mubr.bf16.mxu1 %v2979_v13  ;;  %v3532_v36 = vpack.c.bf16 %v3526_v11, %v3526_v11  ;;  %v3525_v13 = vld [vmem:[#allocation3 + $0x8] sm:$0x1] }
 0x112   : > { %5722 = vmatpush3.bf16.msra.mxu0 %v6191_v26  ;;  %5909 = vmatprep.subr.bf16.mxu1 %v6184_v1  ;;  %v6211_v26 = vld [vmem:[%s7868_s9 + $0x408] sm:$0xff]   ;;  %v3574_v58 = vshll.u32 %v3529_v8, 16  ;;  %v3531_v30 = vpack.c.bf16 %v3525_v13, %v3525_v13  ;;  %v3590_v3 = vshrl.u32 %v3529_v8, 16 }
 0x113   : > { %5723 = vmatprep.subr.bf16.mxu0 %v6192_v52  ;;  %v3567_v52 = vshrl.u32 %v3527_v5, 16 }
 0x114   : > { %v3576_v15 = vrot.slane %v3574_v58, 1  ;;  %v3594_v31 = vshll.u32 %v3531_v30, 16 }
 0x115   : > { %5910 = vmatpush3.bf16.msra.mxu1 %v6184_v1  ;;  %v3602_v1 = vshll.u32 %v3532_v36, 16 }
 0x116   : > { %5724 = vmatpush3.bf16.msra.mxu0 %v6194_v16  ;;  %5911 = vmatprep.subr.bf16.mxu1 %v6187_v46  ;;  %v3592_v63 = vor.u32 %v3590_v3, %v3576_v15  ;;  %v3596_v49 = vrot.slane %v3594_v31, 1 }
 0x117   : > { %5725 = vmatprep.subr.bf16.mxu0 %v6196_v53  ;;  %v3572_v53 = vor.u32 %v3571_v57, %v3567_v52  ;;  %v3604_v61 = vrot.slane %v3602_v1, 1 }
 0x118   : > { %3121 = vmatmul.mubr.bf16.gmra.mxu1 %v2970_v18  ;;  %v4856_v18 = vld [vmem:[%s7869_s10] ss:$0 sm:$0xff]  ;;  %v3597_v23 = vsel %vm1645_vm6, %v3592_v63, %v3596_v49 }
 0x119   : > { %5912 = vmatpush3.bf16.msra.mxu1 %v6187_v46  ;;  %5915 = vmatprep.mubr.msk.bf16.mxu1 %vm591_vm0, %v3423_v48  ;;  %v3600_v46 = vor.u32 %v3598_v43, %v3588_v9 }
 0x11a   : > { %5726 = vmatpush3.bf16.msra.mxu0 %v6198_v37  ;;  %5913 = vmatprep.subr.bf16.mxu1 %v6190_v54  ;;  %v3577_v37 = vsel %vm1645_vm6, %v3572_v53, %v3576_v15 }
 0x11b   : > { %5727 = vmatprep.subr.bf16.mxu0 %v6200_v47  ;;  %v3605_v47 = vsel %vm1645_vm6, %v3600_v46, %v3604_v61 }
 0x11d   : > { %5914 = vmatpush3.bf16.msra.mxu1 %v6190_v54 }
 0x11e   : > { %5728 = vmatpush3.bf16.msra.mxu0 %v6202_v34  ;;  %5747 = vmatprep.subr.bf16.mxu1 %v6193_v7 }
 0x120   : > { %5916 = vmatmul.mubr.msk.bf16.vlgmr.msra.gmra.mxu1 %vm591_vm0, %v3424_v56  ;;  %vm4688_vm0 = vcmask 257024  }
 0x121   : > { %3399 = vmatmul.mubr.bf16.vlgmr.msra.gmra.mxu0 %v3233_v29  ;;  %5748 = vmatpush3.bf16.msra.mxu1 %v6195_v59  ;;  %v5821_v19 = vpop.f32.mrf.mxu0 }
 0x122   : > { %3406 = vmatprep.mubr.bf16.mxu0 %v3236_v45  ;;  %3738 = vmatprep.mubr.bf16.mxu1 %v3589_v60 }
 0x123   : > { %5749 = vmatprep.subr.bf16.mxu1 %v6197_v28  ;;  %v939_v42 = vpop.f32.mrf.mxu0 }
 0x124   : > { %v954_v2 = vadd.f32 %v4856_v18, %v939_v42 }
 0x125   : > { %5750 = vmatpush3.bf16.msra.mxu1 %v6199_v41  ;;  %v5822_v16 = vpop.f32.mrf.mxu0 }
 0x126   : > { %5751 = vmatprep.subr.bf16.mxu1 %v6201_v17  ;;  %v956_v17 = vadd.f32 %v5821_v19, %v4856_v18  ;;  %v957_v5 = vadd.f32 %v5822_v16, %v4856_v18 }
 0x127   : > { %v942_v39 = vpop.f32.mrf.mxu0 }
 0x128   : > { %v955_v9 = vadd.f32 %v4856_v18, %v942_v39 }
 0x129   : > { %3407 = vmatmul.mubr.bf16.gmra.mxu0 %v3235_v55  ;;  %5752 = vmatpush3.bf16.msra.mxu1 %v6203_v4 }
 0x12a   : > { %5753 = vmatprep.subr.bf16.mxu1 %v6204_v50 }
 0x12d   : > { %5754 = vmatpush3.bf16.msra.mxu1 %v6205_v0 }
 0x12e   : > { %5755 = vmatprep.subr.bf16.mxu1 %v6206_v38 }
 0x131   : > { %5756 = vmatpush3.bf16.msra.mxu1 %v6207_v10  ;;  %v5833_v54 = vpop.f32.mrf.mxu0 }
 0x132   : > { %5757 = vmatprep.subr.bf16.mxu1 %v6208_v25 }
 0x133   : > { %v1291_v7 = vpop.f32.mrf.mxu0 }
 0x135   : > { %5758 = vmatpush3.bf16.msra.mxu1 %v6209_v40  ;;  %v5834_v28 = vpop.f32.mrf.mxu0 }
 0x136   : > { %5759 = vmatprep.subr.bf16.mxu1 %v6210_v24 }
 0x137   : > { %v7462_v50 = vpop.f32.mrf.mxu0 }
 0x139   : > { %5760 = vmatpush3.bf16.msra.mxu1 %v6211_v26 }
 0x13a   : > { %5761 = vmatprep.subr.bf16.mxu1 %v6212_v32 }
 0x13d   : > { %5762 = vmatpush3.bf16.msra.mxu1 %v6213_v14 }
 0x13e   : > { %v5491_v48 = vpop.f32.mrf.mxu1 }
 0x140   : > { %3739 = vmatmul.mubr.bf16.vlgmr.msra.gmra.mxu1 %v3577_v37  ;;  %v5492_v34 = vpop.f32.mrf.mxu1 }
 0x141   : > { %3746 = vmatprep.mubr.bf16.mxu1 %v3605_v47  ;;  %v5493_v22 = vadd.f32 %v5492_v34, %v5491_v48 }
 0x142   : > { %v5494_v29 = vpop.f32.mrf.mxu1 }
 0x143   : > { %v1208_v6 = vadd.f32 %v5493_v22, %v954_v2 }
 0x144   : > { %v5495_v45 = vpop.f32.mrf.mxu1 }
 0x145   : > { %v5496_v56 = vadd.f32 %v5495_v45, %v5494_v29  ;;  %v1306_v59 = vadd.f32 %v1291_v7, %v1208_v6 }
 0x147   : > { %v7460_v41 = vadd.f32 %v5496_v56, %v955_v9 }
 0x148   : > { %3747 = vmatmul.mubr.bf16.gmra.mxu1 %v3597_v23  ;;  %v5497_v60 = vpop.f32.mrf.mxu1 }
 0x149   : > { %v1307_v21 = vadd.f32 %v7462_v50, %v7460_v41 }
 0x14a   : > { %v5498_v55 = vpop.f32.mrf.mxu1 }
 0x14b   : > { %v5499_v4 = vadd.f32 %v5498_v55, %v5497_v60 }
 0x14c   : > { %v5500_v0 = vpop.f32.mrf.mxu1 }
 0x14d   : > { %v1210_v38 = vadd.f32 %v5499_v4, %v956_v17 }
 0x14e   : > { %v5501_v10 = vpop.f32.mrf.mxu1 }
 0x14f   : > { %v5502_v25 = vadd.f32 %v5501_v10, %v5500_v0  ;;  %v1308_v11 = vadd.f32 %v5833_v54, %v1210_v38 }
 0x150   : > { %v5845_v40 = vpop.f32.mrf.mxu1 }
 0x151   : > { %v5525_v62 = vpop.f32.mrf.mxu0  ;;  %v1211_v51 = vadd.f32 %v5502_v25, %v957_v5 }
 0x152   : > { %v1577_v42 = vpop.f32.mrf.mxu1 }
 0x153   : > { %v5526_v20 = vpop.f32.mrf.mxu0  ;;  %v1309_v19 = vadd.f32 %v5834_v28, %v1211_v51 }
 0x154   : > { %v5527_v8 = vadd.f32 %v5526_v20, %v5525_v62  ;;  %v5846_v15 = vpop.f32.mrf.mxu1 }
 0x155   : > { %v7464_v24 = vpop.f32.mrf.mxu0 }
 0x156   : > { %v1494_v36 = vadd.f32 %v5527_v8, %v1306_v59  ;;  %v7474_v46 = vpop.f32.mrf.mxu1 }
 0x157   : > { %v7466_v26 = vpop.f32.mrf.mxu0 }
 0x158   : > { %v7468_v52 = vadd.f32 %v1577_v42, %v1494_v36 }
 0x159   : > { %v5531_v57 = vpop.f32.mrf.mxu0 }
 0x15b   : > { %v5532_v58 = vpop.f32.mrf.mxu0 }
 0x15c   : > { %v5533_v32 = vadd.f32 %v5532_v58, %v5531_v57 }
 0x15d   : > { %v5534_v43 = vpop.f32.mrf.mxu0 }
 0x15e   : > { %v1496_v1 = vadd.f32 %v5533_v32, %v1308_v11 }
 0x15f   : > { %v5535_v13 = vpop.f32.mrf.mxu0 }
 0x160   : > { %v5536_v16 = vadd.f32 %v5535_v13, %v5534_v43  ;;  %v7470_v14 = vadd.f32 %v5845_v40, %v1496_v1  ;;  %v6214_v43 = vld [vmem:[%s7870_s11 + $0x8] sm:$0xff]   ;;  %v6215_v1 = vld [vmem:[%s7870_s11] sm:$0xff]   ;;  %v6216_v13 = vld [vmem:[%s7870_s11 + $0x38] sm:$0xff]  }
 0x161   : > { %v7480_v37 = vpop.f32.mrf.mxu0  ;;  %5919 = vmatprep.subr.bf16.mxu0 %v6214_v43  ;;  %5943 = vmatprep.subr.bf16.mxu1 %v6216_v13 }
 0x162   : > { %v1497_v53 = vadd.f32 %v5536_v16, %v1309_v19  ;;  %v6217_v16 = vld [vmem:[%s7870_s11 + $0x30] sm:$0xff]   ;;  %5920 = vmatpush3.bf16.msra.mxu0 %v6214_v43  ;;  %5944 = vmatpush3.bf16.msra.mxu1 %v6216_v13  ;;  %v7602_v43 = vld [vmem:[%s7870_s11 + $0x58] sm:$0xff]  }
 0x163   : > { %v7484_v31 = vpop.f32.mrf.mxu0  ;;  %5921 = vmatprep.subr.bf16.mxu0 %v6215_v1  ;;  %5945 = vmatprep.subr.bf16.mxu1 %v6217_v16  ;;  %7904 = vst [vmem:[#allocation22_spill] sm:$0xff] %v7602_v43 }
 0x164   : > { %v7472_v30 = vadd.f32 %v5846_v15, %v1497_v53 }
 0x165   : > { %v7496_v18 = vpop.f32.mrf.mxu0 }
 0x166   : > { %5922 = vmatpush3.bf16.msra.mxu0 %v6215_v1  ;;  %5946 = vmatpush3.bf16.msra.mxu1 %v6217_v16  ;;  %v5530_v16 = vadd.f32 %v7466_v26, %v7464_v24 }
 0x167   : > { %v7500_v54 = vpop.f32.mrf.mxu0  ;;  %5927 = vmatprep.subr.bf16.mxu0 %v7597_v27  ;;  %5959 = vmatprep.subr.bf16.mxu1 %v7602_v43 }
 0x170   : > { %v7476_v61 = vpop.f32.mrf.mxu1 }
 0x172   : > { %v7478_v39 = vpop.f32.mrf.mxu1 }
 0x174   : > { %v7482_v3 = vpop.f32.mrf.mxu1 }
 0x176   : > { %v7494_v47 = vpop.f32.mrf.mxu1 }
 0x177   : > { %v5564_v27 = vadd.f32 %v7494_v47, %v7482_v3 }
 0x178   : > { %v7498_v48 = vpop.f32.mrf.mxu1 }
 0x17a   : > { %v7502_v34 = vpop.f32.mrf.mxu1 }
 0x17b   : > { %v5567_v26 = vadd.f32 %v7502_v34, %v7498_v48 }
 0x17c   : > { %v7506_v49 = vpop.f32.mrf.mxu1 }
 0x17e   : > { %v7510_v22 = vpop.f32.mrf.mxu1 }
 0x180   : > { %v7514_v12 = vpop.f32.mrf.mxu1 }
 0x181   : > { %v7504_v63 = vpop.f32.mrf.mxu0 }
 0x182   : > { %v7518_v6 = vpop.f32.mrf.mxu1 }
 0x183   : > { %v7508_v2 = vpop.f32.mrf.mxu0 }
 0x184   : > { %v7522_v23 = vpop.f32.mrf.mxu1  ;;  %v5595_v41 = vadd.f32 %v7508_v2, %v7504_v63 }
 0x185   : > { %v7512_v29 = vpop.f32.mrf.mxu0 }
 0x186   : > { %v7526_v56 = vpop.f32.mrf.mxu1 }
 0x187   : > { %v7516_v7 = vpop.f32.mrf.mxu0 }
 0x189   : > { %v7520_v45 = vpop.f32.mrf.mxu0 }
 0x18b   : > { %v7524_v9 = vpop.f32.mrf.mxu0 }
 0x18c   : > { %v5601_v34 = vadd.f32 %v7524_v9, %v7520_v45 }
 0x18d   : > { %v7528_v59 = vpop.f32.mrf.mxu0 }
 0x18f   : > { %v7532_v60 = vpop.f32.mrf.mxu0 }
 0x191   : > { %v7536_v17 = vpop.f32.mrf.mxu0 }
 0x193   : > { %v7540_v0 = vpop.f32.mrf.mxu0 }
 0x195   : > { %v7544_v62 = vpop.f32.mrf.mxu0 }
 0x196   : > { %7898 = vst [vmem:[#allocation16_spill] sm:$0xff] %v7544_v62 }
 0x197   : > { %v7548_v5 = vpop.f32.mrf.mxu0 }
 0x1a0   : > { %v7530_v28 = vpop.f32.mrf.mxu1 }
 0x1a2   : > { %v7534_v55 = vpop.f32.mrf.mxu1 }
 0x1a4   : > { %v7538_v4 = vpop.f32.mrf.mxu1 }
 0x1a6   : > { %v7542_v38 = vpop.f32.mrf.mxu1 }
 0x1a8   : > { %v7546_v10 = vpop.f32.mrf.mxu1 }
 0x1aa   : > { %v7550_v25 = vpop.f32.mrf.mxu1 }
 0x1ac   : > { %v7554_v11 = vpop.f32.mrf.mxu1 }
 0x1ae   : > { %v7558_v8 = vpop.f32.mrf.mxu1 }
 0x1b0   : > { %v7562_v36 = vpop.f32.mrf.mxu1 }
 0x1b1   : > { %v7552_v20 = vpop.f32.mrf.mxu0  ;;  %7899 = vst [vmem:[#allocation17_spill] sm:$0xff] %v7562_v36 }
 0x1b2   : > { %v7566_v19 = vpop.f32.mrf.mxu1 }
 0x1b3   : > { %v7556_v40 = vpop.f32.mrf.mxu0 }
 0x1b4   : > { %v7570_v58 = vpop.f32.mrf.mxu1  ;;  %v5663_v45 = vadd.f32 %v7556_v40, %v7552_v20  ;;  %v5638_v20 = vadd.f32 %v7558_v8, %v7554_v11 }
 0x1b5   : > { %v7560_v51 = vpop.f32.mrf.mxu0  ;;  %7900 = vst [vmem:[#allocation18_spill] sm:$0xff] %v7570_v58  ;;  %v5561_v58 = vadd.f32 %v7478_v39, %v7476_v61 }
 0x1b6   : > { %v7586_v53 = vpop.f32.mrf.mxu1 }
 0x1b7   : > { %v7564_v42 = vpop.f32.mrf.mxu0  ;;  %7901 = vst [vmem:[#allocation19_spill] sm:$0xff] %v7586_v53  ;;  %v1495_v53 = vadd.f32 %v5530_v16, %v1307_v21  ;;  %v1835_v43 = vadd.f32 %v5561_v58, %v7468_v52  ;;  %v5598_v52 = vadd.f32 %v7516_v7, %v7512_v29  ;;  %v1837_v58 = vadd.f32 %v5567_v26, %v7470_v14 }
 0x1b8   : > { %v5632_v14 = vadd.f32 %v7542_v38, %v7538_v4 }
 0x1b9   : > { %v7568_v57 = vpop.f32.mrf.mxu0  ;;  %v1593_v24 = vadd.f32 %v7474_v46, %v1495_v53  ;;  %v1933_v50 = vadd.f32 %v7484_v31, %v1835_v43  ;;  %v5570_v46 = vadd.f32 %v7510_v22, %v7506_v49  ;;  %v5629_v31 = vadd.f32 %v7534_v55, %v7530_v28 }
 0x1ba   : > { %v1935_v7 = vadd.f32 %v7480_v37, %v1837_v58  ;;  %v5635_v37 = vadd.f32 %v7550_v25, %v7546_v10 }
 0x1bb   : > { %v7572_v32 = vpop.f32.mrf.mxu0  ;;  %v1836_v61 = vadd.f32 %v5564_v27, %v1593_v24  ;;  %v2169_v3 = vadd.f32 %v5595_v41, %v1933_v50  ;;  %v1838_v29 = vadd.f32 %v5570_v46, %v7472_v30  ;;  %v7908_v46 = vld [vmem:[#allocation16_spill] sm:$0xff] }
 0x1bc   : > { %v2171_v28 = vadd.f32 %v5601_v34, %v1935_v7 }
 0x1bd   : > { %v7588_v15 = vpop.f32.mrf.mxu0  ;;  %v1934_v63 = vadd.f32 %v7500_v54, %v1836_v61  ;;  %v2267_v2 = vadd.f32 %v7518_v6, %v2169_v3  ;;  %v5604_v54 = vadd.f32 %v7532_v60, %v7528_v59  ;;  %v1936_v9 = vadd.f32 %v7496_v18, %v1838_v29 }
 0x1be   : > { %v2269_v59 = vadd.f32 %v7514_v12, %v2171_v28  ;;  %v5669_v12 = vadd.f32 %v7572_v32, %v7568_v57 }
 0x1bf   : > { %v7592_v35 = vpop.f32.mrf.mxu0  ;;  %v2170_v27 = vadd.f32 %v5598_v52, %v1934_v63  ;;  %v2455_v49 = vadd.f32 %v5629_v31, %v2267_v2  ;;  %v2172_v38 = vadd.f32 %v5604_v54, %v1936_v9 }
 0x1c0   : > { %7902 = vst [vmem:[#allocation20_spill] sm:$0xff] %v7592_v35  ;;  %v2457_v18 = vadd.f32 %v5635_v37, %v2269_v59  ;;  %v7912_v37 = vld [vmem:[#allocation12_spill] sm:$0xff] }
 0x1c1   : > { %v7606_v13 = vpop.f32.mrf.mxu0  ;;  %v2268_v55 = vadd.f32 %v7526_v56, %v2170_v27  ;;  %v2553_v30 = vadd.f32 %v7540_v0, %v2455_v49  ;;  %v5666_v56 = vadd.f32 %v7564_v42, %v7560_v51  ;;  %v2270_v10 = vadd.f32 %v7522_v23, %v2172_v38 }
 0x1c2   : > { %7905 = vst [vmem:[#allocation23_spill] sm:$0xff] %v7606_v13  ;;  %v2555_v42 = vadd.f32 %v7536_v17, %v2457_v18  ;;  %v7909_v17 = vld [vmem:[#allocation17_spill] sm:$0xff] }
 0x1c3   : > { %v7614_v36 = vpop.f32.mrf.mxu0  ;;  %v2456_v4 = vadd.f32 %v5632_v14, %v2268_v55  ;;  %v2795_v60 = vadd.f32 %v5663_v45, %v2553_v30  ;;  %v2458_v51 = vadd.f32 %v5638_v20, %v2270_v10 }
 0x1c5   : > { %v7619_v13 = vpop.f32.mrf.mxu0  ;;  %v2554_v0 = vadd.f32 %v7548_v5, %v2456_v4  ;;  %v2893_v41 = vadd.f32 %v7566_v19, %v2795_v60  ;;  %v2556_v58 = vadd.f32 %v7908_v46, %v2458_v51 }
 0x1c7   : > { %v7627_v21 = vpop.f32.mrf.mxu0  ;;  %v2796_v24 = vadd.f32 %v5666_v56, %v2554_v0  ;;  %v7906_v8 = vld [vmem:[#allocation20_spill] sm:$0xff]  ;;  %v7913_v0 = vld [vmem:[#allocation13_spill] sm:$0xff] }
 0x1c8   : > { %v5672_v5 = vadd.f32 %v7906_v8, %v7588_v15 }
 0x1c9   : > { %v7911_v45 = vld [vmem:[#allocation23_spill] sm:$0xff] }
 0x1ca   : > { %v2798_v63 = vadd.f32 %v5672_v5, %v2556_v58  ;;  %v7914_v5 = vld [vmem:[#allocation14_spill] sm:$0xff] }
 0x1d0   : > { %v7590_v44 = vpop.f32.mrf.mxu1 }
 0x1d2   : > { %v5696_v33 = vpop.f32.mrf.mxu1 }
 0x1d3   : > { %v5697_v40 = vadd.f32 %v5696_v33, %v7590_v44  ;;  %v2797_v44 = vadd.f32 %v5669_v12, %v2555_v42  ;;  %v7907_v33 = vld [vmem:[#allocation19_spill] sm:$0xff] }
 0x1d4   : > { %v5698_v1 = vpop.f32.mrf.mxu1  ;;  %v2894_v23 = vadd.f32 %v7907_v33, %v2796_v24 }
 0x1d5   : > { %v3129_v11 = vadd.f32 %v5697_v40, %v2893_v41 }
 0x1d6   : > { %v5699_v62 = vpop.f32.mrf.mxu1 }
 0x1d7   : > { %v5700_v26 = vadd.f32 %v5699_v62, %v5698_v1  ;;  %v3227_v57 = vadd.f32 %v7614_v36, %v3129_v11  ;;  %v2895_v62 = vadd.f32 %v7909_v17, %v2797_v44 }
 0x1d8   : > { %v5701_v35 = vpop.f32.mrf.mxu1 }
 0x1d9   : > { %v3130_v32 = vadd.f32 %v5700_v26, %v2894_v23 }
 0x1da   : > { %v5702_v39 = vpop.f32.mrf.mxu1 }
 0x1db   : > { %v5703_v19 = vadd.f32 %v5702_v39, %v5701_v35  ;;  %v3228_v7 = vadd.f32 %v7627_v21, %v3130_v32 }
 0x1dc   : > { %v5704_v48 = vpop.f32.mrf.mxu1 }
 0x1dd   : > { %v3131_v29 = vadd.f32 %v5703_v19, %v2895_v62 }
 0x1de   : > { %v5705_v22 = vpop.f32.mrf.mxu1 }
 0x1df   : > { %v5706_v15 = vadd.f32 %v5705_v22, %v5704_v48  ;;  %v3229_v9 = vadd.f32 %v7911_v45, %v3131_v29 }
 0x1e0   : > { %v7653_v43 = vpop.f32.mrf.mxu1 }
 0x1e1   : > { %v5729_v47 = vpop.f32.mrf.mxu0 }
 0x1e2   : > { %v3498_v25 = vpop.f32.mrf.mxu1 }
 0x1e3   : > { %v5730_v53 = vpop.f32.mrf.mxu0 }
 0x1e4   : > { %v5918_v61 = vpop.f32.mrf.mxu1  ;;  %v5731_v3 = vadd.f32 %v5730_v53, %v5729_v47  ;;  %v7910_v47 = vld [vmem:[#allocation18_spill] sm:$0xff] }
 0x1e5   : > { %v5732_v6 = vpop.f32.mrf.mxu0  ;;  %v2896_v53 = vadd.f32 %v7910_v47, %v2798_v63 }
 0x1e6   : > { %v3501_v31 = vpop.f32.mrf.mxu1  ;;  %v3415_v1 = vadd.f32 %v5731_v3, %v3227_v57  ;;  %v7915_v57 = vld [vmem:[#allocation15_spill] sm:$0xff] }
 0x1e7   : > { %v5733_v16 = vpop.f32.mrf.mxu0  ;;  %v3132_v28 = vadd.f32 %v5706_v15, %v2896_v53 }
 0x1e8   : > { %v5734_v27 = vadd.f32 %v5733_v16, %v5732_v6  ;;  %v3513_v35 = vadd.f32 %v3498_v25, %v3415_v1 }
 0x1e9   : > { %v5735_v50 = vpop.f32.mrf.mxu0  ;;  %v3230_v59 = vadd.f32 %v7619_v13, %v3132_v28 }
 0x1ea   : > { %v3416_v49 = vadd.f32 %v5734_v27, %v3228_v7 }
 0x1eb   : > { %v5736_v52 = vpop.f32.mrf.mxu0 }
 0x1ec   : > { %v5737_v54 = vadd.f32 %v5736_v52, %v5735_v50  ;;  %v3514_v4 = vadd.f32 %v3501_v31, %v3416_v49 }
 0x1ed   : > { %v5738_v34 = vpop.f32.mrf.mxu0 }
 0x1ee   : > { %v3417_v22 = vadd.f32 %v5737_v54, %v3229_v9  ;;  %v3800_v9 = vld [vmem:[%s7698_s17] sm:$0x1] }
 0x1ef   : > { %v5739_v36 = vpop.f32.mrf.mxu0 }
 0x1f0   : > { %v5740_v6 = vadd.f32 %v5739_v36, %v5738_v34  ;;  %v3515_v10 = vadd.f32 %v7653_v43, %v3417_v22  ;;  %v3802_v22 = vld [vmem:[%s7705_s22] sm:$0x1] }
 0x1f2   : > { %v3418_v16 = vadd.f32 %v5740_v6, %v3230_v59 }
 0x1f4   : > { %v3516_v13 = vadd.f32 %v5918_v61, %v3418_v16 }
 0x200   : > { %v5763_v2 = vpop.f32.mrf.mxu1 }
 0x202   : > { %v5764_v14 = vpop.f32.mrf.mxu1 }
 0x203   : > { %v5765_v39 = vadd.f32 %v5764_v14, %v5763_v2 }
 0x204   : > { %v5766_v55 = vpop.f32.mrf.mxu1 }
 0x205   : > { %v7676_v30 = vadd.f32 %v5765_v39, %v3513_v35 }
 0x206   : > { %v5767_v48 = vpop.f32.mrf.mxu1 }
 0x207   : > { %v3759_v21 = vmul.f32 %v7912_v37, %v7676_v30  ;;  %v5768_v38 = vadd.f32 %v5767_v48, %v5766_v55 }
 0x208   : > { %v5769_v60 = vpop.f32.mrf.mxu1 }
 0x209   : > { %v3756_v56 = vadd.f32 %v5768_v38, %v3514_v4  ;;  %v3777_v18 = vmul.f32 %v3759_v21, %v7676_v30  ;;  %v3763_v12 = vsel %vm604_vm7, %v3759_v21, 0.0  ;;  %v7916_v4 = vld [vmem:[#allocation11_spill] sm:$0xff] }
 0x20a   : > { %v5770_v20 = vpop.f32.mrf.mxu1 }
 0x20b   : > { %v3760_v40 = vmul.f32 %v7913_v0, %v3756_v56  ;;  %v5771_v25 = vadd.f32 %v5770_v20, %v5769_v60  ;;  %v3781_v11 = vsel %vm604_vm7, %v3777_v18, 0.0 }
 0x20c   : > { %v5772_v24 = vpop.f32.mrf.mxu1 }
 0x20d   : > { %v3764_v41 = vsel %vm604_vm7, %v3760_v40, 0.0  ;;  %v3778_v50 = vmul.f32 %v3760_v40, %v3756_v56  ;;  %v3757_v51 = vadd.f32 %v5771_v25, %v3515_v10 }
 0x20e   : > { %v3765_v42 = vadd.f32 %v3764_v41, %v3763_v12  ;;  %v5773_v26 = vpop.f32.mrf.mxu1 }
 0x20f   : > { %v3782_v8 = vsel %vm604_vm7, %v3778_v50, 0.0  ;;  %v3761_v44 = vmul.f32 %v7914_v5, %v3757_v51  ;;  %v5774_v33 = vadd.f32 %v5773_v26, %v5772_v24 }
 0x210   : > { %v3783_v23 = vadd.f32 %v3782_v8, %v3781_v11 }
 0x211   : > { %v3766_v43 = vsel %vm604_vm7, %v3761_v44, 0.0  ;;  %v3779_v3 = vmul.f32 %v3761_v44, %v3757_v51  ;;  %v3758_v52 = vadd.f32 %v5774_v33, %v3516_v13 }
 0x212   : > { %v3767_v46 = vadd.f32 %v3766_v43, %v3765_v42  ;;  %v3934_v43 = vld [vmem:[#allocation4 + $0x8] sm:$0xff] }
 0x213   : > { %v3784_v58 = vsel %vm604_vm7, %v3779_v3, 0.0  ;;  %v3762_v19 = vmul.f32 %v7915_v57, %v3758_v52 }
 0x214   : > { %v3785_v32 = vadd.f32 %v3784_v58, %v3783_v23  ;;  %v3853_v23 = vld [vmem:[#allocation4 + $0x7] sm:$0xff] }
 0x215   : > { %v3768_v61 = vsel %vm604_vm7, %v3762_v19, 0.0  ;;  %v3780_v63 = vmul.f32 %v3762_v19, %v3758_v52 }
 0x216   : > { %v3769_v31 = vadd.f32 %v3768_v61, %v3767_v46 }
 0x217   : > { %v3786_v17 = vsel %vm604_vm7, %v3780_v63, 0.0 }
 0x218   : > { %v3770_v62 = vrot.slane %v3769_v31, 4  ;;  %v3787_v1 = vadd.f32 %v3786_v17, %v3785_v32 }
 0x21a   : > { %v3771_v27 = vadd.f32 %v3770_v62, %v3769_v31  ;;  %v3788_v34 = vrot.slane %v3787_v1, 4 }
 0x21c   : > { %v3772_v15 = vrot.slane %v3771_v27, 2  ;;  %v3789_v2 = vadd.f32 %v3788_v34, %v3787_v1  ;;  %v6221_v34 = vld [vmem:[%s7870_s11 + $0x50] sm:$0xff]  }
 0x21e   : > { %v3773_v29 = vadd.f32 %v3772_v15, %v3771_v27  ;;  %v3790_v7 = vrot.slane %v3789_v2, 2  ;;  %v6220_v27 = vld [vmem:[%s7870_s11 + $0x10] sm:$0xff]  }
 0x220   : > { %v3774_v47 = vrot.slane %v3773_v29, 1  ;;  %v3791_v53 = vadd.f32 %v3790_v7, %v3789_v2  ;;  %v7917_v2 = vld [vmem:[#allocation21_spill] sm:$0xff]  ;;  %v6222_v7 = vld [vmem:[%s7870_s11 + $0x28] sm:$0xff]  }
 0x222   : > { %v3775_v14 = vadd.f32 %v3774_v47, %v3773_v29  ;;  %v3792_v49 = vrot.slane %v3791_v53, 1  ;;  %v7918_v29 = vld [vmem:[#allocation22_spill] sm:$0xff] }
 0x224   : > { %v3776_v54 = vmul.f32 0.0625, %v3775_v14  ;;  %v3793_v36 = vadd.f32 %v3792_v49, %v3791_v53  ;;  %v6223_v14 = vld [vmem:[%s7870_s11 + $0x78] sm:$0xff]  }
 0x226   : > { %v3794_v35 = vmul.f32 0.0625, %v3793_v36  ;;  %v3795_v39 = vmul.f32 %v3776_v54, %v3776_v54 }
 0x228   : > { %v3796_v28 = vsub.f32 %v3794_v35, %v3795_v39 }
 0x22a   : > { %v3797_v55 = vmax.f32 %v3796_v28, 0.0  ;;  %v6224_v28 = vld [vmem:[%s7870_s11 + $0x20] sm:$0xff]  }
 0x22c   : > { %v3798_v45 = vadd.f32 1e-05, %v3797_v55 }
 0x22e   : > { %6238 = vrsqrt.f32 %v3798_v45  ;;  %v6225_v45 = vld [vmem:[%s7870_s11 + $0x70] sm:$0xff]  }
 0x23b   : > { %v6239_v6 = vpop.eup %6238 }
 0x23c   : > { %v3801_v48 = vmul.f32 %v6239_v6, %v3800_v9  ;;  %v6226_v9 = vld [vmem:[%s7870_s11 + $0x48] sm:$0xff]  }
 0x23e   : > { %v3803_v21 = vmul.f32 %v3801_v48, %v3776_v54  ;;  %v3809_v38 = vrot.slane %v3801_v48, %v7916_v4  ;;  %v4429_v48 = vld [vmem:[#allocation4 + $0x30] sm:$0xff] }
 0x240   : > { %v3804_v59 = vsub.f32 %v3802_v22, %v3803_v21  ;;  %v3811_v60 = vmul.f32 %v3809_v38, %v7676_v30  ;;  %v3812_v16 = vmul.f32 %v3809_v38, %v3756_v56  ;;  %v3813_v20 = vmul.f32 %v3809_v38, %v3757_v51  ;;  %v6227_v21 = vld [vmem:[%s7870_s11 + $0x40] sm:$0xff]  }
 0x241   : > { %v3814_v18 = vmul.f32 %v3809_v38, %v3758_v52 }
 0x242   : > { %v3819_v40 = vrot.slane %v3804_v59, %v7916_v4 }
 0x244   : > { %v3821_v10 = vadd.f32 %v3819_v40, %v3811_v60  ;;  %v3822_v25 = vadd.f32 %v3819_v40, %v3812_v16  ;;  %v3823_v24 = vadd.f32 %v3819_v40, %v3813_v20  ;;  %v3824_v12 = vadd.f32 %v3819_v40, %v3814_v18  ;;  %v6228_v60 = vld [vmem:[%s7870_s11 + $0x68] sm:$0xff]   ;;  %v6229_v20 = vld [vmem:[%s7870_s11 + $0x60] sm:$0xff]  }
 0x245   : > { %v6230_v18 = vld [vmem:[%s7870_s11 + $0x88] sm:$0xff]  }
 0x246   : > { %vm3825_vm8 = vcmp.ge.f32.partialorder %v3821_v10, 0.0  ;;  %vm3826_vm9 = vcmp.ge.f32.partialorder %v3822_v25, 0.0  ;;  %vm3827_vm10 = vcmp.ge.f32.partialorder %v3823_v24, 0.0  ;;  %vm3828_vm11 = vcmp.ge.f32.partialorder %v3824_v12, 0.0 }
 0x247   : > { %v3829_v41 = vmul.f32 0.2, %v3821_v10  ;;  %v3830_v50 = vmul.f32 0.2, %v3822_v25  ;;  %v3831_v42 = vmul.f32 0.2, %v3823_v24 }
 0x248   : > { %v3832_v13 = vmul.f32 0.2, %v3824_v12 }
 0x249   : > { %v3833_v26 = vsel %vm3825_vm8, %v3821_v10, %v3829_v41  ;;  %v3834_v11 = vsel %vm3826_vm9, %v3822_v25, %v3830_v50  ;;  %v3835_v30 = vsel %vm3827_vm10, %v3823_v24, %v3831_v42  ;;  %v6231_v25 = vld [vmem:[%s7870_s11 + $0x80] sm:$0xff]   ;;  %v4511_v24 = vld [vmem:[#allocation4 + $0x31] sm:$0xff] }
 0x24a   : > { %v3836_v56 = vsel %vm3828_vm11, %v3824_v12, %v3832_v13  ;;  %v3837_v51 = vmul.f32 %v7912_v37, %v3833_v26  ;;  %v3838_v8 = vmul.f32 %v7913_v0, %v3834_v11  ;;  %v3839_v44 = vmul.f32 %v7914_v5, %v3835_v30 }
 0x24b   : > { %v3840_v33 = vmul.f32 %v7915_v57, %v3836_v56 }
 0x24c   : > { %3841 = vst.msk [vmem:[#allocation4 + $0x10] sm:$0xff] %vm604_vm7, %v3837_v51  ;;  %3842 = vst.msk [vmem:[#allocation4 + $0x18] sm:$0xff] %vm604_vm7, %v3838_v8 }
 0x24d   : > { %3843 = vst.msk [vmem:[#allocation4 + $0x20] sm:$0xff] %vm604_vm7, %v3839_v44  ;;  %3844 = vst.msk [vmem:[#allocation4 + $0x28] sm:$0xff] %vm604_vm7, %v3840_v33 }
 0x253   : > { %v3854_v3 = vld [vmem:[#allocation4 + $0xf] sm:$0xff]  ;;  %v4099_v52 = vld [vmem:[#allocation4 + $0x17] sm:$0xff] }
 0x254   : > { %v3856_v46 = vld [vmem:[#allocation4 + $0x1f] sm:$0xff]  ;;  %v3857_v58 = vpack.c.bf16 %v3854_v3, %v3853_v23  ;;  %v4102_v19 = vpack.c.bf16 %v4099_v52, %v3854_v3  ;;  %v7721_v61 = vld [vmem:[#allocation4 + $0x27] sm:$0xff]  ;;  %v3935_v63 = vld [vmem:[#allocation4 + $0x10] sm:$0xff] }
 0x255   : > { %v7719_v32 = vpack.c.bf16 %v3856_v46, %v4099_v52  ;;  %v4262_v31 = vld [vmem:[#allocation4 + $0x11] sm:$0xff]  ;;  %v4103_v17 = vpack.c.bf16 %v7721_v61, %v3856_v46  ;;  %v4263_v62 = vld [vmem:[#allocation4 + $0x19] sm:$0xff]  ;;  %v3938_v1 = vpack.c.bf16 %v3935_v63, %v3934_v43  ;;  %v4264_v49 = vld [vmem:[#allocation4 + $0x21] sm:$0xff] }
 0x256   : > { %5923 = vmatprep.mubr.msk.bf16.mxu0 %vm604_vm7, %v3857_v58  ;;  %5947 = vmatprep.mubr.msk.bf16.mxu1 %vm604_vm7, %v4102_v19  ;;  %v4266_v15 = vpack.c.bf16 %v4263_v62, %v4262_v31  ;;  %v3936_v47 = vld [vmem:[#allocation4 + $0x18] sm:$0xff]  ;;  %v3937_v53 = vld [vmem:[#allocation4 + $0x20] sm:$0xff]  ;;  %v4265_v54 = vld [vmem:[#allocation4 + $0x29] sm:$0xff]  ;;  %v4021_v22 = vpack.c.bf16 %v4264_v49, %v4263_v62 }
 0x257   : > { %5924 = vmatmul.mubr.msk.bf16.vlgmr.msra.gmra.mxu0 %vm604_vm7, %v7719_v32  ;;  %5948 = vmatmul.mubr.msk.bf16.vlgmr.msra.gmra.mxu1 %vm604_vm7, %v4103_v17  ;;  %v4016_v36 = vld [vmem:[#allocation4 + $0x9] sm:$0xff]  ;;  %v3939_v35 = vpack.c.bf16 %v3937_v53, %v3936_v47  ;;  %v4267_v39 = vpack.c.bf16 %v4265_v54, %v4264_v49  ;;  %v4184_v59 = vpack.c.bf16 %v3936_v47, %v3935_v63  ;;  %v5375_v52 = vld [vmem:[%s7871_s12] ss:$0 sm:$0xff] }
 0x258   : > { %5928 = vmatpush3.bf16.msra.mxu0 %v7917_v2  ;;  %5931 = vmatprep.mubr.msk.bf16.mxu0 %vm604_vm7, %v3938_v1  ;;  %v4020_v55 = vpack.c.bf16 %v4262_v31, %v4016_v36  ;;  %v4428_v6 = vld [vmem:[#allocation4 + $0x28] sm:$0xff]  ;;  %v4513_v12 = vpack.c.bf16 %v4511_v24, %v4265_v54 }
 0x259   : > { %5960 = vmatpush3.bf16.msra.mxu1 %v7918_v29  ;;  %5963 = vmatprep.mubr.msk.bf16.mxu1 %vm604_vm7, %v4266_v15  ;;  %v4431_v38 = vpack.c.bf16 %v4429_v48, %v4428_v6  ;;  %v4185_v16 = vpack.c.bf16 %v4428_v6, %v3937_v53  ;;  %v4347_v40 = vld [vmem:[#allocation4 + $0x2f] sm:$0xff] }
 0x25a   : > { %5929 = vmatprep.subr.bf16.mxu0 %v6220_v27  ;;  %5961 = vmatprep.subr.bf16.mxu1 %v6221_v34  ;;  %v4349_v10 = vpack.c.bf16 %v4347_v40, %v7721_v61 }
 0x25c   : > { %5930 = vmatpush3.bf16.msra.mxu0 %v6220_v27 }
 0x25d   : > { %5962 = vmatpush3.bf16.msra.mxu1 %v6221_v34  ;;  %5935 = vmatprep.subr.bf16.mxu0 %v6222_v7 }
 0x25e   : > { %5975 = vmatprep.subr.bf16.mxu1 %v6223_v14 }
 0x25f   : > { %5932 = vmatmul.mubr.msk.bf16.vlgmr.msra.gmra.mxu0 %vm604_vm7, %v3939_v35 }
 0x260   : > { %5936 = vmatpush3.bf16.msra.mxu0 %v6222_v7  ;;  %5964 = vmatmul.mubr.msk.bf16.vlgmr.msra.gmra.mxu1 %vm604_vm7, %v4267_v39 }
 0x261   : > { %5939 = vmatprep.mubr.msk.bf16.mxu0 %vm604_vm7, %v4020_v55  ;;  %5976 = vmatpush3.bf16.msra.mxu1 %v6223_v14 }
 0x262   : > { %5979 = vmatprep.mubr.msk.bf16.mxu1 %vm604_vm7, %v3939_v35  ;;  %5937 = vmatprep.subr.bf16.mxu0 %v6224_v28 }
 0x263   : > { %5977 = vmatprep.subr.bf16.mxu1 %v6225_v45 }
 0x264   : > { %5938 = vmatpush3.bf16.msra.mxu0 %v6224_v28 }
 0x265   : > { %5978 = vmatpush3.bf16.msra.mxu1 %v6225_v45  ;;  %5951 = vmatprep.subr.bf16.mxu0 %v6226_v9 }
 0x267   : > { %5940 = vmatmul.mubr.msk.bf16.vlgmr.msra.gmra.mxu0 %vm604_vm7, %v4021_v22 }
 0x268   : > { %5952 = vmatpush3.bf16.msra.mxu0 %v6226_v9  ;;  %5980 = vmatmul.mubr.msk.bf16.vlgmr.msra.gmra.mxu1 %vm604_vm7, %v4431_v38 }
 0x269   : > { %5955 = vmatprep.mubr.msk.bf16.mxu0 %vm604_vm7, %v4184_v59  ;;  %5953 = vmatprep.subr.bf16.mxu0 %v6227_v21 }
 0x26c   : > { %5954 = vmatpush3.bf16.msra.mxu0 %v6227_v21 }
 0x26d   : > { %5967 = vmatprep.subr.bf16.mxu0 %v6228_v60 }
 0x26f   : > { %5956 = vmatmul.mubr.msk.bf16.vlgmr.msra.gmra.mxu0 %vm604_vm7, %v4185_v16 }
 0x270   : > { %5968 = vmatpush3.bf16.msra.mxu0 %v6228_v60  ;;  %5971 = vmatprep.mubr.msk.bf16.mxu0 %vm604_vm7, %v7719_v32 }
 0x271   : > { %5969 = vmatprep.subr.bf16.mxu0 %v6229_v20 }
 0x274   : > { %5970 = vmatpush3.bf16.msra.mxu0 %v6229_v20 }
 0x275   : > { %5983 = vmatprep.subr.bf16.mxu0 %v6230_v18 }
 0x277   : > { %5972 = vmatmul.mubr.msk.bf16.vlgmr.msra.gmra.mxu0 %vm604_vm7, %v4349_v10 }
 0x278   : > { %5984 = vmatpush3.bf16.msra.mxu0 %v6230_v18  ;;  %5987 = vmatprep.mubr.msk.bf16.mxu0 %vm604_vm7, %v4021_v22 }
 0x279   : > { %5985 = vmatprep.subr.bf16.mxu0 %v6231_v25 }
 0x27c   : > { %5986 = vmatpush3.bf16.msra.mxu0 %v6231_v25 }
 0x27f   : > { %5988 = vmatmul.mubr.msk.bf16.vlgmr.msra.gmra.mxu0 %vm604_vm7, %v4513_v12 }
 0x317   : > { %v5925_v41 = vpop.f32.mrf.mxu0  ;;  %v5949_v50 = vpop.f32.mrf.mxu1 }
 0x318   : > { %v3932_v32 = vadd.f32 %v5925_v41, %v5375_v52 }
 0x319   : > { %v3915_v42 = vpop.f32.mrf.mxu0  ;;  %v4161_v26 = vpop.f32.mrf.mxu1 }
 0x31a   : > { %v3930_v58 = vadd.f32 %v5375_v52, %v3915_v42 }
 0x31b   : > { %v5926_v13 = vpop.f32.mrf.mxu0  ;;  %v5950_v56 = vpop.f32.mrf.mxu1 }
 0x31c   : > { %v3933_v31 = vadd.f32 %v5926_v13, %v5375_v52 }
 0x31d   : > { %v3918_v11 = vpop.f32.mrf.mxu0  ;;  %v4164_v44 = vpop.f32.mrf.mxu1 }
 0x31e   : > { %v3931_v34 = vadd.f32 %v5375_v52, %v3918_v11 }
 0x31f   : > { %v5933_v30 = vpop.f32.mrf.mxu0 }
 0x320   : > { %v5965_v43 = vpop.f32.mrf.mxu1  ;;  %v4014_v17 = vadd.f32 %v5933_v30, %v3932_v32 }
 0x321   : > { %v3997_v51 = vpop.f32.mrf.mxu0 }
 0x322   : > { %v4325_v19 = vpop.f32.mrf.mxu1  ;;  %v4012_v63 = vadd.f32 %v3997_v51, %v3930_v58 }
 0x323   : > { %v5934_v8 = vpop.f32.mrf.mxu0 }
 0x324   : > { %v5966_v1 = vpop.f32.mrf.mxu1  ;;  %v4015_v15 = vadd.f32 %v5934_v8, %v3933_v31 }
 0x325   : > { %v4000_v33 = vpop.f32.mrf.mxu0 }
 0x326   : > { %v4013_v7 = vadd.f32 %v4000_v33, %v3931_v34  ;;  %v4328_v14 = vpop.f32.mrf.mxu1 }
 0x327   : > { %v5941_v23 = vpop.f32.mrf.mxu0 }
 0x328   : > { %v4096_v2 = vadd.f32 %v5941_v23, %v4014_v17  ;;  %v5981_v9 = vpop.f32.mrf.mxu1 }
 0x329   : > { %v4079_v3 = vpop.f32.mrf.mxu0 }
 0x32a   : > { %v4094_v27 = vadd.f32 %v4079_v3, %v4012_v63  ;;  %v4178_v36 = vadd.f32 %v5949_v50, %v4096_v2  ;;  %v4489_v16 = vpop.f32.mrf.mxu1 }
 0x32b   : > { %v5942_v46 = vpop.f32.mrf.mxu0 }
 0x32c   : > { %v4097_v47 = vadd.f32 %v5942_v46, %v4015_v15  ;;  %v4176_v49 = vadd.f32 %v4161_v26, %v4094_v27  ;;  %v5982_v41 = vpop.f32.mrf.mxu1 }
 0x32d   : > { %v4082_v61 = vpop.f32.mrf.mxu0 }
 0x32e   : > { %v4095_v54 = vadd.f32 %v4082_v61, %v4013_v7  ;;  %v4179_v55 = vadd.f32 %v5950_v56, %v4097_v47  ;;  %v4492_v8 = vpop.f32.mrf.mxu1 }
 0x32f   : > { %v5957_v62 = vpop.f32.mrf.mxu0 }
 0x330   : > { %v4260_v28 = vadd.f32 %v5957_v62, %v4178_v36  ;;  %v4177_v48 = vadd.f32 %v4164_v44, %v4095_v54 }
 0x331   : > { %v4243_v29 = vpop.f32.mrf.mxu0 }
 0x332   : > { %v4258_v39 = vadd.f32 %v4243_v29, %v4176_v49  ;;  %v4342_v59 = vadd.f32 %v5965_v43, %v4260_v28 }
 0x333   : > { %v5958_v53 = vpop.f32.mrf.mxu0 }
 0x334   : > { %v4261_v6 = vadd.f32 %v5958_v53, %v4179_v55  ;;  %v4340_v21 = vadd.f32 %v4325_v19, %v4258_v39 }
 0x335   : > { %v4246_v35 = vpop.f32.mrf.mxu0 }
 0x336   : > { %v4259_v38 = vadd.f32 %v4246_v35, %v4177_v48  ;;  %v4343_v40 = vadd.f32 %v5966_v1, %v4261_v6 }
 0x337   : > { %v5973_v45 = vpop.f32.mrf.mxu0 }
 0x338   : > { %v4424_v18 = vadd.f32 %v5973_v45, %v4342_v59  ;;  %v4341_v24 = vadd.f32 %v4328_v14, %v4259_v38 }
 0x339   : > { %v4407_v22 = vpop.f32.mrf.mxu0 }
 0x33a   : > { %v4422_v20 = vadd.f32 %v4407_v22, %v4340_v21  ;;  %v4506_v13 = vadd.f32 %v5981_v9, %v4424_v18 }
 0x33b   : > { %v5974_v60 = vpop.f32.mrf.mxu0 }
 0x33c   : > { %v4425_v25 = vadd.f32 %v5974_v60, %v4343_v40  ;;  %v4504_v50 = vadd.f32 %v4489_v16, %v4422_v20  ;;  %v4631_v40 = vld [vmem:[%s7698_s17] sm:$0x1]  ;;  %s5459_s17 = sshll.u32 %s6425_s29, 8 }
 0x33d   : > { %v4410_v10 = vpop.f32.mrf.mxu0  ;;  %s7813_s29 = scalar_lea.hbm %s7872_s13, %s5459_s17 }
 0x33e   : > { %v4423_v42 = vadd.f32 %v4410_v10, %v4341_v24  ;;  %v4507_v56 = vadd.f32 %v5982_v41, %v4425_v25  ;;  %v4633_v24 = vld [vmem:[%s7705_s22] sm:$0x1]  ;;  %s518_s22 = scalar_lea.vmem [#allocation5], %s4845_s15  ;;  %s6252_s15 = scalar_lea.vmem %s6251_s21, 512 }
 0x33f   : > { %v5989_v12 = vpop.f32.mrf.mxu0  ;;  %s4707_s24 = sshll.u32 %s518_s22, 4  ;;  %s7815_s24 = int_to_ptr.vmem [resolvable:$true] %s4707_s24 }
 0x340   : > { %v4588_v30 = vadd.f32 %v5989_v12, %v4506_v13  ;;  %v4505_v23 = vadd.f32 %v4492_v8, %v4423_v42  ;;  %s6246_s14 = scalar_lea.vmem %s7815_s24, 256  ;;  %p6253_p0 = scmp.lt.s32.totalorder %s7815_s24, %s6251_s21 }
 0x341   : > { %v4571_v26 = vpop.f32.mrf.mxu0  ;;  %p6247_p11 = scmp.ne.s32.totalorder %s7815_s24, %s6246_s14  ;;  %p6254_p1 = scmp.lt.s32.totalorder %s6252_s15, %s6246_s14 }
 0x342   : > { %v4586_v11 = vadd.f32 %v4571_v26, %v4504_v50  ;;  %v4592_v3 = vmul.f32 %v7914_v5, %v4588_v30 }
 0x343   : > { %v5990_v51 = vpop.f32.mrf.mxu0  ;;  %p6248_p12 = pnand %p6247_p11, %p6442_p5  ;;  %p6255_p2 = por %p6254_p1, %p6253_p0 }
 0x344   : > { %v4590_v44 = vmul.f32 %v7912_v37, %v4586_v11  ;;  %v4589_v33 = vadd.f32 %v5990_v51, %v4507_v56  ;;  %v4610_v32 = vmul.f32 %v4592_v3, %v4588_v30  ;;  %v4597_v62 = vsel %vm604_vm7, %v4592_v3, 0.0 }
 0x345   : > { %v4574_v43 = vpop.f32.mrf.mxu0  ;;  %p6249_p13 = pneg %p6248_p12 }
 0x346   : > { %v4587_v52 = vadd.f32 %v4574_v43, %v4505_v23  ;;  %v4608_v46 = vmul.f32 %v4590_v44, %v4586_v11  ;;  %v4593_v58 = vmul.f32 %v7915_v57, %v4589_v33  ;;  %v4594_v61 = vsel %vm604_vm7, %v4590_v44, 0.0 }
 0x347   : > { %v4615_v29 = vsel %vm604_vm7, %v4610_v32, 0.0  ;;  %p6256_p3 = pnand %p6255_p2, %p6249_p13 }
 0x348   : > { %v4591_v19 = vmul.f32 %v7913_v0, %v4587_v52  ;;  %v4612_v1 = vsel %vm604_vm7, %v4608_v46, 0.0  ;;  %v4611_v27 = vmul.f32 %v4593_v58, %v4589_v33  ;;  %v4599_v7 = vsel %vm604_vm7, %v4593_v58, 0.0 }
 0x34a   : > { %v4595_v63 = vsel %vm604_vm7, %v4591_v19, 0.0  ;;  %v4609_v31 = vmul.f32 %v4591_v19, %v4587_v52  ;;  %v4617_v14 = vsel %vm604_vm7, %v4611_v27, 0.0 }
 0x34b   : > { %v4596_v17 = vadd.f32 %v4595_v63, %v4594_v61 }
 0x34c   : > { %v4613_v34 = vsel %vm604_vm7, %v4609_v31, 0.0 }
 0x34d   : > { %v4598_v15 = vadd.f32 %v4597_v62, %v4596_v17  ;;  %v4614_v2 = vadd.f32 %v4613_v34, %v4612_v1 }
 0x34f   : > { %v4600_v47 = vadd.f32 %v4599_v7, %v4598_v15  ;;  %v4616_v53 = vadd.f32 %v4615_v29, %v4614_v2 }
 0x351   : > { %v4601_v49 = vrot.slane %v4600_v47, 4  ;;  %v4618_v54 = vadd.f32 %v4617_v14, %v4616_v53 }
 0x353   : > { %v4602_v36 = vadd.f32 %v4601_v49, %v4600_v47  ;;  %v4619_v35 = vrot.slane %v4618_v54, 4 }
 0x355   : > { %v4603_v39 = vrot.slane %v4602_v36, 2  ;;  %v4620_v28 = vadd.f32 %v4619_v35, %v4618_v54 }
 0x357   : > { %v4604_v55 = vadd.f32 %v4603_v39, %v4602_v36  ;;  %v4621_v45 = vrot.slane %v4620_v28, 2 }
 0x359   : > { %v4605_v9 = vrot.slane %v4604_v55, 1  ;;  %v4622_v6 = vadd.f32 %v4621_v45, %v4620_v28 }
 0x35b   : > { %v4606_v48 = vadd.f32 %v4605_v9, %v4604_v55  ;;  %v4623_v22 = vrot.slane %v4622_v6, 1 }
 0x35d   : > { %v4607_v21 = vmul.f32 0.0625, %v4606_v48  ;;  %v4624_v38 = vadd.f32 %v4623_v22, %v4622_v6 }
 0x35f   : > { %v4625_v59 = vmul.f32 0.0625, %v4624_v38  ;;  %v4626_v60 = vmul.f32 %v4607_v21, %v4607_v21 }
 0x361   : > { %v4627_v16 = vsub.f32 %v4625_v59, %v4626_v60 }
 0x363   : > { %v4628_v20 = vmax.f32 %v4627_v16, 0.0 }
 0x365   : > { %v4629_v18 = vadd.f32 1e-05, %v4628_v20 }
 0x367   : > { %6240 = vrsqrt.f32 %v4629_v18 }
 0x374   : > { %v6241_v10 = vpop.eup %6240 }
 0x375   : > { %v4632_v25 = vmul.f32 %v6241_v10, %v4631_v40 }
 0x377   : > { %v4634_v12 = vmul.f32 %v4632_v25, %v4607_v21  ;;  %v4640_v41 = vrot.slane %v4632_v25, %v7916_v4 }
 0x379   : > { %v4635_v50 = vsub.f32 %v4633_v24, %v4634_v12  ;;  %v4642_v42 = vmul.f32 %v4640_v41, %v4586_v11  ;;  %v4643_v13 = vmul.f32 %v4640_v41, %v4587_v52  ;;  %v4644_v26 = vmul.f32 %v4640_v41, %v4588_v30 }
 0x37a   : > { %v4645_v56 = vmul.f32 %v4640_v41, %v4589_v33 }
 0x37b   : > { %v4650_v51 = vrot.slane %v4635_v50, %v7916_v4 }
 0x37d   : > { %v4652_v8 = vadd.f32 %v4650_v51, %v4642_v42  ;;  %v4653_v44 = vadd.f32 %v4650_v51, %v4643_v13  ;;  %v4654_v23 = vadd.f32 %v4650_v51, %v4644_v26  ;;  %v4655_v43 = vadd.f32 %v4650_v51, %v4645_v56 }
 0x37f   : > { %vm4656_vm12 = vcmp.ge.f32.partialorder %v4652_v8, 0.0  ;;  %vm4657_vm13 = vcmp.ge.f32.partialorder %v4653_v44, 0.0  ;;  %vm4658_vm14 = vcmp.ge.f32.partialorder %v4654_v23, 0.0  ;;  %vm4659_vm15 = vcmp.ge.f32.partialorder %v4655_v43, 0.0 }
 0x380   : > { %v4660_v3 = vmul.f32 0.2, %v4652_v8  ;;  %v4661_v46 = vmul.f32 0.2, %v4653_v44  ;;  %v4662_v58 = vmul.f32 0.2, %v4654_v23 }
 0x381   : > { %v4663_v11 = vmul.f32 0.2, %v4655_v43 }
 0x382   : > { %v4665_v52 = vsel %vm4657_vm13, %v4653_v44, %v4661_v46  ;;  %v4664_v30 = vsel %vm4656_vm12, %v4652_v8, %v4660_v3  ;;  %v4666_v33 = vsel %vm4658_vm14, %v4654_v23, %v4662_v58 }
 0x383   : > { %v4669_v4 = vmul.f32 %v7913_v0, %v4665_v52  ;;  %v4667_v19 = vsel %vm4659_vm15, %v4655_v43, %v4663_v11  ;;  %v4668_v32 = vmul.f32 %v7912_v37, %v4664_v30  ;;  %v4670_v61 = vmul.f32 %v7914_v5, %v4666_v33 }
 0x384   : > { %v4671_v63 = vmul.f32 %v7915_v57, %v4667_v19 }
 0x385   : > { %v5456_v31 = vpack.c.bf16 %v4669_v4, %v4669_v4  ;;  %v5455_v17 = vpack.c.bf16 %v4668_v32, %v4668_v32  ;;  %v5457_v62 = vpack.c.bf16 %v4670_v61, %v4670_v61 }
 0x386   : > { %v5458_v37 = vpack.c.bf16 %v4671_v63, %v4671_v63 }
 0x387   : > { %4690 = vst.msk [vmem:[%s518_s22 + $0x4] sm:$0xf] %vm4688_vm0, %v5456_v31  ;;  %4689 = vst.msk [vmem:[%s518_s22] sm:$0xf] %vm4688_vm0, %v5455_v17 }
 0x388   : > { %4691 = vst.msk [vmem:[%s518_s22 + $0x8] sm:$0xf] %vm4688_vm0, %v5457_v62  ;;  %4692 = vst.msk [vmem:[%s518_s22 + $0xc] sm:$0xf] %vm4688_vm0, %v5458_v37 }
 0x389   : > { %6259 = shalt.err (!%p6256_p3)
}
 0x38a   : > { %s6260_s27 = scalar_lea.hbm %s7813_s29, 256  ;;  %s6264_s30 = scalar_lea.hbm %s7872_s13, 512 }
 0x38b   : > { %p6261_p4 = scmp.ne.s32.totalorder %s7813_s29, %s6260_s27  ;;  %p6265_p9 = scmp.lt.s32.totalorder %s7813_s29, %s7872_s13 }
 0x38c   : > { %p6266_p10 = scmp.lt.s32.totalorder %s6264_s30, %s6260_s27 }
 0x38d   : > { %p6262_p7 = pnand %p6261_p4, %p6442_p5 }
 0x38e   : > { %p6267_p11 = por %p6266_p10, %p6265_p9 }
 0x38f   : > { %p6263_p8 = pneg %p6262_p7 }
 0x391   : > { %p6268_p12 = pnand %p6267_p11, %p6263_p8 }
 0x393   : > { %6271 = shalt.err (!%p6268_p12)
}
 0x394   : > { %s6332_s14 = smov 64   ;;  %s6333_s21 = smov 4  }
 0x395   : > { %5991 = dma.vmem_to_hbm [thread:$0]  (%p6442_p5), %s7815_s24, 256, %s7813_s29, %s7819_s16, %s6332_s14, %s6332_s14, %s6333_s21  }
 0x396 PF: > { %p5997_p13 = scmp.ge.s32.totalorder %s6326_s28, 2  ;;  %s4722_s15 = sand.u32 1, %s6314_s25  }
 0x397   : > { %s4723_s27 = scalar_lea.sflag [#allocation6], %s4722_s15 }
 0x398   : > { %p5994_p0 = pnand %p5997_p13, %p6446_p6 }
 0x39a   : > { %p5995_p1 = pneg %p5994_p0 }
 0x39c   : > { %6289 = dma.done.wait (%p5995_p1), %s4723_s27, 256  }
 0x39d   : > { %6291 = vsyncadd (%p5995_p1), %s4723_s27, 4294967040  ;;  %s7919_s28 = sld [smem:[#allocation9_spill]]  ;;  %s7922_s25 = smov %s6318_s26 }
 0x39e   : > { %s7920_s17 = sld [smem:[#allocation8_spill]] }
 0x39f   : > { %s7921_s27 = sld [smem:[#allocation10_spill]] }
 0x3a3   : > { %p23_p2 = scmp.ge.s32.totalorder %s7919_s28, 4  }
 0x3a4   : > { %s7923_s26 = smov %s7920_s17 }
 0x3a5   :  { %25 = sbr.rel (!%p23_p2) target bundleno = 3 (0x3), region = 152 }
 0x3aa   :  { %4728 = vsyncpa [#allocation6], 1 }
 0x3ab   :  { %4730 = vsyncpa [#allocation6 + $0x1], 1 }

</bundles_post_ra>
